<compile_context>
chip_gen: v7x
topology: tpu7x:2x2x1
jax: 0.10.0
libtpu: 0.0.40
codegen_flags: <defaults>
</compile_context>

<pallas_src>
import functools

import jax
import jax.numpy as jnp
from jax.experimental import pallas as pl
from jax.experimental.pallas import tpu as pltpu


# ----------------------------------------------------------------------------
# Pallas kernel: one (HW-tile, batch) grid step
# ----------------------------------------------------------------------------
def _slice_kernel(grid_ref, guide_ref, wyx_ref, out_ref, *, C, D):
    """out[c, p] = sum_d hat(iz[p] - d) * (grid[c*D+d, :] @ wyx[:, p])."""
    g2 = grid_ref[0]                                    # (C*D, Hg*Wg)
    wyx = wyx_ref[...]                                  # (Hg*Wg, T)   T = HW tile
    # x/y bilinear taps for every output pixel of this tile: one MXU matmul.
    up = jnp.dot(g2, wyx, preferred_element_type=jnp.float32)   # (C*D, T)
    T = up.shape[1]

    # depth (z) hat weights from the guidemap (grid_sample trilinear,
    # align_corners=False; padding_mode='zeros' => out-of-range slices weight 0).
    guide = guide_ref[0]                                # (1, T)
    iz = (guide + 1.0) * (D * 0.5) - 0.5                # unnormalized depth coord
    d_idx = jax.lax.broadcasted_iota(jnp.int32, (D, T), 0).astype(jnp.float32)
    wz = jnp.maximum(0.0, 1.0 - jnp.abs(iz - d_idx))    # (D, T), broadcast in-kernel

    up3 = up.reshape(C, D, T)                           # split leading (sublane) dim
    out = jnp.sum(up3 * wz[None, :, :], axis=1)         # (C, T)
    out_ref[0] = out.astype(out_ref.dtype)


# ----------------------------------------------------------------------------
# Wrapper glue (data-independent setup + layout plumbing only)
# ----------------------------------------------------------------------------
def _interp_matrix(out_size, in_size):
    """Hat-weight matrix reproducing F.grid_sample bilinear weights along one
    axis (align_corners=False, padding_mode='zeros') for the normalized
    coordinates arange(out)/(out-1)*2-1 used by Slice."""
    pos = jnp.arange(out_size, dtype=jnp.float32)
    coord = pos / (out_size - 1) * 2.0 - 1.0
    pix = (coord + 1.0) * (in_size * 0.5) - 0.5          # unnormalize
    src = jnp.arange(in_size, dtype=jnp.float32)
    return jnp.maximum(0.0, 1.0 - jnp.abs(pix[:, None] - src[None, :]))  # (out, in)


def _pick_tile(total, target):
    """Largest multiple of 128 <= target that divides total, else full extent."""
    if total <= target:
        return total
    t = (target // 128) * 128
    while t >= 128:
        if total % t == 0:
            return t
        t -= 128
    return total


def slice_forward(bilateral_grid, guidemap, *, tile_cols=2048,
                  vmem_limit=32 * 1024 * 1024):
    N, C, D, Hg, Wg = bilateral_grid.shape
    Ng, _, H, W = guidemap.shape
    assert Ng == N
    K, HW = Hg * Wg, H * W

    # Fused (y, x) interpolation weights: Wyx[gy*Wg+gx, h*W+w] = wy[h,gy]*wx[w,gx].
    # This is the torch.meshgrid / coordinate-normalization part of Slice,
    # data-independent, built once per shape.
    wy = _interp_matrix(H, Hg)                           # (H, Hg)
    wx = _interp_matrix(W, Wg)                           # (W, Wg)
    wyx = (wy.T.reshape(Hg, 1, H, 1) * wx.T.reshape(1, Wg, 1, W)).reshape(K, HW)

    grid2 = bilateral_grid.reshape(N, C * D, K)          # free row-major merges
    guide2 = guidemap.reshape(N, 1, HW)

    T = _pick_tile(HW, tile_cols)                        # lane-dense output tile
    n_t = HW // T

    kernel = functools.partial(_slice_kernel, C=C, D=D)
    out = pl.pallas_call(
        kernel,
        out_shape=jax.ShapeDtypeStruct((N, C, HW), jnp.float32),
        grid_spec=pltpu.PrefetchScalarGridSpec(
            num_scalar_prefetch=0,
            grid=(n_t, N),                   # HW tiles outer, batch inner:
            in_specs=[                       # the big wyx tile stays resident across n
                pl.BlockSpec((1, C * D, K), lambda t, n: (n, 0, 0)),
                pl.BlockSpec((1, 1, T), lambda t, n: (n, 0, t)),
                pl.BlockSpec((K, T), lambda t, n: (0, t)),
            ],
            out_specs=pl.BlockSpec((1, C, T), lambda t, n: (n, 0, t)),
        ),
        compiler_params=pltpu.CompilerParams(
            dimension_semantics=("parallel", "parallel"),
            vmem_limit_bytes=vmem_limit,
        ),
        cost_estimate=pl.CostEstimate(
            flops=2 * N * C * D * K * HW + 4 * N * C * D * HW,
            transcendentals=0,
            bytes_accessed=4 * (N * C * D * K + N * HW + K * HW + N * C * HW),
        ),
    )(grid2, guide2, wyx)
    return out.reshape(N, C, H, W)


# ----------------------------------------------------------------------------
# Pure-XLA reference (same math, completely different code path) for self-check
# ----------------------------------------------------------------------------
def slice_reference(bilateral_grid, guidemap):
    N, C, D, Hg, Wg = bilateral_grid.shape
    _, _, H, W = guidemap.shape
    wy = _interp_matrix(H, Hg)
    wx = _interp_matrix(W, Wg)
    up = jnp.einsum('ncdyx,hy,wx->ncdhw', bilateral_grid, wy, wx,
                    precision=jax.lax.Precision.HIGHEST)
    gz = (guidemap[:, 0] + 1.0) * (D * 0.5) - 0.5                   # (N, H, W)
    d = jnp.arange(D, dtype=jnp.float32)
    wz = jnp.maximum(0.0, 1.0 - jnp.abs(gz[..., None] - d))         # (N, H, W, D)
    return jnp.einsum('ncdhw,nhwd->nchw', up, wz,
                      precision=jax.lax.Precision.HIGHEST)


if __name__ == "__main__":
    key = jax.random.PRNGKey(0)
    k1, k2 = jax.random.split(key)

    # HDRNet-style Slice shapes: 12 coeff channels (nin*nout = 3*4), 8 luma bins,
    # 16x16 spatial grid, 64x64 full-resolution guidemap.
    N, C, D, Hg, Wg = 2, 12, 8, 16, 16
    H, W = 64, 64
    bilateral_grid = jax.random.normal(k1, (N, C, D, Hg, Wg), jnp.float32)
    guidemap = jax.random.uniform(k2, (N, 1, H, W), jnp.float32)    # sigmoid-like

    out = slice_forward(bilateral_grid, guidemap)
    out = jax.block_until_ready(out)

    assert out.shape == (N, C, H, W), out.shape
    assert bool(jnp.all(jnp.isfinite(out)))
    ref = slice_reference(bilateral_grid, guidemap)
    assert bool(jnp.allclose(out, ref, atol=5e-2, rtol=5e-2)), \
        float(jnp.max(jnp.abs(out - ref)))
    print("KERNEL_OK")
</pallas_src>

<mosaic_0001>
module attributes {stable_mosaic.version = 11 : i64} {
  func.func @_slice_kernel(%arg0: i32, %arg1: i32, %arg2: memref<1x96x256xf32, #tpu.memory_space<vmem>>, %arg3: memref<1x1x2048xf32, #tpu.memory_space<vmem>>, %arg4: memref<256x2048xf32, #tpu.memory_space<vmem>>, %arg5: memref<1x12x2048xf32, #tpu.memory_space<vmem>>) attributes {dimension_semantics = [#tpu.dimension_semantics<parallel>, #tpu.dimension_semantics<parallel>], iteration_bounds = array<i64: 2, 2>, scalar_prefetch = 0 : i64, scratch_operands = 0 : i64, tpu.core_type = #tpu.core_type<tc>, window_params = [{transform_indices = @transform_0, window_bounds = array<i64: 1, 96, 256>}, {transform_indices = @transform_1, window_bounds = array<i64: 1, 1, 2048>}, {transform_indices = @transform_2, window_bounds = array<i64: 256, 2048>}, {transform_indices = @transform_3, window_bounds = array<i64: 1, 12, 2048>}]} {
    %c0 = arith.constant 0 : index
    %c0_0 = arith.constant 0 : index
    %c0_1 = arith.constant 0 : index
    %0 = vector.load %arg2[%c0, %c0_0, %c0_1] : memref<1x96x256xf32, #tpu.memory_space<vmem>>, vector<1x96x256xf32>
    %1 = vector.shape_cast %0 : vector<1x96x256xf32> to vector<96x256xf32>
    %c0_2 = arith.constant 0 : index
    %c0_3 = arith.constant 0 : index
    %2 = vector.load %arg4[%c0_2, %c0_3] : memref<256x2048xf32, #tpu.memory_space<vmem>>, vector<256x2048xf32>
    %cst = arith.constant dense<0.000000e+00> : vector<96x2048xf32>
    %3 = tpu.matmul %1, %2, %cst {dimension_numbers = #tpu.dot_dimension_numbers<[1], [0], [0], [1], [0, 0, 1, 1], [], []>} : vector<96x256xf32>, vector<256x2048xf32>, vector<96x2048xf32> -> vector<96x2048xf32>
    %c0_4 = arith.constant 0 : index
    %c0_5 = arith.constant 0 : index
    %c0_6 = arith.constant 0 : index
    %4 = vector.load %arg3[%c0_4, %c0_5, %c0_6] : memref<1x1x2048xf32, #tpu.memory_space<vmem>>, vector<1x1x2048xf32>
    %5 = vector.shape_cast %4 : vector<1x1x2048xf32> to vector<1x2048xf32>
    %cst_7 = arith.constant 1.000000e+00 : f32
    %6 = vector.broadcast %cst_7 : f32 to vector<1x2048xf32>
    %7 = arith.addf %5, %6 : vector<1x2048xf32>
    %cst_8 = arith.constant 4.000000e+00 : f32
    %8 = vector.broadcast %cst_8 : f32 to vector<1x2048xf32>
    %9 = arith.mulf %7, %8 : vector<1x2048xf32>
    %cst_9 = arith.constant 5.000000e-01 : f32
    %10 = vector.broadcast %cst_9 : f32 to vector<1x2048xf32>
    %11 = arith.subf %9, %10 : vector<1x2048xf32>
    %12 = tpu.iota {dimensions = array<i32: 0>} : vector<8x2048xi32>
    %13 = arith.sitofp %12 : vector<8x2048xi32> to vector<8x2048xf32>
    %14 = vector.broadcast %11 : vector<1x2048xf32> to vector<8x2048xf32>
    %15 = arith.subf %14, %13 : vector<8x2048xf32>
    %16 = math.absf %15 : vector<8x2048xf32>
    %cst_10 = arith.constant 1.000000e+00 : f32
    %17 = vector.broadcast %cst_10 : f32 to vector<8x2048xf32>
    %18 = arith.subf %17, %16 : vector<8x2048xf32>
    %cst_11 = arith.constant 0.000000e+00 : f32
    %19 = vector.broadcast %cst_11 : f32 to vector<8x2048xf32>
    %20 = arith.maximumf %19, %18 : vector<8x2048xf32>
    %21 = vector.shape_cast %3 : vector<96x2048xf32> to vector<12x8x2048xf32>
    %22 = vector.shape_cast %20 : vector<8x2048xf32> to vector<1x8x2048xf32>
    %23 = vector.broadcast %22 : vector<1x8x2048xf32> to vector<12x8x2048xf32>
    %24 = arith.mulf %21, %23 : vector<12x8x2048xf32>
    %cst_12 = arith.constant dense<0.000000e+00> : vector<12x2048xf32>
    %25 = vector.multi_reduction <add>, %24, %cst_12 [1] : vector<12x8x2048xf32> to vector<12x2048xf32>
    %c0_13 = arith.constant 0 : index
    %c0_14 = arith.constant 0 : index
    %c0_15 = arith.constant 0 : index
    %26 = vector.load %arg5[%c0_13, %c0_14, %c0_15] : memref<1x12x2048xf32, #tpu.memory_space<vmem>>, vector<1x12x2048xf32>
    %27 = vector.shape_cast %26 : vector<1x12x2048xf32> to vector<12x2048xf32>
    %28 = vector.shape_cast %25 : vector<12x2048xf32> to vector<1x12x2048xf32>
    tpu.vector_store %arg5[%c0_13, %c0_14, %c0_15], %28 {strides = array<i32>} : memref<1x12x2048xf32, #tpu.memory_space<vmem>>, vector<1x12x2048xf32>,
    return
  }
  func.func @transform_0(%arg0: i32, %arg1: i32) -> (i32, i32, i32) {
    %c0_i32 = arith.constant 0 : i32
    %c0_i32_0 = arith.constant 0 : i32
    %c0_i32_1 = arith.constant 0 : i32
    return %arg1, %c0_i32, %c0_i32_0 : i32, i32, i32
  }
  func.func @transform_1(%arg0: i32, %arg1: i32) -> (i32, i32, i32) {
    %c0_i32 = arith.constant 0 : i32
    %c0_i32_0 = arith.constant 0 : i32
    return %arg1, %c0_i32, %arg0 : i32, i32, i32
  }
  func.func @transform_2(%arg0: i32, %arg1: i32) -> (i32, i32) {
    %c0_i32 = arith.constant 0 : i32
    %c0_i32_0 = arith.constant 0 : i32
    return %c0_i32, %arg0 : i32, i32
  }
  func.func @transform_3(%arg0: i32, %arg1: i32) -> (i32, i32, i32) {
    %c0_i32 = arith.constant 0 : i32
    %c0_i32_0 = arith.constant 0 : i32
    return %arg1, %c0_i32, %arg0 : i32, i32, i32
  }
}

</mosaic_0001>

<bundles_post_ra>
// kernel: tpu_custom_call.1
= control target key start
LH: loop header
LB: loop body
LE: loop exit
PB: predicated region body
PF: predicated region fallthrough
CT: control target
= control target key end

     0   :  { %s7352_s0 = inlined_call_operand.hbm [shape: f32[2,96,256], index: 0, kind: input, shape index: {}]   ;;  %s7353_s1 = inlined_call_operand.hbm [shape: f32[2,1,4096], index: 1, kind: input, shape index: {}]   ;;  %s7354_s2 = inlined_call_operand.hbm [shape: f32[256,4096], index: 2, kind: input, shape index: {}]   ;;  %s7355_s3 = inlined_call_operand.vmem [shape: f32[2,12,4096], index: 3, kind: output, shape index: {}]  }
   0x1   :  { %7379 = sst [smem:[#allocation69_spill]] %s7352_s0 }
   0x2   :  { %7380 = sst [smem:[#allocation70_spill]] %s7353_s1 }
   0x3   :  { %7381 = sst [smem:[#allocation71_spill]] %s7355_s3 }
   0x4   :  { %8 = vsyncpa [#allocation3], 0 }
   0x5   :  { %10 = vsyncpa [#allocation3 + $0x1], 0 }
   0x6   :  { %11 = vsyncpa [#allocation5], 0 }
   0x7   :  { %13 = vsyncpa [#allocation5 + $0x1], 0  ;;  %s4990_s12 = smov 0   ;;  %s4992_s13 = smov 0  }
   0x8   :  { %s4994_s14 = smov 0   ;;  %s4996_s15 = smov 0  }
   0x9   :  { %s4998_s16 = smov 0   ;;  %s5000_s17 = smov 0  }
   0xa   :  { %s5002_s18 = smov 0   ;;  %s5004_s19 = smov 0  }
   0xb   :  { %s5006_s20 = smov 0   ;;  %s5008_s21 = smov 0  }
   0xc   :  { %s5010_s22 = smov 0   ;;  %s5012_s23 = smov 0  }
   0xd   :  { %s5014_s24 = smov 0   ;;  %s5016_s25 = smov 0  }
   0xe LB: > { %7382 = sst [smem:[#allocation11_spill]] %s4944_s21  ;;  %s5059_s26 = sadd.s32 4294967295, %s4960_s25   ;;  %s4960_s25 = sphi %s5016_s25, %s19_s25   ;;  %s4956_s24 = sphi %s5014_s24, %s7586_s24   ;;  %s4952_s23 = sphi %s5012_s23, %s7574_s23   ;;  %s4948_s22 = sphi %s5010_s22, %s7585_s22   ;;  %s4944_s21 = sphi %s5008_s21, %s7573_s21   ;;  %s4940_s20 = sphi %s5006_s20, %s7584_s20   ;;  %s4936_s19 = sphi %s5004_s19, %s7583_s19   ;;  %s4932_s18 = sphi %s5002_s18, %s7582_s18   ;;  %s4928_s17 = sphi %s5000_s17, %s7581_s17   ;;  %s4924_s16 = sphi %s4998_s16, %s7580_s16   ;;  %s4920_s15 = sphi %s4996_s15, %s7579_s15   ;;  %s4916_s14 = sphi %s4994_s14, %s7578_s14   ;;  %s4912_s13 = sphi %s4992_s13, %s7577_s13   ;;  %s4908_s12 = sphi %s4990_s12, %s7576_s12  }
   0xf   : > { %7383 = sst [smem:[#allocation12_spill]] %s4948_s22  ;;  %s28_s27 = sadd.s32 1, %s4952_s23 }
  0x10   : > { %7384 = sst [smem:[#allocation13_spill]] %s4952_s23  ;;  %p29_p0 = scmp.ge.s32.totalorder %s28_s27, 2 }
  0x11   : > { %s31_s28 = sadd.s32 1, %s4956_s24  ;;  %p7361_p1 = scmp.eq.s32.totalorder %s4960_s25, 0 }
  0x12   : > { %p7360_p2 = scmp.eq.s32.totalorder %s5059_s26, 0  ;;  %s7588_s27 = smov (%p29_p0, %s28_s27), 0 }
  0x13   : > { %7385 = sst [smem:[#allocation14_spill]] %s7588_s27  ;;  %s7590_s28 = smov (!%p29_p0, %s31_s28), %s4956_s24 }
  0x14   : > { %s5070_s29 = ssub.s32 %s4952_s23, %s7588_s27  ;;  %s66_s30 = sadd.s32 1, %s4928_s17 }
  0x15   : > { %p33_p3 = scmp.ge.s32.totalorder %s7590_s28, 2  ;;  %p73_p5 = scmp.ne.s32.totalorder %s4928_s17, %s4924_s16 }
  0x16   : > { %p79_p6 = scmp.ne.s32.totalorder %s4924_s16, %s4920_s15  ;;  %s92_s7 = sadd.s32 1, %s4916_s14 }
  0x17   : > { %s7592_s28 = smov (%p33_p3, %s7590_s28), 0  ;;  %p5084_p7 = por %p73_p5, %p7361_p1 }
  0x18   : > { %7386 = sst [smem:[#allocation15_spill]] %s7592_s28  ;;  %p5090_p8 = por %p79_p6, %p7360_p2 }
  0x19   : > { %s62_s6 = ssub.s32 %s4956_s24, %s7592_s28  ;;  %p99_p11 = scmp.ne.s32.totalorder %s4916_s14, %s4912_s13 }
  0x1a   : > { %s7388_s5 = scalar_select %p5090_p8, 1, 0 }
  0x1b   : > { %s63_s8 = sor.u32 %s62_s6, %s5070_s29  ;;  %p90_p9 = scmp.eq.s32.totalorder %s62_s6, 0 }
  0x1c   : > { %p64_p10 = scmp.eq.s32.totalorder %s63_s8, 0  ;;  %p5108_p12 = por %p99_p11, %p7361_p1 }
  0x1d   : > { %s5101_s9 = scalar_select %p90_p9, %s4916_s14, %s92_s7  }
  0x1e   : > { %s5104_s10 = scalar_select %p64_p10, %s4928_s17, %s66_s30  }
  0x1f   : > { %7389 = sst [smem:[#allocation16_spill]] %s5101_s9  ;;  %p105_p13 = scmp.ne.s32.totalorder %s4912_s13, %s4908_s12 }
  0x20   : > { %7390 = sst [smem:[#allocation17_spill]] %s5104_s10  ;;  %p131_p0 = scmp.eq.s32.totalorder %s5059_s26, 3 }
  0x21   : > { %p5117_p3 = por %p105_p13, %p7360_p2  ;;  %p7362_p6 = scmp.lt.s32.totalorder %s4960_s25, 4 }
  0x22   : > { %p5125_p9 = por %p131_p0, %p73_p5  ;;  %s178_s6 = sand.u32 1, %s4960_s25  }
  0x23   : > { %s7392_s15 = scalar_select %p5117_p3, 1, 0 }
  0x24   : > { %s7394_s30 = scalar_select %p5125_p9, 1, 0 }
  0x25   : > { %7393 = sst [smem:[#allocation18_spill]] %s7392_s15  ;;  %s180_s12 = sand.u32 1, %s4928_s17  }
  0x26   : > { %s4055_s7 = sshll.u32 %s180_s12, 4  ;;  %s4056_s8 = sshll.u32 %s4956_s24, 4 }
  0x27   : > { %s4057_s28 = sshll.u32 %s4952_s23, 5  ;;  %s182_s10 = scalar_lea.vmem [#allocation4], %s4055_s7 }
  0x28   : > { %s188_s27 = sadd.s32 %s4057_s28, %s4056_s8  ;;  %s192_s9 = sshll.u32 %s182_s10, 4  ;;  %s5133_s9 = int_to_ptr.vmem [resolvable:$true] %s192_s9 }
  0x29   : > { %s4058_s3 = sshll.u32 %s188_s27, 4  ;;  %s7395_s1 = sld [smem:[#allocation70_spill]] }
  0x2a   : > { %p5144_p5 = pnand %p7362_p6, %p5084_p7  ;;  %p5152_p10 = pnand %p7362_p6, %p5108_p12 }
  0x2c   : > { %p4750_p2 = pneg %p5144_p5 }
  0x2f   : > { %s5138_s15 = scalar_lea.hbm %s7395_s1, %s4058_s3  ;;  %s5158_s3 = scalar_lea.sflag [#allocation5], %s178_s6 }
  0x30   : > { %s4748_s21 = scalar_lea.hbm %s5138_s15, 256  ;;  %s4753_s4 = scalar_lea.hbm %s7395_s1, 1024 }
  0x31   : > { %p4749_p0 = scmp.ne.s32.totalorder %s5138_s15, %s4748_s21  ;;  %p4754_p12 = scmp.lt.u32.totalorder %s5138_s15, %s7395_s1 }
  0x32   : > { %p4755_p6 = scmp.lt.u32.totalorder %s4753_s4, %s4748_s21  ;;  %p4757_p11 = scmp.lt.u32.totalorder %s4748_s21, %s5138_s15 }
  0x33   : > { %p4751_p7 = pnand %p4750_p2, %p4749_p0 }
  0x34   : > { %p4756_p4 = por %p4755_p6, %p4754_p12 }
  0x35   : > { %p4752_p1 = pneg %p4751_p7 }
  0x36   : > { %p4758_p13 = por %p4757_p11, %p4756_p4 }
  0x38   : > { %p4759_p9 = pnand %p4758_p13, %p4752_p1 }
  0x3a   : > { %4762 = shalt.err (!%p4759_p9)
}
  0x3b   : > { %s4763_s6 = scalar_lea.vmem %s5133_s9, 256  ;;  %s4962_s7 = smov [#allocation4]  }
  0x3c   : > { %p4764_p0 = scmp.ne.s32.totalorder %s5133_s9, %s4763_s6  ;;  %s4768_s8 = sshll.u32 %s4962_s7, 4  ;;  %s4769_s8 = int_to_ptr.vmem [resolvable:$false] %s4768_s8 }
  0x3d   : > { %s4770_s22 = scalar_lea.vmem %s4769_s8, 512  ;;  %p4771_p8 = scmp.lt.s32.totalorder %s5133_s9, %s4769_s8 }
  0x3e   : > { %p4766_p7 = pnand %p4764_p0, %p4750_p2  ;;  %p4772_p6 = scmp.lt.s32.totalorder %s4770_s22, %s4763_s6 }
  0x40   : > { %p4767_p3 = pneg %p4766_p7  ;;  %p4773_p12 = por %p4772_p6, %p4771_p8 }
  0x42   : > { %p4774_p4 = pnand %p4773_p12, %p4767_p3 }
  0x44   : > { %4777 = shalt.err (!%p4774_p4)
}
  0x45   : > { %4602 = dma.hbm_to_vmem [thread:$0]  (!%p5144_p5), %s5138_s15, 256, %s5133_s9, %s5158_s3  }
  0x46   : > { %p7398_p1 = scmp.lt.s32.totalorder %s4960_s25, 5  ;;  %p7399_p2 = scmp.ge.s32.totalorder %s4960_s25, 1 }
  0x47   : > { %s38_s21 = sadd.s32 1, %s4940_s20  ;;  %p45_p3 = scmp.ne.s32.totalorder %s4940_s20, %s4936_s19 }
  0x48   : > { %p5190_p8 = pnand %p7399_p2, %p7398_p1  ;;  %p7401_p9 = scmp.eq.s32.totalorder %s5070_s29, 0 }
  0x49   : > { %p7403_p11 = scmp.eq.s32.totalorder %s4960_s25, 0  ;;  %p51_p0 = scmp.ne.s32.totalorder %s4936_s19, %s4932_s18 }
  0x4a   : > { %s7400_s12 = scalar_select %p5190_p8, 1, 0 }
  0x4b   : > { %s5200_s28 = scalar_select %p7401_p9, %s4940_s20, %s38_s21  }
  0x4c   : > { %p47_p13 = por %p7403_p11, %p45_p3  ;;  %s157_s4 = sand.u32 1, %s4940_s20  }
  0x4d   : > { %7402 = sst [smem:[#allocation19_spill]] %s5200_s28  ;;  %s4588_s10 = smul.u32 3072, %s4952_s23 }
  0x4e   : > { %p7404_p7 = scmp.eq.s32.totalorder %s5059_s26, 0  ;;  %s4587_s15 = smul.u32 192, %s157_s4 }
  0x4f   : > { %s7406_s0 = sld [smem:[#allocation69_spill]]  ;;  %p7407_p5 = scmp.lt.s32.totalorder %s4960_s25, 4 }
  0x50   : > { %p5210_p6 = por %p7404_p7, %p51_p0  ;;  %s161_s29 = scalar_lea.vmem [#allocation2], %s4587_s15 }
  0x51   : > { %p5221_p12 = pnand %p7407_p5, %p47_p13  ;;  %s168_s8 = sshll.u32 %s161_s29, 4  ;;  %s5225_s8 = int_to_ptr.vmem [resolvable:$true] %s168_s8 }
  0x52   : > { %s7405_s9 = scalar_select %p5210_p6, 1, 0 }
  0x53   : > { %s201_s22 = sand.u32 1, %s4916_s14   ;;  %s5228_s21 = scalar_lea.sflag [#allocation3], %s157_s4 }
  0x54   : > { %p4780_p1 = pneg %p5221_p12 }
  0x55   : > { %s5217_s7 = scalar_lea.hbm %s7406_s0, %s4588_s10  ;;  %s4783_s1 = scalar_lea.hbm %s7406_s0, 6144 }
  0x56   : > { %s4778_s10 = scalar_lea.hbm %s5217_s7, 3072  ;;  %p4784_p9 = scmp.lt.u32.totalorder %s5217_s7, %s7406_s0 }
  0x57   : > { %p4779_p4 = scmp.ne.s32.totalorder %s5217_s7, %s4778_s10  ;;  %p4785_p11 = scmp.lt.u32.totalorder %s4783_s1, %s4778_s10 }
  0x58   : > { %p4787_p0 = scmp.lt.u32.totalorder %s4778_s10, %s5217_s7 }
  0x59   : > { %p4781_p2 = pnand %p4780_p1, %p4779_p4  ;;  %p4786_p13 = por %p4785_p11, %p4784_p9 }
  0x5b   : > { %p4782_p3 = pneg %p4781_p2  ;;  %p4788_p7 = por %p4787_p0, %p4786_p13 }
  0x5d   : > { %p4789_p5 = pnand %p4788_p7, %p4782_p3 }
  0x5f   : > { %4792 = shalt.err (!%p4789_p5)
}
  0x60   : > { %s4793_s4 = scalar_lea.vmem %s5225_s8, 3072  ;;  %s4963_s29 = smov [#allocation2]  }
  0x61   : > { %p4794_p4 = scmp.ne.s32.totalorder %s5225_s8, %s4793_s4  ;;  %s4798_s11 = sshll.u32 %s4963_s29, 4  ;;  %s4799_s11 = int_to_ptr.vmem [resolvable:$false] %s4798_s11 }
  0x62   : > { %s4800_s23 = scalar_lea.vmem %s4799_s11, 6144  ;;  %p4801_p8 = scmp.lt.s32.totalorder %s5225_s8, %s4799_s11 }
  0x63   : > { %p4796_p2 = pnand %p4794_p4, %p4780_p1  ;;  %p4802_p9 = scmp.lt.s32.totalorder %s4800_s23, %s4793_s4 }
  0x65   : > { %p4797_p6 = pneg %p4796_p2  ;;  %p4803_p11 = por %p4802_p9, %p4801_p8 }
  0x67   : > { %p4804_p13 = pnand %p4803_p11, %p4797_p6 }
  0x69   : > { %4807 = shalt.err (!%p4804_p13)
}
  0x6a   : > { %s4964_s1 = smov 256   ;;  %s4965_s10 = smov 16  }
  0x6b   : > { %4599 = dma.hbm_to_vmem [thread:$0]  (!%p5221_p12), %s5217_s7, 3072, %s5225_s8, %s5228_s21, %s4964_s1, %s4964_s1, %s4965_s10  }
  0x6c   : > { %s4059_s6 = sshll.u32 %s201_s22, 12  ;;  %s4074_s15 = sshll.u32 %s4956_s24, 11 }
  0x6d   : > { %s5262_s11 = scalar_lea.hbm %s7354_s2, %s4074_s15  ;;  %s203_s23 = scalar_lea.vmem [#allocation6], %s4059_s6 }
  0x6e   : > { %s210_s0 = sshll.u32 %s203_s23, 4  ;;  %s4808_s28 = scalar_lea.hbm %s5262_s11, 65536  ;;  %s5264_s0 = int_to_ptr.vmem [resolvable:$true] %s210_s0 }
  0x6f   : > { %p4809_p8 = scmp.ne.s32.totalorder %s5262_s11, %s4808_s28  ;;  %p4810_p6 = pneg %p5152_p10 }
  0x70   : > { %s4813_s8 = scalar_lea.hbm %s7354_s2, 131072  ;;  %p4814_p3 = scmp.lt.u32.totalorder %s5262_s11, %s7354_s2 }
  0x71   : > { %p4811_p12 = pnand %p4810_p6, %p4809_p8  ;;  %p4815_p0 = scmp.lt.u32.totalorder %s4813_s8, %s4808_s28 }
  0x72   : > { %p4817_p5 = scmp.lt.u32.totalorder %s4808_s28, %s5262_s11 }
  0x73   : > { %p4812_p1 = pneg %p4811_p12  ;;  %p4816_p7 = por %p4815_p0, %p4814_p3 }
  0x75   : > { %p4818_p4 = por %p4817_p5, %p4816_p7 }
  0x77   : > { %p4819_p2 = pnand %p4818_p4, %p4812_p1 }
  0x79   : > { %4822 = shalt.err (!%p4819_p2)
}
  0x7a   : > { %s4823_s1 = scalar_lea.vmem %s5264_s0, 65536  ;;  %s4966_s10 = smov [#allocation6]  }
  0x7b   : > { %p4824_p9 = scmp.ne.s32.totalorder %s5264_s0, %s4823_s1  ;;  %s4828_s6 = sshll.u32 %s4966_s10, 4  ;;  %s4829_s6 = int_to_ptr.vmem [resolvable:$false] %s4828_s6 }
  0x7c   : > { %s4830_s15 = scalar_lea.vmem %s4829_s6, 131072  ;;  %p4831_p8 = scmp.lt.s32.totalorder %s5264_s0, %s4829_s6 }
  0x7d   : > { %p4826_p11 = pnand %p4824_p9, %p4810_p6  ;;  %p4832_p12 = scmp.lt.s32.totalorder %s4830_s15, %s4823_s1 }
  0x7f   : > { %p4827_p13 = pneg %p4826_p11  ;;  %p4833_p3 = por %p4832_p12, %p4831_p8 }
  0x81   : > { %p4834_p0 = pnand %p4833_p3, %p4827_p13 }
  0x83   : > { %4837 = shalt.err (!%p4834_p0)
}
  0x84   : > { %s4967_s28 = smov 4096   ;;  %s4968_s29 = smov 2048  }
  0x85   : > { %s4969_s4 = smov 128   ;;  %p7409_p6 = scmp.ne.s32.totalorder %s7400_s12, 0 }
  0x86   : > { %4605 = dma.hbm_to_vmem [thread:$0]  (!%p5152_p10), %s5262_s11, 65536, %s5264_s0, %s5158_s3, %s4967_s28, %s4968_s29, %s4969_s4  }
  0x87   : > { %222 = sbr.rel (%p7409_p6) target bundleno = 850 (0x352), region = 32 }
  0x8e   : > { %s224_s23 = sand.u32 1, %s4936_s19   ;;  %p7410_p1 = scmp.ne.s32.totalorder %s7405_s9, 0 }
  0x8f   : > { %s4589_s7 = smul.u32 192, %s224_s23  ;;  %s225_s18 = scalar_lea.sflag [#allocation3], %s224_s23 }
  0x91   : > { %s5295_s8 = scalar_lea.vmem [#allocation2], %s4589_s7 }
  0x92   : > { %4895 = dma.done.wait (%p7410_p1), %s225_s18, 3072  }
  0x93   : > { %4897 = vsyncadd (%p7410_p1), %s225_s18, 4294964224  ;;  %s233_s0 = sand.u32 1, %s5059_s26   ;;  %s235_s27 = sand.u32 1, %s4924_s16  }
  0x94   : > { %s5305_s3 = sshll.u32 %s235_s27, 4  ;;  %s234_s12 = scalar_lea.sflag [#allocation5], %s233_s0 }
  0x95   : > { %s237_s11 = scalar_lea.vmem [#allocation4], %s5305_s3  ;;  %p7411_p10 = scmp.ne.s32.totalorder %s7388_s5, 0 }
  0x97   : > { %4899 = dma.done.wait (%p7411_p10), %s234_s12, 256  }
  0x98   : > { %4901 = vsyncadd (%p7411_p10), %s234_s12, 4294967040  ;;  %s7412_s9 = sld [smem:[#allocation18_spill]]  ;;  %s244_s22 = sand.u32 1, %s4912_s13  }
  0x99   : > { %s4064_s21 = sshll.u32 %s244_s22, 12 }
  0x9a   : > { %s5313_s1 = scalar_lea.vmem [#allocation6], %s4064_s21 }
  0x9e   : > { %p7413_p7 = scmp.ne.s32.totalorder %s7412_s9, 0 }
  0xa0   : > { %4903 = dma.done.wait (%p7413_p7), %s234_s12, 65536  }
  0xa1   : > { %4905 = vsyncadd (%p7413_p7), %s234_s12, 4294901760  ;;  %v306_v0 = vld [vmem:[%s5313_s1 + $0x8] sm:$0xff]  ;;  %v308_v2 = vld [vmem:[%s5313_s1 + $0x18] sm:$0xff]  ;;  %vm3606_vm0 = vcmask 1041409   ;;  %vm3608_vm1 = vcmask 1042434   ;;  %vm3610_vm2 = vcmask 1043459  }
  0xa2   : > { %v322_v1 = vld [vmem:[%s5313_s1 + $0x88] sm:$0xff]  ;;  %v324_v4 = vld [vmem:[%s5313_s1 + $0x98] sm:$0xff]  ;;  %v305_v5 = vld [vmem:[%s5313_s1] sm:$0xff]  ;;  %vm3612_vm3 = vcmask 1044484   ;;  %vm3614_vm4 = vcmask 1045509   ;;  %vm3616_vm5 = vcmask 1046534  }
  0xa3   : > { %v4075_v3 = vpack.c.bf16 %v322_v1, %v306_v0  ;;  %v321_v6 = vld [vmem:[%s5313_s1 + $0x80] sm:$0xff]  ;;  %v4139_v7 = vpack.c.bf16 %v324_v4, %v308_v2  ;;  %v307_v9 = vld [vmem:[%s5313_s1 + $0x10] sm:$0xff]  ;;  %v338_v11 = vld [vmem:[%s5313_s1 + $0x108] sm:$0xff]  ;;  %vm3618_vm6 = vcmask 1047559   ;;  %s4065_s26 = sshll.u32 %s235_s27, 8  ;;  %p7565_p5 = scmp.ne.s32.totalorder %s7394_s30, 0 }
  0xa4   : > { %v4077_v8 = vpack.c.bf16 %v321_v6, %v305_v5  ;;  %v323_v10 = vld [vmem:[%s5313_s1 + $0x90] sm:$0xff]  ;;  %v354_v13 = vld [vmem:[%s5313_s1 + $0x188] sm:$0xff]  ;;  %v340_v14 = vld [vmem:[%s5313_s1 + $0x118] sm:$0xff]  ;;  %s6377_s5 = scalar_lea.vmem [#allocation7], %s4065_s26  ;;  %s7566_s10 = sld [smem:[#allocation12_spill]] (%p7565_p5) }
  0xa5   : > { %4076 = vmatprep.subr.bf16.mxu0 %v4075_v3  ;;  %v4141_v12 = vpack.c.bf16 %v323_v10, %v307_v9  ;;  %v356_v15 = vld [vmem:[%s5313_s1 + $0x198] sm:$0xff]  ;;  %4140 = vmatprep.subr.bf16.mxu1 %v4139_v7  ;;  %v4079_v16 = vpack.c.bf16 %v354_v13, %v338_v11  ;;  %v337_v18 = vld [vmem:[%s5313_s1 + $0x100] sm:$0xff]  ;;  %v339_v20 = vld [vmem:[%s5313_s1 + $0x110] sm:$0xff]  ;;  %s7567_s6 = sld [smem:[#allocation11_spill]] (%p7565_p5)  ;;  %s7568_s7 = sld [smem:[#allocation71_spill]] (%p7565_p5) }
  0xa6   : > { %4078 = vmatpush1.bf16.msra.mxu0 %v4077_v8  ;;  %v4143_v17 = vpack.c.bf16 %v356_v15, %v340_v14  ;;  %v353_v19 = vld [vmem:[%s5313_s1 + $0x180] sm:$0xff]  ;;  %v355_v22 = vld [vmem:[%s5313_s1 + $0x190] sm:$0xff]  ;;  %v370_v23 = vld [vmem:[%s5313_s1 + $0x208] sm:$0xff] }
  0xa7   : > { %4142 = vmatpush1.bf16.msra.mxu1 %v4141_v12  ;;  %v4081_v21 = vpack.c.bf16 %v353_v19, %v337_v18  ;;  %v386_v24 = vld [vmem:[%s5313_s1 + $0x288] sm:$0xff]  ;;  %4080 = vmatprep.subr.bf16.mxu0 %v4079_v16  ;;  %v4145_v25 = vpack.c.bf16 %v355_v22, %v339_v20  ;;  %v372_v27 = vld [vmem:[%s5313_s1 + $0x218] sm:$0xff]  ;;  %v369_v29 = vld [vmem:[%s5313_s1 + $0x200] sm:$0xff] }
  0xa8   : > { %4144 = vmatprep.subr.bf16.mxu1 %v4143_v17  ;;  %v4083_v26 = vpack.c.bf16 %v386_v24, %v370_v23  ;;  %v388_v28 = vld [vmem:[%s5313_s1 + $0x298] sm:$0xff]  ;;  %v385_v31 = vld [vmem:[%s5313_s1 + $0x280] sm:$0xff]  ;;  %v371_v32 = vld [vmem:[%s5313_s1 + $0x210] sm:$0xff] }
  0xa9   : > { %v4147_v30 = vpack.c.bf16 %v388_v28, %v372_v27  ;;  %v387_v33 = vld [vmem:[%s5313_s1 + $0x290] sm:$0xff]  ;;  %v4085_v34 = vpack.c.bf16 %v385_v31, %v369_v29  ;;  %v402_v35 = vld [vmem:[%s5313_s1 + $0x308] sm:$0xff]  ;;  %v404_v37 = vld [vmem:[%s5313_s1 + $0x318] sm:$0xff] }
  0xaa   : > { %4082 = vmatpush1.bf16.msra.mxu0 %v4081_v21  ;;  %v418_v36 = vld [vmem:[%s5313_s1 + $0x388] sm:$0xff]  ;;  %v4149_v38 = vpack.c.bf16 %v387_v33, %v371_v32  ;;  %v420_v40 = vld [vmem:[%s5313_s1 + $0x398] sm:$0xff]  ;;  %v401_v41 = vld [vmem:[%s5313_s1 + $0x300] sm:$0xff]  ;;  %s4069_s15 = sshll.u32 (%p7565_p5), %s7566_s10, 4 }
  0xab   : > { %4146 = vmatpush1.bf16.msra.mxu1 %v4145_v25  ;;  %4084 = vmatprep.subr.bf16.mxu0 %v4083_v26  ;;  %v4087_v39 = vpack.c.bf16 %v418_v36, %v402_v35  ;;  %v417_v42 = vld [vmem:[%s5313_s1 + $0x380] sm:$0xff]  ;;  %v4151_v43 = vpack.c.bf16 %v420_v40, %v404_v37  ;;  %v403_v44 = vld [vmem:[%s5313_s1 + $0x310] sm:$0xff]  ;;  %v434_v46 = vld [vmem:[%s5313_s1 + $0x408] sm:$0xff]  ;;  %s4070_s28 = sshll.u32 (%p7565_p5), %s7567_s6, 6 }
  0xac   : > { %4148 = vmatprep.subr.bf16.mxu1 %v4147_v30  ;;  %v419_v45 = vld [vmem:[%s5313_s1 + $0x390] sm:$0xff]  ;;  %v450_v47 = vld [vmem:[%s5313_s1 + $0x488] sm:$0xff]  ;;  %v436_v48 = vld [vmem:[%s5313_s1 + $0x418] sm:$0xff]  ;;  %v4089_v50 = vpack.c.bf16 %v417_v42, %v401_v41  ;;  %s3846_s30 = sadd.s32 (%p7565_p5), %s4070_s28, %s4069_s15 }
  0xad   : > { %v452_v49 = vld [vmem:[%s5313_s1 + $0x498] sm:$0xff]  ;;  %v4153_v51 = vpack.c.bf16 %v419_v45, %v403_v44  ;;  %v4091_v52 = vpack.c.bf16 %v450_v47, %v434_v46  ;;  %v433_v53 = vld [vmem:[%s5313_s1 + $0x400] sm:$0xff]  ;;  %v435_v55 = vld [vmem:[%s5313_s1 + $0x410] sm:$0xff]  ;;  %s4071_s29 = sshll.u32 (%p7565_p5), %s3846_s30, 3 }
  0xae   : > { %4086 = vmatpush1.bf16.msra.mxu0 %v4085_v34  ;;  %v449_v54 = vld [vmem:[%s5313_s1 + $0x480] sm:$0xff]  ;;  %v4155_v56 = vpack.c.bf16 %v452_v49, %v436_v48  ;;  %v451_v57 = vld [vmem:[%s5313_s1 + $0x490] sm:$0xff]  ;;  %v466_v58 = vld [vmem:[%s5313_s1 + $0x508] sm:$0xff]  ;;  %s7247_s18 = scalar_lea.vmem (%p7565_p5), %s7568_s7, %s4071_s29 }
  0xaf   : > { %4150 = vmatpush1.bf16.msra.mxu1 %v4149_v38  ;;  %4088 = vmatprep.subr.bf16.mxu0 %v4087_v39  ;;  %v482_v59 = vld [vmem:[%s5313_s1 + $0x588] sm:$0xff]  ;;  %v468_v60 = vld [vmem:[%s5313_s1 + $0x518] sm:$0xff]  ;;  %v4093_v62 = vpack.c.bf16 %v449_v54, %v433_v53  ;;  %v4157_v63 = vpack.c.bf16 %v451_v57, %v435_v55  ;;  %v465_v1 = vld [vmem:[%s5313_s1 + $0x500] sm:$0xff] }
  0xb0   : > { %4152 = vmatprep.subr.bf16.mxu1 %v4151_v43  ;;  %v484_v61 = vld [vmem:[%s5313_s1 + $0x598] sm:$0xff]  ;;  %v4095_v0 = vpack.c.bf16 %v482_v59, %v466_v58  ;;  %v481_v2 = vld [vmem:[%s5313_s1 + $0x580] sm:$0xff]  ;;  %v467_v3 = vld [vmem:[%s5313_s1 + $0x510] sm:$0xff] }
  0xb1   : > { %v4159_v4 = vpack.c.bf16 %v484_v61, %v468_v60  ;;  %v483_v5 = vld [vmem:[%s5313_s1 + $0x590] sm:$0xff]  ;;  %v498_v6 = vld [vmem:[%s5313_s1 + $0x608] sm:$0xff]  ;;  %v500_v8 = vld [vmem:[%s5313_s1 + $0x618] sm:$0xff]  ;;  %v4097_v10 = vpack.c.bf16 %v481_v2, %v465_v1 }
  0xb2   : > { %4090 = vmatpush1.bf16.msra.mxu0 %v4089_v50  ;;  %v514_v7 = vld [vmem:[%s5313_s1 + $0x688] sm:$0xff]  ;;  %v516_v9 = vld [vmem:[%s5313_s1 + $0x698] sm:$0xff]  ;;  %v4161_v11 = vpack.c.bf16 %v483_v5, %v467_v3  ;;  %v497_v13 = vld [vmem:[%s5313_s1 + $0x600] sm:$0xff] }
  0xb3   : > { %4154 = vmatpush1.bf16.msra.mxu1 %v4153_v51  ;;  %4092 = vmatprep.subr.bf16.mxu0 %v4091_v52  ;;  %v4099_v12 = vpack.c.bf16 %v514_v7, %v498_v6  ;;  %v513_v14 = vld [vmem:[%s5313_s1 + $0x680] sm:$0xff]  ;;  %v499_v15 = vld [vmem:[%s5313_s1 + $0x610] sm:$0xff]  ;;  %v4163_v16 = vpack.c.bf16 %v516_v9, %v500_v8  ;;  %v530_v18 = vld [vmem:[%s5313_s1 + $0x708] sm:$0xff] }
  0xb4   : > { %4156 = vmatprep.subr.bf16.mxu1 %v4155_v56  ;;  %v515_v17 = vld [vmem:[%s5313_s1 + $0x690] sm:$0xff]  ;;  %v546_v19 = vld [vmem:[%s5313_s1 + $0x788] sm:$0xff]  ;;  %v532_v20 = vld [vmem:[%s5313_s1 + $0x718] sm:$0xff]  ;;  %v4101_v22 = vpack.c.bf16 %v513_v14, %v497_v13 }
  0xb5   : > { %v548_v21 = vld [vmem:[%s5313_s1 + $0x798] sm:$0xff]  ;;  %v4165_v23 = vpack.c.bf16 %v515_v17, %v499_v15  ;;  %v4103_v24 = vpack.c.bf16 %v546_v19, %v530_v18  ;;  %v529_v25 = vld [vmem:[%s5313_s1 + $0x700] sm:$0xff]  ;;  %v531_v27 = vld [vmem:[%s5313_s1 + $0x710] sm:$0xff] }
  0xb6   : > { %4094 = vmatpush1.bf16.msra.mxu0 %v4093_v62  ;;  %v545_v26 = vld [vmem:[%s5313_s1 + $0x780] sm:$0xff]  ;;  %v4167_v28 = vpack.c.bf16 %v548_v21, %v532_v20  ;;  %v547_v29 = vld [vmem:[%s5313_s1 + $0x790] sm:$0xff]  ;;  %v562_v30 = vld [vmem:[%s5313_s1 + $0x808] sm:$0xff] }
  0xb7   : > { %4158 = vmatpush1.bf16.msra.mxu1 %v4157_v63  ;;  %4096 = vmatprep.subr.bf16.mxu0 %v4095_v0  ;;  %v578_v31 = vld [vmem:[%s5313_s1 + $0x888] sm:$0xff]  ;;  %v564_v32 = vld [vmem:[%s5313_s1 + $0x818] sm:$0xff]  ;;  %v4105_v34 = vpack.c.bf16 %v545_v26, %v529_v25  ;;  %v4169_v35 = vpack.c.bf16 %v547_v29, %v531_v27  ;;  %v561_v37 = vld [vmem:[%s5313_s1 + $0x800] sm:$0xff] }
  0xb8   : > { %4160 = vmatprep.subr.bf16.mxu1 %v4159_v4  ;;  %v580_v33 = vld [vmem:[%s5313_s1 + $0x898] sm:$0xff]  ;;  %v4107_v36 = vpack.c.bf16 %v578_v31, %v562_v30  ;;  %v577_v38 = vld [vmem:[%s5313_s1 + $0x880] sm:$0xff]  ;;  %v563_v39 = vld [vmem:[%s5313_s1 + $0x810] sm:$0xff] }
  0xb9   : > { %v4171_v40 = vpack.c.bf16 %v580_v33, %v564_v32  ;;  %v579_v41 = vld [vmem:[%s5313_s1 + $0x890] sm:$0xff]  ;;  %v594_v42 = vld [vmem:[%s5313_s1 + $0x908] sm:$0xff]  ;;  %v596_v44 = vld [vmem:[%s5313_s1 + $0x918] sm:$0xff]  ;;  %v4109_v46 = vpack.c.bf16 %v577_v38, %v561_v37 }
  0xba   : > { %4098 = vmatpush1.bf16.msra.mxu0 %v4097_v10  ;;  %v610_v43 = vld [vmem:[%s5313_s1 + $0x988] sm:$0xff]  ;;  %v612_v45 = vld [vmem:[%s5313_s1 + $0x998] sm:$0xff]  ;;  %v4173_v47 = vpack.c.bf16 %v579_v41, %v563_v39  ;;  %v593_v49 = vld [vmem:[%s5313_s1 + $0x900] sm:$0xff] }
  0xbb   : > { %4162 = vmatpush1.bf16.msra.mxu1 %v4161_v11  ;;  %4100 = vmatprep.subr.bf16.mxu0 %v4099_v12  ;;  %v4111_v48 = vpack.c.bf16 %v610_v43, %v594_v42  ;;  %v609_v50 = vld [vmem:[%s5313_s1 + $0x980] sm:$0xff]  ;;  %v595_v51 = vld [vmem:[%s5313_s1 + $0x910] sm:$0xff]  ;;  %v4175_v52 = vpack.c.bf16 %v612_v45, %v596_v44  ;;  %v626_v54 = vld [vmem:[%s5313_s1 + $0xa08] sm:$0xff] }
  0xbc   : > { %4164 = vmatprep.subr.bf16.mxu1 %v4163_v16  ;;  %v611_v53 = vld [vmem:[%s5313_s1 + $0x990] sm:$0xff]  ;;  %v642_v55 = vld [vmem:[%s5313_s1 + $0xa88] sm:$0xff]  ;;  %v628_v56 = vld [vmem:[%s5313_s1 + $0xa18] sm:$0xff]  ;;  %v4113_v58 = vpack.c.bf16 %v609_v50, %v593_v49 }
  0xbd   : > { %v644_v57 = vld [vmem:[%s5313_s1 + $0xa98] sm:$0xff]  ;;  %v4177_v59 = vpack.c.bf16 %v611_v53, %v595_v51  ;;  %v4115_v60 = vpack.c.bf16 %v642_v55, %v626_v54  ;;  %v625_v61 = vld [vmem:[%s5313_s1 + $0xa00] sm:$0xff]  ;;  %v627_v63 = vld [vmem:[%s5313_s1 + $0xa10] sm:$0xff] }
  0xbe   : > { %4102 = vmatpush1.bf16.msra.mxu0 %v4101_v22  ;;  %v641_v62 = vld [vmem:[%s5313_s1 + $0xa80] sm:$0xff]  ;;  %v4179_v0 = vpack.c.bf16 %v644_v57, %v628_v56  ;;  %v643_v1 = vld [vmem:[%s5313_s1 + $0xa90] sm:$0xff]  ;;  %v658_v2 = vld [vmem:[%s5313_s1 + $0xb08] sm:$0xff] }
  0xbf   : > { %4166 = vmatpush1.bf16.msra.mxu1 %v4165_v23  ;;  %4104 = vmatprep.subr.bf16.mxu0 %v4103_v24  ;;  %v674_v3 = vld [vmem:[%s5313_s1 + $0xb88] sm:$0xff]  ;;  %v660_v4 = vld [vmem:[%s5313_s1 + $0xb18] sm:$0xff]  ;;  %v4117_v6 = vpack.c.bf16 %v641_v62, %v625_v61  ;;  %v657_v7 = vld [vmem:[%s5313_s1 + $0xb00] sm:$0xff]  ;;  %v4181_v8 = vpack.c.bf16 %v643_v1, %v627_v63 }
  0xc0   : > { %4168 = vmatprep.subr.bf16.mxu1 %v4167_v28  ;;  %v676_v5 = vld [vmem:[%s5313_s1 + $0xb98] sm:$0xff]  ;;  %v4119_v9 = vpack.c.bf16 %v674_v3, %v658_v2  ;;  %v673_v10 = vld [vmem:[%s5313_s1 + $0xb80] sm:$0xff]  ;;  %v659_v11 = vld [vmem:[%s5313_s1 + $0xb10] sm:$0xff] }
  0xc1   : > { %v675_v12 = vld [vmem:[%s5313_s1 + $0xb90] sm:$0xff]  ;;  %v4183_v13 = vpack.c.bf16 %v676_v5, %v660_v4  ;;  %v690_v14 = vld [vmem:[%s5313_s1 + $0xc08] sm:$0xff]  ;;  %v692_v17 = vld [vmem:[%s5313_s1 + $0xc18] sm:$0xff]  ;;  %v4121_v19 = vpack.c.bf16 %v673_v10, %v657_v7 }
  0xc2   : > { %4106 = vmatpush1.bf16.msra.mxu0 %v4105_v34  ;;  %v706_v15 = vld [vmem:[%s5313_s1 + $0xc88] sm:$0xff]  ;;  %v708_v18 = vld [vmem:[%s5313_s1 + $0xc98] sm:$0xff]  ;;  %v4185_v20 = vpack.c.bf16 %v675_v12, %v659_v11  ;;  %v689_v22 = vld [vmem:[%s5313_s1 + $0xc00] sm:$0xff] }
  0xc3   : > { %4170 = vmatpush1.bf16.msra.mxu1 %v4169_v35  ;;  %4108 = vmatprep.subr.bf16.mxu0 %v4107_v36  ;;  %v5418_v16 = vld [vmem:[%s5295_s8 + $0x8] sm:$0xff]  ;;  %v4123_v21 = vpack.c.bf16 %v706_v15, %v690_v14  ;;  %v705_v23 = vld [vmem:[%s5313_s1 + $0xc80] sm:$0xff]  ;;  %v691_v24 = vld [vmem:[%s5313_s1 + $0xc10] sm:$0xff]  ;;  %v4187_v25 = vpack.c.bf16 %v708_v18, %v692_v17 }
  0xc4   : > { %4172 = vmatprep.subr.bf16.mxu1 %v4171_v40  ;;  %881 = vmatprep.mubr.f32.mxu0 %v5418_v16  ;;  %v707_v26 = vld [vmem:[%s5313_s1 + $0xc90] sm:$0xff]  ;;  %v722_v27 = vld [vmem:[%s5313_s1 + $0xd08] sm:$0xff]  ;;  %v724_v29 = vld [vmem:[%s5313_s1 + $0xd18] sm:$0xff]  ;;  %v4125_v31 = vpack.c.bf16 %v705_v23, %v689_v22 }
  0xc5   : > { %1018 = vmatprep.mubr.f32.mxu1 %v5418_v16  ;;  %v738_v28 = vld [vmem:[%s5313_s1 + $0xd88] sm:$0xff]  ;;  %v740_v30 = vld [vmem:[%s5313_s1 + $0xd98] sm:$0xff]  ;;  %v4189_v32 = vpack.c.bf16 %v707_v26, %v691_v24  ;;  %v721_v34 = vld [vmem:[%s5313_s1 + $0xd00] sm:$0xff] }
  0xc6   : > { %4110 = vmatpush1.bf16.msra.mxu0 %v4109_v46  ;;  %v4127_v33 = vpack.c.bf16 %v738_v28, %v722_v27  ;;  %v737_v35 = vld [vmem:[%s5313_s1 + $0xd80] sm:$0xff]  ;;  %v723_v36 = vld [vmem:[%s5313_s1 + $0xd10] sm:$0xff]  ;;  %v4191_v37 = vpack.c.bf16 %v740_v30, %v724_v29  ;;  %v754_v39 = vld [vmem:[%s5313_s1 + $0xe08] sm:$0xff] }
  0xc7   : > { %4174 = vmatpush1.bf16.msra.mxu1 %v4173_v47  ;;  %4112 = vmatprep.subr.bf16.mxu0 %v4111_v48  ;;  %v739_v38 = vld [vmem:[%s5313_s1 + $0xd90] sm:$0xff]  ;;  %v770_v40 = vld [vmem:[%s5313_s1 + $0xe88] sm:$0xff]  ;;  %v756_v41 = vld [vmem:[%s5313_s1 + $0xe18] sm:$0xff]  ;;  %v4129_v43 = vpack.c.bf16 %v737_v35, %v721_v34 }
  0xc8   : > { %4176 = vmatprep.subr.bf16.mxu1 %v4175_v52  ;;  %v772_v42 = vld [vmem:[%s5313_s1 + $0xe98] sm:$0xff]  ;;  %v4193_v44 = vpack.c.bf16 %v739_v38, %v723_v36  ;;  %v4131_v45 = vpack.c.bf16 %v770_v40, %v754_v39  ;;  %v753_v46 = vld [vmem:[%s5313_s1 + $0xe00] sm:$0xff]  ;;  %v755_v48 = vld [vmem:[%s5313_s1 + $0xe10] sm:$0xff] }
  0xc9   : > { %v769_v47 = vld [vmem:[%s5313_s1 + $0xe80] sm:$0xff]  ;;  %v4195_v49 = vpack.c.bf16 %v772_v42, %v756_v41  ;;  %v771_v50 = vld [vmem:[%s5313_s1 + $0xe90] sm:$0xff]  ;;  %v786_v51 = vld [vmem:[%s5313_s1 + $0xf08] sm:$0xff] }
  0xca   : > { %4114 = vmatpush1.bf16.msra.mxu0 %v4113_v58  ;;  %v802_v52 = vld [vmem:[%s5313_s1 + $0xf88] sm:$0xff]  ;;  %v788_v53 = vld [vmem:[%s5313_s1 + $0xf18] sm:$0xff]  ;;  %v4133_v55 = vpack.c.bf16 %v769_v47, %v753_v46  ;;  %v4197_v56 = vpack.c.bf16 %v771_v50, %v755_v48  ;;  %v785_v58 = vld [vmem:[%s5313_s1 + $0xf00] sm:$0xff] }
  0xcb   : > { %4178 = vmatpush1.bf16.msra.mxu1 %v4177_v59  ;;  %4116 = vmatprep.subr.bf16.mxu0 %v4115_v60  ;;  %v804_v54 = vld [vmem:[%s5313_s1 + $0xf98] sm:$0xff]  ;;  %v4135_v57 = vpack.c.bf16 %v802_v52, %v786_v51  ;;  %v801_v59 = vld [vmem:[%s5313_s1 + $0xf80] sm:$0xff]  ;;  %v787_v60 = vld [vmem:[%s5313_s1 + $0xf10] sm:$0xff] }
  0xcc   : > { %4180 = vmatprep.subr.bf16.mxu1 %v4179_v0  ;;  %v4199_v61 = vpack.c.bf16 %v804_v54, %v788_v53  ;;  %v803_v62 = vld [vmem:[%s5313_s1 + $0xf90] sm:$0xff]  ;;  %v310_v63 = vld [vmem:[%s5313_s1 + $0x28] sm:$0xff]  ;;  %v312_v1 = vld [vmem:[%s5313_s1 + $0x38] sm:$0xff]  ;;  %v4137_v3 = vpack.c.bf16 %v801_v59, %v785_v58 }
  0xcd   : > { %v326_v0 = vld [vmem:[%s5313_s1 + $0xa8] sm:$0xff]  ;;  %v328_v2 = vld [vmem:[%s5313_s1 + $0xb8] sm:$0xff]  ;;  %v4201_v4 = vpack.c.bf16 %v803_v62, %v787_v60  ;;  %v325_v7 = vld [vmem:[%s5313_s1 + $0xa0] sm:$0xff] }
  0xce   : > { %4118 = vmatpush1.bf16.msra.mxu0 %v4117_v6  ;;  %v4203_v5 = vpack.c.bf16 %v326_v0, %v310_v63  ;;  %v309_v6 = vld [vmem:[%s5313_s1 + $0x20] sm:$0xff]  ;;  %v327_v10 = vld [vmem:[%s5313_s1 + $0xb0] sm:$0xff]  ;;  %v342_v11 = vld [vmem:[%s5313_s1 + $0x128] sm:$0xff] }
  0xcf   : > { %4182 = vmatpush1.bf16.msra.mxu1 %v4181_v8  ;;  %4120 = vmatprep.subr.bf16.mxu0 %v4119_v9  ;;  %v4267_v8 = vpack.c.bf16 %v328_v2, %v312_v1  ;;  %v311_v9 = vld [vmem:[%s5313_s1 + $0x30] sm:$0xff]  ;;  %v358_v12 = vld [vmem:[%s5313_s1 + $0x1a8] sm:$0xff]  ;;  %v4205_v14 = vpack.c.bf16 %v325_v7, %v309_v6  ;;  %v344_v15 = vld [vmem:[%s5313_s1 + $0x138] sm:$0xff] }
  0xd0   : > { %4184 = vmatprep.subr.bf16.mxu1 %v4183_v13  ;;  %v5463_v13 = vld [vmem:[%s5295_s8] sm:$0xff]  ;;  %v360_v17 = vld [vmem:[%s5313_s1 + $0x1b8] sm:$0xff]  ;;  %v4269_v18 = vpack.c.bf16 %v327_v10, %v311_v9  ;;  %v4207_v22 = vpack.c.bf16 %v358_v12, %v342_v11  ;;  %v343_v23 = vld [vmem:[%s5313_s1 + $0x130] sm:$0xff] }
  0xd1   : > { %v359_v24 = vld [vmem:[%s5313_s1 + $0x1b0] sm:$0xff]  ;;  %v374_v26 = vld [vmem:[%s5313_s1 + $0x228] sm:$0xff]  ;;  %v376_v30 = vld [vmem:[%s5313_s1 + $0x238] sm:$0xff] }
  0xd2   : > { %4122 = vmatpush1.bf16.msra.mxu0 %v4121_v19  ;;  %v341_v19 = vld [vmem:[%s5313_s1 + $0x120] sm:$0xff]  ;;  %v390_v27 = vld [vmem:[%s5313_s1 + $0x2a8] sm:$0xff]  ;;  %v5479_v28 = vld [vmem:[%s5295_s8 + $0x10] sm:$0xff] }
  0xd3   : > { %4186 = vmatpush1.bf16.msra.mxu1 %v4185_v20  ;;  %4124 = vmatprep.subr.bf16.mxu0 %v4123_v21  ;;  %v357_v20 = vld [vmem:[%s5313_s1 + $0x1a0] sm:$0xff]  ;;  %v5470_v21 = vld [vmem:[%s5295_s8 + $0x18] sm:$0xff]  ;;  %v5488_v35 = vld [vmem:[%s5295_s8 + $0x28] sm:$0xff]  ;;  %v4211_v36 = vpack.c.bf16 %v390_v27, %v374_v26 }
  0xd4   : > { %4188 = vmatprep.subr.bf16.mxu1 %v4187_v25  ;;  %v4271_v25 = vpack.c.bf16 %v360_v17, %v344_v15  ;;  %v4209_v29 = vpack.c.bf16 %v357_v20, %v341_v19  ;;  %v389_v34 = vld [vmem:[%s5313_s1 + $0x2a0] sm:$0xff]  ;;  %v391_v38 = vld [vmem:[%s5313_s1 + $0x2b0] sm:$0xff]  ;;  %v406_v40 = vld [vmem:[%s5313_s1 + $0x328] sm:$0xff] }
  0xd5   : > { %v422_v41 = vld [vmem:[%s5313_s1 + $0x3a8] sm:$0xff]  ;;  %v5497_v42 = vld [vmem:[%s5295_s8 + $0x20] sm:$0xff]  ;;  %v407_v51 = vld [vmem:[%s5313_s1 + $0x330] sm:$0xff] }
  0xd6   : > { %4126 = vmatpush1.bf16.msra.mxu0 %v4125_v31  ;;  %v392_v31 = vld [vmem:[%s5313_s1 + $0x2b8] sm:$0xff]  ;;  %v405_v47 = vld [vmem:[%s5313_s1 + $0x320] sm:$0xff]  ;;  %v4215_v50 = vpack.c.bf16 %v422_v41, %v406_v40  ;;  %v423_v52 = vld [vmem:[%s5313_s1 + $0x3b0] sm:$0xff] }
  0xd7   : > { %4190 = vmatpush1.bf16.msra.mxu1 %v4189_v32  ;;  %4128 = vmatprep.subr.bf16.mxu0 %v4127_v33  ;;  %v4273_v32 = vpack.c.bf16 %v359_v24, %v343_v23  ;;  %v373_v33 = vld [vmem:[%s5313_s1 + $0x220] sm:$0xff]  ;;  %v4275_v39 = vpack.c.bf16 %v392_v31, %v376_v30  ;;  %v438_v54 = vld [vmem:[%s5313_s1 + $0x428] sm:$0xff]  ;;  %v440_v58 = vld [vmem:[%s5313_s1 + $0x438] sm:$0xff]  ;;  %v4281_v60 = vpack.c.bf16 %v423_v52, %v407_v51 }
  0xd8   : > { %4192 = vmatprep.subr.bf16.mxu1 %v4191_v37  ;;  %v375_v37 = vld [vmem:[%s5313_s1 + $0x230] sm:$0xff]  ;;  %v421_v48 = vld [vmem:[%s5313_s1 + $0x3a0] sm:$0xff]  ;;  %v456_v59 = vld [vmem:[%s5313_s1 + $0x4b8] sm:$0xff] }
  0xd9   : > { %v4277_v46 = vpack.c.bf16 %v391_v38, %v375_v37  ;;  %v453_v62 = vld [vmem:[%s5313_s1 + $0x4a0] sm:$0xff]  ;;  %v5524_v63 = vld [vmem:[%s5295_s8 + $0x48] sm:$0xff]  ;;  %v439_v1 = vld [vmem:[%s5313_s1 + $0x430] sm:$0xff] }
  0xda   : > { %4130 = vmatpush1.bf16.msra.mxu0 %v4129_v43  ;;  %v4213_v43 = vpack.c.bf16 %v389_v34, %v373_v33  ;;  %v455_v2 = vld [vmem:[%s5313_s1 + $0x4b0] sm:$0xff]  ;;  %v5533_v6 = vld [vmem:[%s5295_s8 + $0x40] sm:$0xff]  ;;  %v488_v9 = vld [vmem:[%s5313_s1 + $0x5b8] sm:$0xff] }
  0xdb   : > { %4194 = vmatpush1.bf16.msra.mxu1 %v4193_v44  ;;  %4132 = vmatprep.subr.bf16.mxu0 %v4131_v45  ;;  %v408_v44 = vld [vmem:[%s5313_s1 + $0x338] sm:$0xff]  ;;  %v4285_v10 = vpack.c.bf16 %v455_v2, %v439_v1  ;;  %v469_v11 = vld [vmem:[%s5313_s1 + $0x520] sm:$0xff]  ;;  %v471_v17 = vld [vmem:[%s5313_s1 + $0x530] sm:$0xff] }
  0xdc   : > { %4196 = vmatprep.subr.bf16.mxu1 %v4195_v49  ;;  %v424_v45 = vld [vmem:[%s5313_s1 + $0x3b8] sm:$0xff]  ;;  %v485_v12 = vld [vmem:[%s5313_s1 + $0x5a0] sm:$0xff]  ;;  %v502_v20 = vld [vmem:[%s5313_s1 + $0x628] sm:$0xff] }
  0xdd   : > { %v5506_v49 = vld [vmem:[%s5295_s8 + $0x38] sm:$0xff]  ;;  %v4279_v53 = vpack.c.bf16 %v424_v45, %v408_v44  ;;  %v5551_v23 = vld [vmem:[%s5295_s8 + $0x50] sm:$0xff]  ;;  %v4225_v24 = vpack.c.bf16 %v485_v12, %v469_v11  ;;  %v517_v30 = vld [vmem:[%s5313_s1 + $0x6a0] sm:$0xff] }
  0xde   : > { %4134 = vmatpush1.bf16.msra.mxu0 %v4133_v55  ;;  %v454_v55 = vld [vmem:[%s5313_s1 + $0x4a8] sm:$0xff]  ;;  %v520_v26 = vld [vmem:[%s5313_s1 + $0x6b8] sm:$0xff]  ;;  %v503_v33 = vld [vmem:[%s5313_s1 + $0x630] sm:$0xff] }
  0xdf   : > { %4198 = vmatpush1.bf16.msra.mxu1 %v4197_v56  ;;  %4136 = vmatprep.subr.bf16.mxu0 %v4135_v57  ;;  %v5515_v56 = vld [vmem:[%s5295_s8 + $0x30] sm:$0xff]  ;;  %v4217_v57 = vpack.c.bf16 %v421_v48, %v405_v47  ;;  %v4219_v0 = vpack.c.bf16 %v454_v55, %v438_v54  ;;  %v5560_v31 = vld [vmem:[%s5295_s8 + $0x68] sm:$0xff]  ;;  %v536_v41 = vld [vmem:[%s5313_s1 + $0x738] sm:$0xff] }
  0xe0   : > { %4200 = vmatprep.subr.bf16.mxu1 %v4199_v61  ;;  %v437_v61 = vld [vmem:[%s5313_s1 + $0x420] sm:$0xff]  ;;  %v519_v34 = vld [vmem:[%s5313_s1 + $0x6b0] sm:$0xff]  ;;  %v534_v37 = vld [vmem:[%s5313_s1 + $0x728] sm:$0xff] }
  0xe1   : > { %v4221_v7 = vpack.c.bf16 %v453_v62, %v437_v61  ;;  %v550_v38 = vld [vmem:[%s5313_s1 + $0x7a8] sm:$0xff]  ;;  %v4293_v44 = vpack.c.bf16 %v519_v34, %v503_v33  ;;  %v533_v45 = vld [vmem:[%s5313_s1 + $0x720] sm:$0xff]  ;;  %v5578_v47 = vld [vmem:[%s5295_s8 + $0x78] sm:$0xff] }
  0xe2   : > { %4138 = vmatpush1.bf16.msra.mxu0 %v4137_v3  ;;  %v4283_v3 = vpack.c.bf16 %v456_v59, %v440_v58  ;;  %v4231_v48 = vpack.c.bf16 %v550_v38, %v534_v37  ;;  %v551_v51 = vld [vmem:[%s5313_s1 + $0x7b0] sm:$0xff]  ;;  %v582_v54 = vld [vmem:[%s5313_s1 + $0x8a8] sm:$0xff]  ;;  %v568_v58 = vld [vmem:[%s5313_s1 + $0x838] sm:$0xff] }
  0xe3   : > { %4202 = vmatpush1.bf16.msra.mxu1 %v4201_v4  ;;  %4204 = vmatprep.subr.bf16.mxu0 %v4203_v5  ;;  %v470_v4 = vld [vmem:[%s5313_s1 + $0x528] sm:$0xff]  ;;  %v5587_v55 = vld [vmem:[%s5295_s8 + $0x70] sm:$0xff]  ;;  %v584_v59 = vld [vmem:[%s5313_s1 + $0x8b8] sm:$0xff] }
  0xe4   : > { %4268 = vmatprep.subr.bf16.mxu1 %v4267_v8  ;;  %v486_v5 = vld [vmem:[%s5313_s1 + $0x5a8] sm:$0xff]  ;;  %v472_v8 = vld [vmem:[%s5313_s1 + $0x538] sm:$0xff]  ;;  %v565_v61 = vld [vmem:[%s5313_s1 + $0x820] sm:$0xff] }
  0xe5   : > { %882 = vmatmul.mubr.f32.vlgmr.msra.gmra.mrb[0].mxu0 %v5463_v13  ;;  %v4223_v15 = vpack.c.bf16 %v486_v5, %v470_v4  ;;  %v4287_v19 = vpack.c.bf16 %v488_v9, %v472_v8  ;;  %v581_v62 = vld [vmem:[%s5313_s1 + $0x8a0] sm:$0xff]  ;;  %v567_v2 = vld [vmem:[%s5313_s1 + $0x830] sm:$0xff]  ;;  %v4299_v4 = vpack.c.bf16 %v584_v59, %v568_v58  ;;  %v598_v5 = vld [vmem:[%s5313_s1 + $0x928] sm:$0xff] }
  0xe6   : > { %1019 = vmatmul.mubr.f32.vlgmr.msra.gmra.mrb[0].mxu1 %v5463_v13  ;;  %4206 = vmatpush1.bf16.msra.mxu0 %v4205_v14  ;;  %v5542_v14 = vld [vmem:[%s5295_s8 + $0x58] sm:$0xff]  ;;  %v5605_v8 = vld [vmem:[%s5295_s8 + $0x80] sm:$0xff]  ;;  %v4237_v9 = vpack.c.bf16 %v581_v62, %v565_v61  ;;  %v5632_v37 = vld [vmem:[%s5295_s8 + $0xa8] sm:$0xff] }
  0xe7   : > { %4270 = vmatpush1.bf16.msra.mxu1 %v4269_v18  ;;  %887 = vmatprep.mubr.f32.mxu0 %v5470_v21  ;;  %v487_v18 = vld [vmem:[%s5313_s1 + $0x5b0] sm:$0xff]  ;;  %v616_v11 = vld [vmem:[%s5313_s1 + $0x9b8] sm:$0xff]  ;;  %v629_v34 = vld [vmem:[%s5313_s1 + $0xa20] sm:$0xff] }
  0xe8   : > { %1024 = vmatprep.mubr.f32.mxu1 %v5470_v21  ;;  %4208 = vmatprep.subr.bf16.mxu0 %v4207_v22  ;;  %v518_v22 = vld [vmem:[%s5313_s1 + $0x6a8] sm:$0xff]  ;;  %v4289_v27 = vpack.c.bf16 %v487_v18, %v471_v17  ;;  %v613_v17 = vld [vmem:[%s5313_s1 + $0x9a0] sm:$0xff]  ;;  %v5614_v18 = vld [vmem:[%s5295_s8 + $0x98] sm:$0xff] }
  0xe9   : > { %888 = vmatmul.mubr.f32.gmra.mrb[2].mxu0 %v5479_v28  ;;  %4272 = vmatprep.subr.bf16.mxu1 %v4271_v25  ;;  %v504_v25 = vld [vmem:[%s5313_s1 + $0x638] sm:$0xff]  ;;  %v663_v58 = vld [vmem:[%s5313_s1 + $0xb30] sm:$0xff]  ;;  %v694_v61 = vld [vmem:[%s5313_s1 + $0xc28] sm:$0xff] }
  0xea   : > { %1025 = vmatmul.mubr.f32.gmra.mrb[2].mxu1 %v5479_v28  ;;  %4210 = vmatpush1.bf16.msra.mxu0 %v4209_v29  ;;  %v501_v29 = vld [vmem:[%s5313_s1 + $0x620] sm:$0xff]  ;;  %v710_v62 = vld [vmem:[%s5313_s1 + $0xca8] sm:$0xff] }
  0xeb   : > { %4274 = vmatpush1.bf16.msra.mxu1 %v4273_v32  ;;  %893 = vmatprep.mubr.f32.mxu0 %v5488_v35  ;;  %v4227_v32 = vpack.c.bf16 %v518_v22, %v502_v20  ;;  %v4229_v40 = vpack.c.bf16 %v517_v30, %v501_v29  ;;  %v599_v20 = vld [vmem:[%s5313_s1 + $0x930] sm:$0xff]  ;;  %v632_v30 = vld [vmem:[%s5313_s1 + $0xa38] sm:$0xff] }
  0xec   : > { %1030 = vmatprep.mubr.f32.mxu1 %v5488_v35  ;;  %4212 = vmatprep.subr.bf16.mxu0 %v4211_v36  ;;  %v4291_v36 = vpack.c.bf16 %v520_v26, %v504_v25  ;;  %v615_v22 = vld [vmem:[%s5313_s1 + $0x9b0] sm:$0xff]  ;;  %v630_v25 = vld [vmem:[%s5313_s1 + $0xa28] sm:$0xff] }
  0xed   : > { %894 = vmatmul.mubr.f32.gmra.mrb[4].mxu0 %v5497_v42  ;;  %4276 = vmatprep.subr.bf16.mxu1 %v4275_v39  ;;  %v5569_v39 = vld [vmem:[%s5295_s8 + $0x60] sm:$0xff]  ;;  %v646_v26 = vld [vmem:[%s5313_s1 + $0xaa8] sm:$0xff]  ;;  %v4305_v33 = vpack.c.bf16 %v615_v22, %v599_v20  ;;  %v728_v22 = vld [vmem:[%s5313_s1 + $0xd38] sm:$0xff] }
  0xee   : > { %1031 = vmatmul.mubr.f32.gmra.mrb[4].mxu1 %v5497_v42  ;;  %4214 = vmatpush1.bf16.msra.mxu0 %v4213_v43  ;;  %v552_v43 = vld [vmem:[%s5313_s1 + $0x7b8] sm:$0xff]  ;;  %v4243_v38 = vpack.c.bf16 %v646_v26, %v630_v25  ;;  %v742_v20 = vld [vmem:[%s5313_s1 + $0xda8] sm:$0xff] }
  0xef   : > { %4278 = vmatpush1.bf16.msra.mxu1 %v4277_v46  ;;  %899 = vmatprep.mubr.f32.mxu0 %v5506_v49  ;;  %v549_v46 = vld [vmem:[%s5313_s1 + $0x7a0] sm:$0xff]  ;;  %v4295_v52 = vpack.c.bf16 %v552_v43, %v536_v41  ;;  %v647_v41 = vld [vmem:[%s5313_s1 + $0xab0] sm:$0xff] }
  0xf0   : > { %1036 = vmatprep.mubr.f32.mxu1 %v5506_v49  ;;  %4216 = vmatprep.subr.bf16.mxu0 %v4215_v50  ;;  %v535_v50 = vld [vmem:[%s5313_s1 + $0x730] sm:$0xff]  ;;  %v5638_v43 = vld [vmem:[%s5295_s8 + $0xa0] sm:$0xff] }
  0xf1   : > { %900 = vmatmul.mubr.f32.gmra.mrb[6].mxu0 %v5515_v56  ;;  %4280 = vmatprep.subr.bf16.mxu1 %v4279_v53  ;;  %v566_v53 = vld [vmem:[%s5313_s1 + $0x828] sm:$0xff] }
  0xf2   : > { %1037 = vmatmul.mubr.f32.gmra.mrb[6].mxu1 %v5515_v56  ;;  %4218 = vmatpush1.bf16.msra.mxu0 %v4217_v57  ;;  %v4233_v57 = vpack.c.bf16 %v549_v46, %v533_v45  ;;  %v4235_v1 = vpack.c.bf16 %v582_v54, %v566_v53  ;;  %v662_v45 = vld [vmem:[%s5313_s1 + $0xb28] sm:$0xff]  ;;  %v661_v54 = vld [vmem:[%s5313_s1 + $0xb20] sm:$0xff] }
  0xf3   : > { %4282 = vmatpush1.bf16.msra.mxu1 %v4281_v60  ;;  %905 = vmatprep.mubr.f32.mxu0 %v5524_v63  ;;  %v4297_v60 = vpack.c.bf16 %v551_v51, %v535_v50  ;;  %v678_v46 = vld [vmem:[%s5313_s1 + $0xba8] sm:$0xff]  ;;  %v5644_v50 = vld [vmem:[%s5295_s8 + $0xb8] sm:$0xff] }
  0xf4   : > { %1042 = vmatprep.mubr.f32.mxu1 %v5524_v63  ;;  %4220 = vmatprep.subr.bf16.mxu0 %v4219_v0  ;;  %v5596_v0 = vld [vmem:[%s5295_s8 + $0x88] sm:$0xff]  ;;  %v664_v51 = vld [vmem:[%s5313_s1 + $0xb38] sm:$0xff]  ;;  %v4247_v59 = vpack.c.bf16 %v678_v46, %v662_v45 }
  0xf5   : > { %906 = vmatmul.mubr.f32.gmra.mrb[8].mxu0 %v5533_v6  ;;  %4284 = vmatprep.subr.bf16.mxu1 %v4283_v3  ;;  %v583_v3 = vld [vmem:[%s5313_s1 + $0x8b0] sm:$0xff] }
  0xf6   : > { %1043 = vmatmul.mubr.f32.gmra.mrb[8].mxu1 %v5533_v6  ;;  %4222 = vmatpush1.bf16.msra.mxu0 %v4221_v7  ;;  %v614_v7 = vld [vmem:[%s5313_s1 + $0x9a8] sm:$0xff]  ;;  %v4301_v12 = vpack.c.bf16 %v583_v3, %v567_v2  ;;  %v696_v2 = vld [vmem:[%s5313_s1 + $0xc38] sm:$0xff] }
  0xf7   : > { %4286 = vmatpush1.bf16.msra.mxu1 %v4285_v10  ;;  %911 = vmatprep.mubr.f32.mxu0 %v5542_v14  ;;  %v600_v10 = vld [vmem:[%s5313_s1 + $0x938] sm:$0xff] }
  0xf8   : > { %1048 = vmatprep.mubr.f32.mxu1 %v5542_v14  ;;  %4224 = vmatprep.subr.bf16.mxu0 %v4223_v15  ;;  %v597_v15 = vld [vmem:[%s5313_s1 + $0x920] sm:$0xff]  ;;  %v712_v3 = vld [vmem:[%s5313_s1 + $0xcb8] sm:$0xff] }
  0xf9   : > { %912 = vmatmul.mubr.f32.gmra.mrb[10].mxu0 %v5551_v23  ;;  %4288 = vmatprep.subr.bf16.mxu1 %v4287_v19  ;;  %v4239_v19 = vpack.c.bf16 %v614_v7, %v598_v5  ;;  %v4241_v29 = vpack.c.bf16 %v613_v17, %v597_v15  ;;  %v4315_v15 = vpack.c.bf16 %v712_v3, %v696_v2  ;;  %v711_v17 = vld [vmem:[%s5313_s1 + $0xcb0] sm:$0xff]  ;;  %v789_v2 = vld [vmem:[%s5313_s1 + $0xf20] sm:$0xff] }
  0xfa   : > { %1049 = vmatmul.mubr.f32.gmra.mrb[10].mxu1 %v5551_v23  ;;  %4226 = vmatpush1.bf16.msra.mxu0 %v4225_v24  ;;  %v4303_v24 = vpack.c.bf16 %v616_v11, %v600_v10  ;;  %v693_v10 = vld [vmem:[%s5313_s1 + $0xc20] sm:$0xff] }
  0xfb   : > { %4290 = vmatpush1.bf16.msra.mxu1 %v4289_v27  ;;  %917 = vmatprep.mubr.f32.mxu0 %v5560_v31  ;;  %v5623_v27 = vld [vmem:[%s5295_s8 + $0x90] sm:$0xff]  ;;  %v709_v11 = vld [vmem:[%s5313_s1 + $0xca0] sm:$0xff] }
  0xfc   : > { %1054 = vmatprep.mubr.f32.mxu1 %v5560_v31  ;;  %4228 = vmatprep.subr.bf16.mxu0 %v4227_v32  ;;  %v648_v32 = vld [vmem:[%s5313_s1 + $0xab8] sm:$0xff]  ;;  %v4253_v25 = vpack.c.bf16 %v709_v11, %v693_v10  ;;  %v805_v3 = vld [vmem:[%s5313_s1 + $0xfa0] sm:$0xff]  ;;  %v314_v10 = vld [vmem:[%s5313_s1 + $0x48] sm:$0xff] }
  0xfd   : > { %918 = vmatmul.mubr.f32.gmra.mrb[12].mxu0 %v5569_v39  ;;  %4292 = vmatprep.subr.bf16.mxu1 %v4291_v36  ;;  %v645_v36 = vld [vmem:[%s5313_s1 + $0xaa0] sm:$0xff]  ;;  %v330_v11 = vld [vmem:[%s5313_s1 + $0xc8] sm:$0xff] }
  0xfe   : > { %1055 = vmatmul.mubr.f32.gmra.mrb[12].mxu1 %v5569_v39  ;;  %4230 = vmatpush1.bf16.msra.mxu0 %v4229_v40  ;;  %v631_v40 = vld [vmem:[%s5313_s1 + $0xa30] sm:$0xff] }
  0xff   : > { %4294 = vmatpush1.bf16.msra.mxu1 %v4293_v44  ;;  %923 = vmatprep.mubr.f32.mxu0 %v5578_v47  ;;  %v4307_v44 = vpack.c.bf16 %v648_v32, %v632_v30  ;;  %v4309_v53 = vpack.c.bf16 %v647_v41, %v631_v40  ;;  %v725_v30 = vld [vmem:[%s5313_s1 + $0xd20] sm:$0xff]  ;;  %v774_v40 = vld [vmem:[%s5313_s1 + $0xea8] sm:$0xff]  ;;  %v760_v41 = vld [vmem:[%s5313_s1 + $0xe38] sm:$0xff] }
 0x100   : > { %1060 = vmatprep.mubr.f32.mxu1 %v5578_v47  ;;  %4232 = vmatprep.subr.bf16.mxu0 %v4231_v48  ;;  %v4245_v48 = vpack.c.bf16 %v645_v36, %v629_v34  ;;  %v741_v32 = vld [vmem:[%s5313_s1 + $0xda0] sm:$0xff]  ;;  %v743_v36 = vld [vmem:[%s5313_s1 + $0xdb0] sm:$0xff] }
 0x101   : > { %924 = vmatmul.mubr.f32.gmra.mrb[14].mxu0 %v5587_v55  ;;  %4296 = vmatprep.subr.bf16.mxu1 %v4295_v52  ;;  %v680_v52 = vld [vmem:[%s5313_s1 + $0xbb8] sm:$0xff]  ;;  %v4257_v45 = vpack.c.bf16 %v741_v32, %v725_v30  ;;  %v346_v30 = vld [vmem:[%s5313_s1 + $0x148] sm:$0xff] }
 0x102   : > { %1061 = vmatmul.mubr.f32.gmra.mrb[14].mxu1 %v5587_v55  ;;  %4234 = vmatpush1.bf16.msra.mxu0 %v4233_v57  ;;  %v677_v57 = vld [vmem:[%s5313_s1 + $0xba0] sm:$0xff]  ;;  %v362_v32 = vld [vmem:[%s5313_s1 + $0x1c8] sm:$0xff] }
 0x103   : > { %4298 = vmatpush1.bf16.msra.mxu1 %v4297_v60  ;;  %929 = vmatprep.mubr.f32.mxu0 %v5596_v0  ;;  %v679_v60 = vld [vmem:[%s5313_s1 + $0xbb0] sm:$0xff]  ;;  %v4249_v5 = vpack.c.bf16 %v677_v57, %v661_v54 }
 0x104   : > { %1066 = vmatprep.mubr.f32.mxu1 %v5596_v0  ;;  %4236 = vmatprep.subr.bf16.mxu0 %v4235_v1  ;;  %v4311_v1 = vpack.c.bf16 %v680_v52, %v664_v51  ;;  %v4313_v7 = vpack.c.bf16 %v679_v60, %v663_v58  ;;  %v757_v51 = vld [vmem:[%s5313_s1 + $0xe20] sm:$0xff]  ;;  %v775_v57 = vld [vmem:[%s5313_s1 + $0xeb0] sm:$0xff]  ;;  %v790_v58 = vld [vmem:[%s5313_s1 + $0xf28] sm:$0xff] }
 0x105   : > { %930 = vmatmul.mubr.f32.gmra.mrb[16].mxu0 %v5605_v8  ;;  %4300 = vmatprep.subr.bf16.mxu1 %v4299_v4  ;;  %v5661_v4 = vld [vmem:[%s5295_s8 + $0xb0] sm:$0xff]  ;;  %v773_v52 = vld [vmem:[%s5313_s1 + $0xea0] sm:$0xff]  ;;  %v808_v60 = vld [vmem:[%s5313_s1 + $0xfb8] sm:$0xff] }
 0x106   : > { %1067 = vmatmul.mubr.f32.gmra.mrb[16].mxu1 %v5605_v8  ;;  %4238 = vmatpush1.bf16.msra.mxu0 %v4237_v9  ;;  %v4251_v9 = vpack.c.bf16 %v710_v62, %v694_v61  ;;  %v4261_v61 = vpack.c.bf16 %v773_v52, %v757_v51  ;;  %v378_v51 = vld [vmem:[%s5313_s1 + $0x248] sm:$0xff] }
 0x107   : > { %4302 = vmatpush1.bf16.msra.mxu1 %v4301_v12  ;;  %935 = vmatprep.mubr.f32.mxu0 %v5614_v18  ;;  %v695_v12 = vld [vmem:[%s5313_s1 + $0xc30] sm:$0xff]  ;;  %v394_v52 = vld [vmem:[%s5313_s1 + $0x2c8] sm:$0xff] }
 0x108   : > { %1072 = vmatprep.mubr.f32.mxu1 %v5614_v18  ;;  %4240 = vmatprep.subr.bf16.mxu0 %v4239_v19  ;;  %v726_v19 = vld [vmem:[%s5313_s1 + $0xd28] sm:$0xff]  ;;  %v4317_v26 = vpack.c.bf16 %v711_v17, %v695_v12  ;;  %v316_v12 = vld [vmem:[%s5313_s1 + $0x58] sm:$0xff]  ;;  %v4265_v17 = vpack.c.bf16 %v805_v3, %v789_v2 }
 0x109   : > { %936 = vmatmul.mubr.f32.gmra.mrb[18].mxu0 %v5623_v27  ;;  %4304 = vmatprep.subr.bf16.mxu1 %v4303_v24  ;;  %v744_v24 = vld [vmem:[%s5313_s1 + $0xdb8] sm:$0xff]  ;;  %v426_v2 = vld [vmem:[%s5313_s1 + $0x3c8] sm:$0xff] }
 0x10a   : > { %1073 = vmatmul.mubr.f32.gmra.mrb[18].mxu1 %v5623_v27  ;;  %4242 = vmatpush1.bf16.msra.mxu0 %v4241_v29  ;;  %v4255_v29 = vpack.c.bf16 %v742_v20, %v726_v19  ;;  %v4319_v34 = vpack.c.bf16 %v744_v24, %v728_v22  ;;  %v4331_v20 = vpack.c.bf16 %v330_v11, %v314_v10  ;;  %v313_v22 = vld [vmem:[%s5313_s1 + $0x40] sm:$0xff] }
 0x10b   : > { %4306 = vmatpush1.bf16.msra.mxu1 %v4305_v33  ;;  %941 = vmatprep.mubr.f32.mxu0 %v5632_v37  ;;  %v727_v33 = vld [vmem:[%s5313_s1 + $0xd30] sm:$0xff]  ;;  %v329_v24 = vld [vmem:[%s5313_s1 + $0xc0] sm:$0xff] }
 0x10c   : > { %1078 = vmatprep.mubr.f32.mxu1 %v5632_v37  ;;  %4244 = vmatprep.subr.bf16.mxu0 %v4243_v38  ;;  %v758_v38 = vld [vmem:[%s5313_s1 + $0xe28] sm:$0xff]  ;;  %v4321_v46 = vpack.c.bf16 %v743_v36, %v727_v33  ;;  %v4333_v33 = vpack.c.bf16 %v329_v24, %v313_v22  ;;  %v364_v36 = vld [vmem:[%s5313_s1 + $0x1d8] sm:$0xff]  ;;  %v425_v10 = vld [vmem:[%s5313_s1 + $0x3c0] sm:$0xff] }
 0x10d   : > { %942 = vmatmul.mubr.f32.gmra.mrb[20].mxu0 %v5638_v43  ;;  %4308 = vmatprep.subr.bf16.mxu1 %v4307_v44  ;;  %v776_v44 = vld [vmem:[%s5313_s1 + $0xeb8] sm:$0xff] }
 0x10e   : > { %1079 = vmatmul.mubr.f32.gmra.mrb[20].mxu1 %v5638_v43  ;;  %4246 = vmatpush1.bf16.msra.mxu0 %v4245_v48  ;;  %v4259_v48 = vpack.c.bf16 %v774_v40, %v758_v38  ;;  %v4323_v54 = vpack.c.bf16 %v776_v44, %v760_v41  ;;  %v345_v40 = vld [vmem:[%s5313_s1 + $0x140] sm:$0xff]  ;;  %v4335_v44 = vpack.c.bf16 %v362_v32, %v346_v30  ;;  %v460_v22 = vld [vmem:[%s5313_s1 + $0x4d8] sm:$0xff]  ;;  %v459_v30 = vld [vmem:[%s5313_s1 + $0x4d0] sm:$0xff] }
 0x10f   : > { %4310 = vmatpush1.bf16.msra.mxu1 %v4309_v53  ;;  %947 = vmatprep.mubr.f32.mxu0 %v5644_v50  ;;  %v759_v53 = vld [vmem:[%s5313_s1 + $0xe30] sm:$0xff]  ;;  %v361_v41 = vld [vmem:[%s5313_s1 + $0x1c0] sm:$0xff] }
 0x110   : > { %1084 = vmatprep.mubr.f32.mxu1 %v5644_v50  ;;  %4248 = vmatprep.subr.bf16.mxu0 %v4247_v59  ;;  %v792_v59 = vld [vmem:[%s5313_s1 + $0xf38] sm:$0xff]  ;;  %v4325_v62 = vpack.c.bf16 %v775_v57, %v759_v53  ;;  %v4337_v53 = vpack.c.bf16 %v361_v41, %v345_v40  ;;  %v473_v41 = vld [vmem:[%s5313_s1 + $0x540] sm:$0xff] }
 0x111   : > { %948 = vmatmul.mubr.f32.gmra.mrb[22].mxu0 %v5661_v4  ;;  %4312 = vmatprep.subr.bf16.mxu1 %v4311_v1  ;;  %v396_v57 = vld [vmem:[%s5313_s1 + $0x2d8] sm:$0xff] }
 0x112   : > { %1085 = vmatmul.mubr.f32.gmra.mrb[22].mxu1 %v5661_v4  ;;  %4250 = vmatpush1.bf16.msra.mxu0 %v4249_v5  ;;  %v791_v5 = vld [vmem:[%s5313_s1 + $0xf30] sm:$0xff] }
 0x113   : > { %4314 = vmatpush1.bf16.msra.mxu1 %v4313_v7  ;;  %4252 = vmatprep.subr.bf16.mxu0 %v4251_v9  ;;  %v4327_v7 = vpack.c.bf16 %v808_v60, %v792_v59  ;;  %v807_v9 = vld [vmem:[%s5313_s1 + $0xfb0] sm:$0xff]  ;;  %v393_v59 = vld [vmem:[%s5313_s1 + $0x2c0] sm:$0xff]  ;;  %v4339_v60 = vpack.c.bf16 %v394_v52, %v378_v51  ;;  %v506_v51 = vld [vmem:[%s5313_s1 + $0x648] sm:$0xff] }
 0x114   : > { %4316 = vmatprep.subr.bf16.mxu1 %v4315_v15  ;;  %1155 = vmatprep.mubr.f32.mxu0 %v5418_v16  ;;  %v332_v15 = vld [vmem:[%s5313_s1 + $0xd8] sm:$0xff]  ;;  %v4329_v19 = vpack.c.bf16 %v807_v9, %v791_v5  ;;  %v409_v9 = vld [vmem:[%s5313_s1 + $0x340] sm:$0xff]  ;;  %v522_v52 = vld [vmem:[%s5313_s1 + $0x6c8] sm:$0xff] }
 0x115   : > { %1292 = vmatprep.mubr.f32.mxu1 %v5418_v16  ;;  %v806_v16 = vld [vmem:[%s5313_s1 + $0xfa8] sm:$0xff]  ;;  %v428_v5 = vld [vmem:[%s5313_s1 + $0x3d8] sm:$0xff] }
 0x116   : > { %4254 = vmatpush1.bf16.msra.mxu0 %v4253_v25  ;;  %v4263_v1 = vpack.c.bf16 %v806_v16, %v790_v58  ;;  %v4395_v25 = vpack.c.bf16 %v332_v15, %v316_v12  ;;  %v377_v16 = vld [vmem:[%s5313_s1 + $0x240] sm:$0xff]  ;;  %v427_v12 = vld [vmem:[%s5313_s1 + $0x3d0] sm:$0xff] }
 0x117   : > { %4318 = vmatpush1.bf16.msra.mxu1 %v4317_v26  ;;  %4256 = vmatprep.subr.bf16.mxu0 %v4255_v29  ;;  %v315_v26 = vld [vmem:[%s5313_s1 + $0x50] sm:$0xff]  ;;  %v4341_v3 = vpack.c.bf16 %v393_v59, %v377_v16  ;;  %v521_v16 = vld [vmem:[%s5313_s1 + $0x6c0] sm:$0xff]  ;;  %v4355_v59 = vpack.c.bf16 %v522_v52, %v506_v51 }
 0x118   : > { %4320 = vmatprep.subr.bf16.mxu1 %v4319_v34  ;;  %v331_v29 = vld [vmem:[%s5313_s1 + $0xd0] sm:$0xff]  ;;  %v348_v34 = vld [vmem:[%s5313_s1 + $0x158] sm:$0xff] }
 0x119   : > { %v4397_v38 = vpack.c.bf16 %v331_v29, %v315_v26  ;;  %v457_v26 = vld [vmem:[%s5313_s1 + $0x4c0] sm:$0xff]  ;;  %v651_v51 = vld [vmem:[%s5313_s1 + $0xad0] sm:$0xff] }
 0x11a   : > { %4258 = vmatpush1.bf16.msra.mxu0 %v4257_v45  ;;  %v347_v45 = vld [vmem:[%s5313_s1 + $0x150] sm:$0xff] }
 0x11b   : > { %4322 = vmatpush1.bf16.msra.mxu1 %v4321_v46  ;;  %4260 = vmatprep.subr.bf16.mxu0 %v4259_v48  ;;  %v363_v46 = vld [vmem:[%s5313_s1 + $0x1d0] sm:$0xff]  ;;  %v4399_v48 = vpack.c.bf16 %v364_v36, %v348_v34  ;;  %v490_v34 = vld [vmem:[%s5313_s1 + $0x5c8] sm:$0xff] }
 0x11c   : > { %4324 = vmatprep.subr.bf16.mxu1 %v4323_v54  ;;  %v380_v54 = vld [vmem:[%s5313_s1 + $0x258] sm:$0xff]  ;;  %v4401_v58 = vpack.c.bf16 %v363_v46, %v347_v45  ;;  %v491_v46 = vld [vmem:[%s5313_s1 + $0x5d0] sm:$0xff] }
 0x11e   : > { %4262 = vmatpush1.bf16.msra.mxu0 %v4261_v61  ;;  %v395_v61 = vld [vmem:[%s5313_s1 + $0x2d0] sm:$0xff] }
 0x11f   : > { %4326 = vmatpush1.bf16.msra.mxu1 %v4325_v62  ;;  %4264 = vmatprep.subr.bf16.mxu0 %v4263_v1  ;;  %v4403_v62 = vpack.c.bf16 %v396_v57, %v380_v54  ;;  %v410_v1 = vld [vmem:[%s5313_s1 + $0x348] sm:$0xff]  ;;  %v524_v54 = vld [vmem:[%s5313_s1 + $0x6d8] sm:$0xff] }
 0x120   : > { %4328 = vmatprep.subr.bf16.mxu1 %v4327_v7  ;;  %v4343_v11 = vpack.c.bf16 %v426_v2, %v410_v1  ;;  %v556_v2 = vld [vmem:[%s5313_s1 + $0x7d8] sm:$0xff] }
 0x122   : > { %4266 = vmatpush1.bf16.msra.mxu0 %v4265_v17  ;;  %v442_v17 = vld [vmem:[%s5313_s1 + $0x448] sm:$0xff] }
 0x123   : > { %4330 = vmatpush1.bf16.msra.mxu1 %v4329_v19  ;;  %4332 = vmatprep.subr.bf16.mxu0 %v4331_v20  ;;  %v458_v19 = vld [vmem:[%s5313_s1 + $0x4c8] sm:$0xff]  ;;  %v4345_v20 = vpack.c.bf16 %v425_v10, %v409_v9  ;;  %v555_v9 = vld [vmem:[%s5313_s1 + $0x7d0] sm:$0xff] }
 0x124   : > { %4396 = vmatprep.subr.bf16.mxu1 %v4395_v25  ;;  %v441_v25 = vld [vmem:[%s5313_s1 + $0x440] sm:$0xff]  ;;  %v4347_v29 = vpack.c.bf16 %v458_v19, %v442_v17 }
 0x125   : > { %1156 = vmatmul.mubr.f32.vlgmr.msra.gmra.mrb[24].mxu0 %v5463_v13  ;;  %v4349_v36 = vpack.c.bf16 %v457_v26, %v441_v25  ;;  %v569_v19 = vld [vmem:[%s5313_s1 + $0x840] sm:$0xff]  ;;  %v602_v25 = vld [vmem:[%s5313_s1 + $0x948] sm:$0xff] }
 0x126   : > { %1293 = vmatmul.mubr.f32.vlgmr.msra.gmra.mrb[24].mxu1 %v5463_v13  ;;  %4334 = vmatpush1.bf16.msra.mxu0 %v4333_v33  ;;  %v379_v13 = vld [vmem:[%s5313_s1 + $0x250] sm:$0xff]  ;;  %v474_v33 = vld [vmem:[%s5313_s1 + $0x548] sm:$0xff] }
 0x127   : > { %4398 = vmatpush1.bf16.msra.mxu1 %v4397_v38  ;;  %1161 = vmatprep.mubr.f32.mxu0 %v5470_v21  ;;  %v4405_v7 = vpack.c.bf16 %v395_v61, %v379_v13  ;;  %v492_v38 = vld [vmem:[%s5313_s1 + $0x5d8] sm:$0xff]  ;;  %v4351_v45 = vpack.c.bf16 %v490_v34, %v474_v33  ;;  %v538_v61 = vld [vmem:[%s5313_s1 + $0x748] sm:$0xff]  ;;  %v617_v33 = vld [vmem:[%s5313_s1 + $0x9c0] sm:$0xff] }
 0x128   : > { %1298 = vmatprep.mubr.f32.mxu1 %v5470_v21  ;;  %4336 = vmatprep.subr.bf16.mxu0 %v4335_v44  ;;  %v412_v21 = vld [vmem:[%s5313_s1 + $0x358] sm:$0xff]  ;;  %v489_v44 = vld [vmem:[%s5313_s1 + $0x5c0] sm:$0xff]  ;;  %v618_v26 = vld [vmem:[%s5313_s1 + $0x9c8] sm:$0xff] }
 0x129   : > { %1162 = vmatmul.mubr.f32.gmra.mrb[26].mxu0 %v5479_v28  ;;  %4400 = vmatprep.subr.bf16.mxu1 %v4399_v48  ;;  %v4407_v15 = vpack.c.bf16 %v428_v5, %v412_v21  ;;  %v537_v21 = vld [vmem:[%s5313_s1 + $0x740] sm:$0xff]  ;;  %v4367_v34 = vpack.c.bf16 %v618_v26, %v602_v25  ;;  %v780_v25 = vld [vmem:[%s5313_s1 + $0xed8] sm:$0xff] }
 0x12a   : > { %1299 = vmatmul.mubr.f32.gmra.mrb[26].mxu1 %v5479_v28  ;;  %4338 = vmatpush1.bf16.msra.mxu0 %v4337_v53  ;;  %v411_v28 = vld [vmem:[%s5313_s1 + $0x350] sm:$0xff]  ;;  %v4353_v53 = vpack.c.bf16 %v489_v44, %v473_v41  ;;  %v553_v5 = vld [vmem:[%s5313_s1 + $0x7c0] sm:$0xff]  ;;  %v652_v44 = vld [vmem:[%s5313_s1 + $0xad8] sm:$0xff] }
 0x12b   : > { %4402 = vmatpush1.bf16.msra.mxu1 %v4401_v58  ;;  %1167 = vmatprep.mubr.f32.mxu0 %v5488_v35  ;;  %v4409_v24 = vpack.c.bf16 %v427_v12, %v411_v28  ;;  %v505_v58 = vld [vmem:[%s5313_s1 + $0x640] sm:$0xff]  ;;  %v586_v28 = vld [vmem:[%s5313_s1 + $0x8c8] sm:$0xff]  ;;  %v4361_v12 = vpack.c.bf16 %v553_v5, %v537_v21 }
 0x12c   : > { %1304 = vmatprep.mubr.f32.mxu1 %v5488_v35  ;;  %4340 = vmatprep.subr.bf16.mxu0 %v4339_v60  ;;  %v444_v35 = vld [vmem:[%s5313_s1 + $0x458] sm:$0xff]  ;;  %v523_v60 = vld [vmem:[%s5313_s1 + $0x6d0] sm:$0xff]  ;;  %v4357_v1 = vpack.c.bf16 %v521_v16, %v505_v58  ;;  %v665_v16 = vld [vmem:[%s5313_s1 + $0xb40] sm:$0xff] }
 0x12d   : > { %1168 = vmatmul.mubr.f32.gmra.mrb[28].mxu0 %v5497_v42  ;;  %4404 = vmatprep.subr.bf16.mxu1 %v4403_v62  ;;  %v4411_v32 = vpack.c.bf16 %v460_v22, %v444_v35  ;;  %v554_v62 = vld [vmem:[%s5313_s1 + $0x7c8] sm:$0xff]  ;;  %v587_v22 = vld [vmem:[%s5313_s1 + $0x8d0] sm:$0xff]  ;;  %v697_v21 = vld [vmem:[%s5313_s1 + $0xc40] sm:$0xff] }
 0x12e   : > { %1305 = vmatmul.mubr.f32.gmra.mrb[28].mxu1 %v5497_v42  ;;  %4342 = vmatpush1.bf16.msra.mxu0 %v4341_v3  ;;  %v443_v42 = vld [vmem:[%s5313_s1 + $0x450] sm:$0xff]  ;;  %v713_v5 = vld [vmem:[%s5313_s1 + $0xcc0] sm:$0xff] }
 0x12f   : > { %4406 = vmatpush1.bf16.msra.mxu1 %v4405_v7  ;;  %1173 = vmatprep.mubr.f32.mxu0 %v5506_v49  ;;  %v4413_v40 = vpack.c.bf16 %v459_v30, %v443_v42  ;;  %v4359_v7 = vpack.c.bf16 %v554_v62, %v538_v61  ;;  %v620_v42 = vld [vmem:[%s5313_s1 + $0x9d8] sm:$0xff]  ;;  %v714_v61 = vld [vmem:[%s5313_s1 + $0xcc8] sm:$0xff] }
 0x130   : > { %1310 = vmatprep.mubr.f32.mxu1 %v5506_v49  ;;  %4344 = vmatprep.subr.bf16.mxu0 %v4343_v11  ;;  %v476_v49 = vld [vmem:[%s5313_s1 + $0x558] sm:$0xff]  ;;  %v570_v11 = vld [vmem:[%s5313_s1 + $0x848] sm:$0xff] }
 0x131   : > { %1174 = vmatmul.mubr.f32.gmra.mrb[30].mxu0 %v5515_v56  ;;  %4408 = vmatprep.subr.bf16.mxu1 %v4407_v15  ;;  %v4415_v48 = vpack.c.bf16 %v492_v38, %v476_v49  ;;  %v588_v15 = vld [vmem:[%s5313_s1 + $0x8d8] sm:$0xff]  ;;  %v4363_v35 = vpack.c.bf16 %v586_v28, %v570_v11  ;;  %v634_v38 = vld [vmem:[%s5313_s1 + $0xa48] sm:$0xff] }
 0x132   : > { %1311 = vmatmul.mubr.f32.gmra.mrb[30].mxu1 %v5515_v56  ;;  %4346 = vmatpush1.bf16.msra.mxu0 %v4345_v20  ;;  %v475_v56 = vld [vmem:[%s5313_s1 + $0x550] sm:$0xff]  ;;  %v585_v20 = vld [vmem:[%s5313_s1 + $0x8c0] sm:$0xff]  ;;  %v732_v11 = vld [vmem:[%s5313_s1 + $0xd58] sm:$0xff] }
 0x133   : > { %4410 = vmatpush1.bf16.msra.mxu1 %v4409_v24  ;;  %1179 = vmatprep.mubr.f32.mxu0 %v5524_v63  ;;  %v4417_v57 = vpack.c.bf16 %v491_v46, %v475_v56  ;;  %v633_v56 = vld [vmem:[%s5313_s1 + $0xa40] sm:$0xff]  ;;  %v748_v28 = vld [vmem:[%s5313_s1 + $0xdd8] sm:$0xff] }
 0x134   : > { %1316 = vmatprep.mubr.f32.mxu1 %v5524_v63  ;;  %4348 = vmatprep.subr.bf16.mxu0 %v4347_v29  ;;  %v508_v63 = vld [vmem:[%s5313_s1 + $0x658] sm:$0xff]  ;;  %v4365_v29 = vpack.c.bf16 %v585_v20, %v569_v19  ;;  %v649_v46 = vld [vmem:[%s5313_s1 + $0xac0] sm:$0xff]  ;;  %v731_v19 = vld [vmem:[%s5313_s1 + $0xd50] sm:$0xff]  ;;  %v4447_v20 = vpack.c.bf16 %v748_v28, %v732_v11 }
 0x135   : > { %1180 = vmatmul.mubr.f32.gmra.mrb[32].mxu0 %v5533_v6  ;;  %4412 = vmatprep.subr.bf16.mxu1 %v4411_v32  ;;  %v4419_v13 = vpack.c.bf16 %v524_v54, %v508_v63  ;;  %v601_v32 = vld [vmem:[%s5313_s1 + $0x940] sm:$0xff]  ;;  %v682_v63 = vld [vmem:[%s5313_s1 + $0xbc8] sm:$0xff]  ;;  %v668_v54 = vld [vmem:[%s5313_s1 + $0xb58] sm:$0xff] }
 0x136   : > { %1317 = vmatmul.mubr.f32.gmra.mrb[32].mxu1 %v5533_v6  ;;  %4350 = vmatpush1.bf16.msra.mxu0 %v4349_v36  ;;  %v507_v6 = vld [vmem:[%s5313_s1 + $0x650] sm:$0xff]  ;;  %v4369_v41 = vpack.c.bf16 %v617_v33, %v601_v32  ;;  %v400_v11 = vld [vmem:[%s5313_s1 + $0x2f8] sm:$0xff] }
 0x137   : > { %4414 = vmatpush1.bf16.msra.mxu1 %v4413_v40  ;;  %1185 = vmatprep.mubr.f32.mxu0 %v5542_v14  ;;  %v4421_v3 = vpack.c.bf16 %v523_v60, %v507_v6  ;;  %v619_v36 = vld [vmem:[%s5313_s1 + $0x9d0] sm:$0xff]  ;;  %v650_v40 = vld [vmem:[%s5313_s1 + $0xac8] sm:$0xff]  ;;  %v5902_v28 = vld [vmem:[%s5295_s8 + $0x18] sm:$0xff] }
 0x138   : > { %1322 = vmatprep.mubr.f32.mxu1 %v5542_v14  ;;  %4352 = vmatprep.subr.bf16.mxu0 %v4351_v45  ;;  %v540_v14 = vld [vmem:[%s5313_s1 + $0x758] sm:$0xff]  ;;  %v667_v6 = vld [vmem:[%s5313_s1 + $0xb50] sm:$0xff] }
 0x139   : > { %1186 = vmatmul.mubr.f32.gmra.mrb[34].mxu0 %v5551_v23  ;;  %4416 = vmatprep.subr.bf16.mxu1 %v4415_v48  ;;  %v4423_v10 = vpack.c.bf16 %v556_v2, %v540_v14  ;;  %v4371_v48 = vpack.c.bf16 %v650_v40, %v634_v38  ;;  %v716_v14 = vld [vmem:[%s5313_s1 + $0xcd8] sm:$0xff]  ;;  %v763_v32 = vld [vmem:[%s5313_s1 + $0xe50] sm:$0xff] }
 0x13a   : > { %1323 = vmatmul.mubr.f32.gmra.mrb[34].mxu1 %v5551_v23  ;;  %4354 = vmatpush1.bf16.msra.mxu0 %v4353_v53  ;;  %v539_v23 = vld [vmem:[%s5313_s1 + $0x750] sm:$0xff]  ;;  %v666_v53 = vld [vmem:[%s5313_s1 + $0xb48] sm:$0xff]  ;;  %v812_v38 = vld [vmem:[%s5313_s1 + $0xfd8] sm:$0xff] }
 0x13b   : > { %4418 = vmatpush1.bf16.msra.mxu1 %v4417_v57  ;;  %1191 = vmatprep.mubr.f32.mxu0 %v5560_v31  ;;  %v4425_v17 = vpack.c.bf16 %v555_v9, %v539_v23  ;;  %v684_v57 = vld [vmem:[%s5313_s1 + $0xbd8] sm:$0xff]  ;;  %v4375_v60 = vpack.c.bf16 %v682_v63, %v666_v53  ;;  %v715_v9 = vld [vmem:[%s5313_s1 + $0xcd0] sm:$0xff] }
 0x13c   : > { %1328 = vmatprep.mubr.f32.mxu1 %v5560_v31  ;;  %4356 = vmatprep.subr.bf16.mxu0 %v4355_v59  ;;  %v572_v31 = vld [vmem:[%s5313_s1 + $0x858] sm:$0xff]  ;;  %v681_v59 = vld [vmem:[%s5313_s1 + $0xbc0] sm:$0xff]  ;;  %v4439_v62 = vpack.c.bf16 %v684_v57, %v668_v54 }
 0x13d   : > { %1192 = vmatmul.mubr.f32.gmra.mrb[36].mxu0 %v5569_v39  ;;  %4420 = vmatprep.subr.bf16.mxu1 %v4419_v13  ;;  %v4427_v24 = vpack.c.bf16 %v588_v15, %v572_v31  ;;  %v698_v13 = vld [vmem:[%s5313_s1 + $0xc48] sm:$0xff]  ;;  %v729_v15 = vld [vmem:[%s5313_s1 + $0xd40] sm:$0xff]  ;;  %v336_v53 = vld [vmem:[%s5313_s1 + $0xf8] sm:$0xff] }
 0x13e   : > { %1329 = vmatmul.mubr.f32.gmra.mrb[36].mxu1 %v5569_v39  ;;  %4358 = vmatpush1.bf16.msra.mxu0 %v4357_v1  ;;  %v571_v39 = vld [vmem:[%s5313_s1 + $0x850] sm:$0xff]  ;;  %v700_v1 = vld [vmem:[%s5313_s1 + $0xc58] sm:$0xff]  ;;  %v317_v57 = vld [vmem:[%s5313_s1 + $0x60] sm:$0xff] }
 0x13f   : > { %4422 = vmatpush1.bf16.msra.mxu1 %v4421_v3  ;;  %1197 = vmatprep.mubr.f32.mxu0 %v5578_v47  ;;  %v4429_v30 = vpack.c.bf16 %v587_v22, %v571_v39  ;;  %v4379_v3 = vpack.c.bf16 %v714_v61, %v698_v13  ;;  %v4443_v23 = vpack.c.bf16 %v716_v14, %v700_v1  ;;  %v762_v39 = vld [vmem:[%s5313_s1 + $0xe48] sm:$0xff]  ;;  %v352_v61 = vld [vmem:[%s5313_s1 + $0x178] sm:$0xff]  ;;  %v349_v14 = vld [vmem:[%s5313_s1 + $0x160] sm:$0xff] }
 0x140   : > { %1334 = vmatprep.mubr.f32.mxu1 %v5578_v47  ;;  %4360 = vmatprep.subr.bf16.mxu0 %v4359_v7  ;;  %v604_v47 = vld [vmem:[%s5313_s1 + $0x958] sm:$0xff]  ;;  %v699_v7 = vld [vmem:[%s5313_s1 + $0xc50] sm:$0xff]  ;;  %v778_v22 = vld [vmem:[%s5313_s1 + $0xec8] sm:$0xff] }
 0x141   : > { %1198 = vmatmul.mubr.f32.gmra.mrb[38].mxu0 %v5587_v55  ;;  %4424 = vmatprep.subr.bf16.mxu1 %v4423_v10  ;;  %v4431_v49 = vpack.c.bf16 %v620_v42, %v604_v47  ;;  %v746_v10 = vld [vmem:[%s5313_s1 + $0xdc8] sm:$0xff]  ;;  %v4387_v47 = vpack.c.bf16 %v778_v22, %v762_v39  ;;  %v761_v42 = vld [vmem:[%s5313_s1 + $0xe40] sm:$0xff] }
 0x142   : > { %1335 = vmatmul.mubr.f32.gmra.mrb[38].mxu1 %v5587_v55  ;;  %4362 = vmatpush1.bf16.msra.mxu0 %v4361_v12  ;;  %v603_v55 = vld [vmem:[%s5313_s1 + $0x950] sm:$0xff]  ;;  %v4445_v12 = vpack.c.bf16 %v715_v9, %v699_v7  ;;  %v398_v9 = vld [vmem:[%s5313_s1 + $0x2e8] sm:$0xff] }
 0x143   : > { %4426 = vmatpush1.bf16.msra.mxu1 %v4425_v17  ;;  %1203 = vmatprep.mubr.f32.mxu0 %v5596_v0  ;;  %v4433_v45 = vpack.c.bf16 %v619_v36, %v603_v55  ;;  %v745_v17 = vld [vmem:[%s5313_s1 + $0xdc0] sm:$0xff]  ;;  %v794_v55 = vld [vmem:[%s5313_s1 + $0xf48] sm:$0xff] }
 0x144   : > { %1340 = vmatprep.mubr.f32.mxu1 %v5596_v0  ;;  %4364 = vmatprep.subr.bf16.mxu0 %v4363_v35  ;;  %v636_v0 = vld [vmem:[%s5313_s1 + $0xa58] sm:$0xff]  ;;  %v747_v35 = vld [vmem:[%s5313_s1 + $0xdd0] sm:$0xff]  ;;  %v4385_v26 = vpack.c.bf16 %v745_v17, %v729_v15  ;;  %v810_v36 = vld [vmem:[%s5313_s1 + $0xfc8] sm:$0xff] }
 0x145   : > { %1204 = vmatmul.mubr.f32.gmra.mrb[40].mxu0 %v5605_v8  ;;  %4428 = vmatprep.subr.bf16.mxu1 %v4427_v24  ;;  %v4435_v52 = vpack.c.bf16 %v652_v44, %v636_v0  ;;  %v764_v24 = vld [vmem:[%s5313_s1 + $0xe58] sm:$0xff]  ;;  %v4391_v0 = vpack.c.bf16 %v810_v36, %v794_v55  ;;  %v793_v44 = vld [vmem:[%s5313_s1 + $0xf40] sm:$0xff]  ;;  %v383_v17 = vld [vmem:[%s5313_s1 + $0x270] sm:$0xff] }
 0x146   : > { %1341 = vmatmul.mubr.f32.gmra.mrb[40].mxu1 %v5605_v8  ;;  %4366 = vmatpush1.bf16.msra.mxu0 %v4365_v29  ;;  %v635_v8 = vld [vmem:[%s5313_s1 + $0xa50] sm:$0xff]  ;;  %v4449_v29 = vpack.c.bf16 %v747_v35, %v731_v19  ;;  %v4451_v33 = vpack.c.bf16 %v780_v25, %v764_v24  ;;  %v414_v39 = vld [vmem:[%s5313_s1 + $0x368] sm:$0xff]  ;;  %v416_v25 = vld [vmem:[%s5313_s1 + $0x378] sm:$0xff] }
 0x147   : > { %4430 = vmatpush1.bf16.msra.mxu1 %v4429_v30  ;;  %1209 = vmatprep.mubr.f32.mxu0 %v5614_v18  ;;  %v4437_v58 = vpack.c.bf16 %v651_v51, %v635_v8  ;;  %v777_v30 = vld [vmem:[%s5313_s1 + $0xec0] sm:$0xff]  ;;  %v318_v8 = vld [vmem:[%s5313_s1 + $0x68] sm:$0xff]  ;;  %v399_v19 = vld [vmem:[%s5313_s1 + $0x2f0] sm:$0xff] }
 0x148   : > { %1346 = vmatprep.mubr.f32.mxu1 %v5614_v18  ;;  %4368 = vmatprep.subr.bf16.mxu0 %v4367_v34  ;;  %v4373_v18 = vpack.c.bf16 %v649_v46, %v633_v56  ;;  %v779_v34 = vld [vmem:[%s5313_s1 + $0xed0] sm:$0xff]  ;;  %v4389_v40 = vpack.c.bf16 %v777_v30, %v761_v42  ;;  %v334_v51 = vld [vmem:[%s5313_s1 + $0xe8] sm:$0xff]  ;;  %v413_v42 = vld [vmem:[%s5313_s1 + $0x360] sm:$0xff] }
 0x149   : > { %1210 = vmatmul.mubr.f32.gmra.mrb[42].mxu0 %v5623_v27  ;;  %4432 = vmatprep.subr.bf16.mxu1 %v4431_v49  ;;  %v796_v49 = vld [vmem:[%s5313_s1 + $0xf58] sm:$0xff]  ;;  %v795_v56 = vld [vmem:[%s5313_s1 + $0xf50] sm:$0xff]  ;;  %v4459_v54 = vpack.c.bf16 %v334_v51, %v318_v8  ;;  %v430_v22 = vld [vmem:[%s5313_s1 + $0x3e8] sm:$0xff] }
 0x14a   : > { %1347 = vmatmul.mubr.f32.gmra.mrb[42].mxu1 %v5623_v27  ;;  %4370 = vmatpush1.bf16.msra.mxu0 %v4369_v41  ;;  %v683_v27 = vld [vmem:[%s5313_s1 + $0xbd0] sm:$0xff]  ;;  %v4453_v41 = vpack.c.bf16 %v779_v34, %v763_v32  ;;  %v4455_v46 = vpack.c.bf16 %v812_v38, %v796_v49  ;;  %v429_v30 = vld [vmem:[%s5313_s1 + $0x3e0] sm:$0xff]  ;;  %v4471_v32 = vpack.c.bf16 %v430_v22, %v414_v39  ;;  %v446_v49 = vld [vmem:[%s5313_s1 + $0x468] sm:$0xff] }
 0x14b   : > { %4434 = vmatpush1.bf16.msra.mxu1 %v4433_v45  ;;  %1215 = vmatprep.mubr.f32.mxu0 %v5632_v37  ;;  %v4441_v2 = vpack.c.bf16 %v683_v27, %v667_v6  ;;  %v809_v45 = vld [vmem:[%s5313_s1 + $0xfc0] sm:$0xff]  ;;  %v335_v6 = vld [vmem:[%s5313_s1 + $0xf0] sm:$0xff]  ;;  %v366_v27 = vld [vmem:[%s5313_s1 + $0x1e8] sm:$0xff] }
 0x14c   : > { %1352 = vmatprep.mubr.f32.mxu1 %v5632_v37  ;;  %4372 = vmatprep.subr.bf16.mxu0 %v4371_v48  ;;  %v4377_v37 = vpack.c.bf16 %v681_v59, %v665_v16  ;;  %v811_v48 = vld [vmem:[%s5313_s1 + $0xfd0] sm:$0xff]  ;;  %v4393_v63 = vpack.c.bf16 %v809_v45, %v793_v44  ;;  %v5929_v55 = vld [vmem:[%s5295_s8 + $0x20] sm:$0xff]  ;;  %v462_v38 = vld [vmem:[%s5313_s1 + $0x4e8] sm:$0xff] }
 0x14d   : > { %1216 = vmatmul.mubr.f32.gmra.mrb[44].mxu0 %v5638_v43  ;;  %4436 = vmatprep.subr.bf16.mxu1 %v4435_v52  ;;  %v320_v52 = vld [vmem:[%s5313_s1 + $0x78] sm:$0xff]  ;;  %v319_v59 = vld [vmem:[%s5313_s1 + $0x70] sm:$0xff]  ;;  %v5992_v22 = vld [vmem:[%s5295_s8 + $0x68] sm:$0xff] }
 0x14e   : > { %1353 = vmatmul.mubr.f32.gmra.mrb[44].mxu1 %v5638_v43  ;;  %4374 = vmatpush1.bf16.msra.mxu0 %v4373_v18  ;;  %v730_v43 = vld [vmem:[%s5313_s1 + $0xd48] sm:$0xff]  ;;  %v4457_v18 = vpack.c.bf16 %v811_v48, %v795_v56  ;;  %v4523_v16 = vpack.c.bf16 %v336_v53, %v320_v52  ;;  %v4525_v1 = vpack.c.bf16 %v335_v6, %v319_v59  ;;  %v431_v34 = vld [vmem:[%s5313_s1 + $0x3f0] sm:$0xff]  ;;  %v5938_v44 = vld [vmem:[%s5295_s8 + $0x38] sm:$0xff] }
 0x14f   : > { %4438 = vmatpush1.bf16.msra.mxu1 %v4437_v58  ;;  %1221 = vmatprep.mubr.f32.mxu0 %v5644_v50  ;;  %v4383_v31 = vpack.c.bf16 %v746_v10, %v730_v43  ;;  %v333_v58 = vld [vmem:[%s5313_s1 + $0xe0] sm:$0xff]  ;;  %v384_v10 = vld [vmem:[%s5313_s1 + $0x278] sm:$0xff]  ;;  %v4475_v48 = vpack.c.bf16 %v462_v38, %v446_v49  ;;  %v447_v8 = vld [vmem:[%s5313_s1 + $0x470] sm:$0xff] }
 0x150   : > { %1358 = vmatprep.mubr.f32.mxu1 %v5644_v50  ;;  %4376 = vmatprep.subr.bf16.mxu0 %v4375_v60  ;;  %v4381_v50 = vpack.c.bf16 %v713_v5, %v697_v21  ;;  %v350_v60 = vld [vmem:[%s5313_s1 + $0x168] sm:$0xff]  ;;  %v4461_v13 = vpack.c.bf16 %v333_v58, %v317_v57  ;;  %v367_v21 = vld [vmem:[%s5313_s1 + $0x1f0] sm:$0xff]  ;;  %v5893_v5 = vld [vmem:[%s5295_s8] sm:$0xff]  ;;  %v4531_v35 = vpack.c.bf16 %v400_v11, %v384_v10 }
 0x151   : > { %1222 = vmatmul.mubr.f32.gmra.mrb[46].mxu0 %v5661_v4  ;;  %4440 = vmatprep.subr.bf16.mxu1 %v4439_v62  ;;  %v368_v62 = vld [vmem:[%s5313_s1 + $0x1f8] sm:$0xff]  ;;  %v445_v56 = vld [vmem:[%s5313_s1 + $0x460] sm:$0xff]  ;;  %v463_v51 = vld [vmem:[%s5313_s1 + $0x4f0] sm:$0xff] }
 0x152   : > { %1359 = vmatmul.mubr.f32.gmra.mrb[46].mxu1 %v5661_v4  ;;  %4378 = vmatpush1.bf16.msra.mxu0 %v4377_v37  ;;  %v5858_v4 = vld [vmem:[%s5295_s8 + $0x8] sm:$0xff]  ;;  %v365_v37 = vld [vmem:[%s5313_s1 + $0x1e0] sm:$0xff]  ;;  %v4527_v7 = vpack.c.bf16 %v368_v62, %v352_v61  ;;  %v5947_v52 = vld [vmem:[%s5295_s8 + $0x30] sm:$0xff]  ;;  %v4541_v59 = vpack.c.bf16 %v463_v51, %v447_v8 }
 0x153   : > { %4442 = vmatpush1.bf16.msra.mxu1 %v4441_v2  ;;  %4380 = vmatprep.subr.bf16.mxu0 %v4379_v3  ;;  %v4463_v2 = vpack.c.bf16 %v366_v27, %v350_v60  ;;  %v351_v3 = vld [vmem:[%s5313_s1 + $0x170] sm:$0xff]  ;;  %v4465_v43 = vpack.c.bf16 %v365_v37, %v349_v14  ;;  %v480_v57 = vld [vmem:[%s5313_s1 + $0x578] sm:$0xff]  ;;  %v477_v6 = vld [vmem:[%s5313_s1 + $0x560] sm:$0xff] }
 0x154   : > { %4444 = vmatprep.subr.bf16.mxu1 %v4443_v23  ;;  %1429 = vmatprep.mubr.f32.mxu0 %v5858_v4  ;;  %v382_v23 = vld [vmem:[%s5313_s1 + $0x268] sm:$0xff]  ;;  %v496_v58 = vld [vmem:[%s5313_s1 + $0x5f8] sm:$0xff]  ;;  %v493_v60 = vld [vmem:[%s5313_s1 + $0x5e0] sm:$0xff] }
 0x155   : > { %1566 = vmatprep.mubr.f32.mxu1 %v5858_v4  ;;  %v4467_v15 = vpack.c.bf16 %v398_v9, %v382_v23  ;;  %v495_v61 = vld [vmem:[%s5313_s1 + $0x5f0] sm:$0xff]  ;;  %v5965_v62 = vld [vmem:[%s5295_s8 + $0x40] sm:$0xff]  ;;  %v510_v14 = vld [vmem:[%s5313_s1 + $0x668] sm:$0xff] }
 0x156   : > { %4382 = vmatpush1.bf16.msra.mxu0 %v4381_v50  ;;  %v4529_v50 = vpack.c.bf16 %v367_v21, %v351_v3  ;;  %v526_v37 = vld [vmem:[%s5313_s1 + $0x6e8] sm:$0xff]  ;;  %v512_v3 = vld [vmem:[%s5313_s1 + $0x678] sm:$0xff]  ;;  %v509_v9 = vld [vmem:[%s5313_s1 + $0x660] sm:$0xff] }
 0x157   : > { %4446 = vmatpush1.bf16.msra.mxu1 %v4445_v12  ;;  %4384 = vmatprep.subr.bf16.mxu0 %v4383_v31  ;;  %v381_v12 = vld [vmem:[%s5313_s1 + $0x260] sm:$0xff]  ;;  %v528_v21 = vld [vmem:[%s5313_s1 + $0x6f8] sm:$0xff]  ;;  %v4483_v10 = vpack.c.bf16 %v526_v37, %v510_v14  ;;  %v511_v11 = vld [vmem:[%s5313_s1 + $0x670] sm:$0xff] }
 0x158   : > { %4448 = vmatprep.subr.bf16.mxu1 %v4447_v20  ;;  %v397_v31 = vld [vmem:[%s5313_s1 + $0x2e0] sm:$0xff]  ;;  %v5911_v20 = vld [vmem:[%s5295_s8 + $0x10] sm:$0xff]  ;;  %v560_v39 = vld [vmem:[%s5313_s1 + $0x7f8] sm:$0xff] }
 0x159   : > { %v4469_v24 = vpack.c.bf16 %v397_v31, %v381_v12  ;;  %v5983_v12 = vld [vmem:[%s5295_s8 + $0x50] sm:$0xff]  ;;  %v4547_v31 = vpack.c.bf16 %v528_v21, %v512_v3  ;;  %v576_v38 = vld [vmem:[%s5313_s1 + $0x878] sm:$0xff]  ;;  %v6037_v14 = vld [vmem:[%s5295_s8 + $0x80] sm:$0xff] }
 0x15a   : > { %4386 = vmatpush1.bf16.msra.mxu0 %v4385_v26  ;;  %v432_v26 = vld [vmem:[%s5313_s1 + $0x3f8] sm:$0xff]  ;;  %v591_v8 = vld [vmem:[%s5313_s1 + $0x8f0] sm:$0xff]  ;;  %v654_v3 = vld [vmem:[%s5313_s1 + $0xae8] sm:$0xff] }
 0x15b   : > { %4450 = vmatpush1.bf16.msra.mxu1 %v4449_v29  ;;  %4388 = vmatprep.subr.bf16.mxu0 %v4387_v47  ;;  %v5920_v29 = vld [vmem:[%s5295_s8 + $0x28] sm:$0xff]  ;;  %v4533_v47 = vpack.c.bf16 %v399_v19, %v383_v17  ;;  %v4535_v36 = vpack.c.bf16 %v432_v26, %v416_v25  ;;  %v541_v25 = vld [vmem:[%s5313_s1 + $0x760] sm:$0xff]  ;;  %v6019_v51 = vld [vmem:[%s5295_s8 + $0x70] sm:$0xff] }
 0x15c   : > { %4452 = vmatprep.subr.bf16.mxu1 %v4451_v33  ;;  %v415_v33 = vld [vmem:[%s5313_s1 + $0x370] sm:$0xff]  ;;  %v558_v17 = vld [vmem:[%s5313_s1 + $0x7e8] sm:$0xff]  ;;  %v557_v26 = vld [vmem:[%s5313_s1 + $0x7e0] sm:$0xff] }
 0x15d   : > { %v4537_v45 = vpack.c.bf16 %v431_v34, %v415_v33  ;;  %v574_v34 = vld [vmem:[%s5313_s1 + $0x868] sm:$0xff]  ;;  %v4489_v49 = vpack.c.bf16 %v557_v26, %v541_v25  ;;  %v672_v26 = vld [vmem:[%s5313_s1 + $0xb78] sm:$0xff] }
 0x15e   : > { %4390 = vmatpush1.bf16.msra.mxu0 %v4389_v40  ;;  %v4473_v40 = vpack.c.bf16 %v429_v30, %v413_v42  ;;  %v543_v42 = vld [vmem:[%s5313_s1 + $0x770] sm:$0xff] }
 0x15f   : > { %4454 = vmatpush1.bf16.msra.mxu1 %v4453_v41  ;;  %4392 = vmatprep.subr.bf16.mxu0 %v4391_v0  ;;  %v448_v41 = vld [vmem:[%s5313_s1 + $0x478] sm:$0xff]  ;;  %v559_v30 = vld [vmem:[%s5313_s1 + $0x7f0] sm:$0xff] }
 0x160   : > { %4456 = vmatprep.subr.bf16.mxu1 %v4455_v46  ;;  %v464_v0 = vld [vmem:[%s5313_s1 + $0x4f8] sm:$0xff]  ;;  %v461_v46 = vld [vmem:[%s5313_s1 + $0x4e0] sm:$0xff] }
 0x161   : > { %v4539_v53 = vpack.c.bf16 %v464_v0, %v448_v41  ;;  %v6010_v41 = vld [vmem:[%s5295_s8 + $0x78] sm:$0xff]  ;;  %v4553_v0 = vpack.c.bf16 %v559_v30, %v543_v42  ;;  %v6064_v42 = vld [vmem:[%s5295_s8 + $0xa8] sm:$0xff] }
 0x162   : > { %4394 = vmatpush1.bf16.msra.mxu0 %v4393_v63  ;;  %v478_v63 = vld [vmem:[%s5313_s1 + $0x568] sm:$0xff] }
 0x163   : > { %4458 = vmatpush1.bf16.msra.mxu1 %v4457_v18  ;;  %4460 = vmatprep.subr.bf16.mxu0 %v4459_v54  ;;  %v494_v18 = vld [vmem:[%s5313_s1 + $0x5e8] sm:$0xff]  ;;  %v4477_v54 = vpack.c.bf16 %v461_v46, %v445_v56  ;;  %v589_v56 = vld [vmem:[%s5313_s1 + $0x8e0] sm:$0xff] }
 0x164   : > { %4524 = vmatprep.subr.bf16.mxu1 %v4523_v16  ;;  %v5956_v16 = vld [vmem:[%s5295_s8 + $0x48] sm:$0xff]  ;;  %v4479_v27 = vpack.c.bf16 %v494_v18, %v478_v63 }
 0x165   : > { %1430 = vmatmul.mubr.f32.vlgmr.msra.gmra.mrb[48].mxu0 %v5893_v5  ;;  %v606_v63 = vld [vmem:[%s5313_s1 + $0x968] sm:$0xff] }
 0x166   : > { %1567 = vmatmul.mubr.f32.vlgmr.msra.gmra.mrb[48].mxu1 %v5893_v5  ;;  %4462 = vmatpush1.bf16.msra.mxu0 %v4461_v13  ;;  %v479_v13 = vld [vmem:[%s5313_s1 + $0x570] sm:$0xff]  ;;  %v622_v18 = vld [vmem:[%s5313_s1 + $0x9e8] sm:$0xff] }
 0x167   : > { %4526 = vmatpush1.bf16.msra.mxu1 %v4525_v1  ;;  %1435 = vmatprep.mubr.f32.mxu0 %v5902_v28  ;;  %v4543_v1 = vpack.c.bf16 %v496_v58, %v480_v57  ;;  %v4545_v23 = vpack.c.bf16 %v495_v61, %v479_v13  ;;  %v608_v57 = vld [vmem:[%s5313_s1 + $0x978] sm:$0xff]  ;;  %v4495_v13 = vpack.c.bf16 %v622_v18, %v606_v63  ;;  %v607_v61 = vld [vmem:[%s5313_s1 + $0x970] sm:$0xff] }
 0x168   : > { %1572 = vmatprep.mubr.f32.mxu1 %v5902_v28  ;;  %4464 = vmatprep.subr.bf16.mxu0 %v4463_v2  ;;  %v4481_v2 = vpack.c.bf16 %v493_v60, %v477_v6  ;;  %v624_v58 = vld [vmem:[%s5313_s1 + $0x9f8] sm:$0xff]  ;;  %v605_v60 = vld [vmem:[%s5313_s1 + $0x960] sm:$0xff] }
 0x169   : > { %1436 = vmatmul.mubr.f32.gmra.mrb[50].mxu0 %v5911_v20  ;;  %4528 = vmatprep.subr.bf16.mxu1 %v4527_v7  ;;  %v5974_v7 = vld [vmem:[%s5295_s8 + $0x58] sm:$0xff]  ;;  %v4559_v37 = vpack.c.bf16 %v624_v58, %v608_v57  ;;  %v717_v57 = vld [vmem:[%s5313_s1 + $0xce0] sm:$0xff]  ;;  %v703_v58 = vld [vmem:[%s5313_s1 + $0xc70] sm:$0xff] }
 0x16a   : > { %1573 = vmatmul.mubr.f32.gmra.mrb[50].mxu1 %v5911_v20  ;;  %4466 = vmatpush1.bf16.msra.mxu0 %v4465_v43  ;;  %v525_v43 = vld [vmem:[%s5313_s1 + $0x6e0] sm:$0xff] }
 0x16b   : > { %4530 = vmatpush1.bf16.msra.mxu1 %v4529_v50  ;;  %1441 = vmatprep.mubr.f32.mxu0 %v5920_v29  ;;  %v527_v50 = vld [vmem:[%s5313_s1 + $0x6f0] sm:$0xff]  ;;  %v4485_v19 = vpack.c.bf16 %v525_v43, %v509_v9  ;;  %v656_v9 = vld [vmem:[%s5313_s1 + $0xaf8] sm:$0xff] }
 0x16c   : > { %1578 = vmatprep.mubr.f32.mxu1 %v5920_v29  ;;  %4468 = vmatprep.subr.bf16.mxu0 %v4467_v15  ;;  %v542_v15 = vld [vmem:[%s5313_s1 + $0x768] sm:$0xff]  ;;  %v6046_v43 = vld [vmem:[%s5295_s8 + $0x98] sm:$0xff] }
 0x16d   : > { %1442 = vmatmul.mubr.f32.gmra.mrb[52].mxu0 %v5929_v55  ;;  %4532 = vmatprep.subr.bf16.mxu1 %v4531_v35  ;;  %v544_v35 = vld [vmem:[%s5313_s1 + $0x778] sm:$0xff] }
 0x16e   : > { %1579 = vmatmul.mubr.f32.gmra.mrb[52].mxu1 %v5929_v55  ;;  %4470 = vmatpush1.bf16.msra.mxu0 %v4469_v24  ;;  %v4549_v24 = vpack.c.bf16 %v527_v50, %v511_v11  ;;  %v4551_v33 = vpack.c.bf16 %v560_v39, %v544_v35  ;;  %v637_v11 = vld [vmem:[%s5313_s1 + $0xa60] sm:$0xff]  ;;  %v670_v39 = vld [vmem:[%s5313_s1 + $0xb68] sm:$0xff] }
 0x16f   : > { %4534 = vmatpush1.bf16.msra.mxu1 %v4533_v47  ;;  %1447 = vmatprep.mubr.f32.mxu0 %v5938_v44  ;;  %v4487_v47 = vpack.c.bf16 %v558_v17, %v542_v15  ;;  %v653_v50 = vld [vmem:[%s5313_s1 + $0xae0] sm:$0xff]  ;;  %v639_v15 = vld [vmem:[%s5313_s1 + $0xa70] sm:$0xff] }
 0x170   : > { %1584 = vmatprep.mubr.f32.mxu1 %v5938_v44  ;;  %4472 = vmatprep.subr.bf16.mxu0 %v4471_v32  ;;  %v6001_v32 = vld [vmem:[%s5295_s8 + $0x60] sm:$0xff]  ;;  %v655_v17 = vld [vmem:[%s5313_s1 + $0xaf0] sm:$0xff]  ;;  %v4501_v25 = vpack.c.bf16 %v653_v50, %v637_v11 }
 0x171   : > { %1448 = vmatmul.mubr.f32.gmra.mrb[54].mxu0 %v5947_v52  ;;  %4536 = vmatprep.subr.bf16.mxu1 %v4535_v36  ;;  %v590_v36 = vld [vmem:[%s5313_s1 + $0x8e8] sm:$0xff]  ;;  %v4565_v30 = vpack.c.bf16 %v655_v17, %v639_v15  ;;  %v751_v50 = vld [vmem:[%s5313_s1 + $0xdf0] sm:$0xff]  ;;  %v768_v17 = vld [vmem:[%s5313_s1 + $0xe78] sm:$0xff] }
 0x172   : > { %1585 = vmatmul.mubr.f32.gmra.mrb[54].mxu1 %v5947_v52  ;;  %4474 = vmatpush1.bf16.msra.mxu0 %v4473_v40  ;;  %v592_v40 = vld [vmem:[%s5313_s1 + $0x8f8] sm:$0xff]  ;;  %v4491_v46 = vpack.c.bf16 %v590_v36, %v574_v34  ;;  %v685_v34 = vld [vmem:[%s5313_s1 + $0xbe0] sm:$0xff]  ;;  %v671_v36 = vld [vmem:[%s5313_s1 + $0xb70] sm:$0xff] }
 0x173   : > { %4538 = vmatpush1.bf16.msra.mxu1 %v4537_v45  ;;  %1453 = vmatprep.mubr.f32.mxu0 %v5956_v16  ;;  %v573_v45 = vld [vmem:[%s5313_s1 + $0x860] sm:$0xff]  ;;  %v782_v15 = vld [vmem:[%s5313_s1 + $0xee8] sm:$0xff] }
 0x174   : > { %1590 = vmatprep.mubr.f32.mxu1 %v5956_v16  ;;  %4476 = vmatprep.subr.bf16.mxu0 %v4475_v48  ;;  %v575_v48 = vld [vmem:[%s5313_s1 + $0x870] sm:$0xff] }
 0x175   : > { %1454 = vmatmul.mubr.f32.gmra.mrb[56].mxu0 %v5965_v62  ;;  %4540 = vmatprep.subr.bf16.mxu1 %v4539_v53  ;;  %v4555_v53 = vpack.c.bf16 %v592_v40, %v576_v38  ;;  %v4557_v6 = vpack.c.bf16 %v591_v8, %v575_v48  ;;  %v687_v38 = vld [vmem:[%s5313_s1 + $0xbf0] sm:$0xff]  ;;  %v702_v40 = vld [vmem:[%s5313_s1 + $0xc68] sm:$0xff]  ;;  %v720_v48 = vld [vmem:[%s5313_s1 + $0xcf8] sm:$0xff] }
 0x176   : > { %1591 = vmatmul.mubr.f32.gmra.mrb[56].mxu1 %v5965_v62  ;;  %4478 = vmatpush1.bf16.msra.mxu0 %v4477_v54  ;;  %v4493_v54 = vpack.c.bf16 %v589_v56, %v573_v45  ;;  %v6075_v45 = vld [vmem:[%s5295_s8 + $0xa0] sm:$0xff]  ;;  %v4569_v63 = vpack.c.bf16 %v687_v38, %v671_v36  ;;  %v783_v36 = vld [vmem:[%s5313_s1 + $0xef0] sm:$0xff]  ;;  %v800_v38 = vld [vmem:[%s5313_s1 + $0xf78] sm:$0xff] }
 0x177   : > { %4542 = vmatpush1.bf16.msra.mxu1 %v4541_v59  ;;  %1459 = vmatprep.mubr.f32.mxu0 %v5974_v7  ;;  %v6028_v59 = vld [vmem:[%s5295_s8 + $0x88] sm:$0xff] }
 0x178   : > { %1596 = vmatprep.mubr.f32.mxu1 %v5974_v7  ;;  %4480 = vmatprep.subr.bf16.mxu0 %v4479_v27  ;;  %v621_v27 = vld [vmem:[%s5313_s1 + $0x9e0] sm:$0xff] }
 0x179   : > { %1460 = vmatmul.mubr.f32.gmra.mrb[58].mxu0 %v5983_v12  ;;  %4544 = vmatprep.subr.bf16.mxu1 %v4543_v1  ;;  %v623_v1 = vld [vmem:[%s5313_s1 + $0x9f0] sm:$0xff]  ;;  %v4497_v21 = vpack.c.bf16 %v621_v27, %v605_v60  ;;  %v734_v27 = vld [vmem:[%s5313_s1 + $0xd68] sm:$0xff] }
 0x17a   : > { %1597 = vmatmul.mubr.f32.gmra.mrb[58].mxu1 %v5983_v12  ;;  %4482 = vmatpush1.bf16.msra.mxu0 %v4481_v2  ;;  %v638_v2 = vld [vmem:[%s5313_s1 + $0xa68] sm:$0xff]  ;;  %v719_v60 = vld [vmem:[%s5313_s1 + $0xcf0] sm:$0xff] }
 0x17b   : > { %4546 = vmatpush1.bf16.msra.mxu1 %v4545_v23  ;;  %1465 = vmatprep.mubr.f32.mxu0 %v5992_v22  ;;  %v640_v23 = vld [vmem:[%s5313_s1 + $0xa78] sm:$0xff] }
 0x17c   : > { %1602 = vmatprep.mubr.f32.mxu1 %v5992_v22  ;;  %4484 = vmatprep.subr.bf16.mxu0 %v4483_v10  ;;  %v4561_v10 = vpack.c.bf16 %v623_v1, %v607_v61  ;;  %v4563_v35 = vpack.c.bf16 %v656_v9, %v640_v23  ;;  %v6093_v61 = vld [vmem:[%s5295_s8 + $0xb0] sm:$0xff]  ;;  %v736_v1 = vld [vmem:[%s5313_s1 + $0xd78] sm:$0xff]  ;;  %v733_v23 = vld [vmem:[%s5313_s1 + $0xd60] sm:$0xff] }
 0x17d   : > { %1466 = vmatmul.mubr.f32.gmra.mrb[60].mxu0 %v6001_v32  ;;  %4548 = vmatprep.subr.bf16.mxu1 %v4547_v31  ;;  %v4499_v31 = vpack.c.bf16 %v654_v3, %v638_v2  ;;  %v4573_v3 = vpack.c.bf16 %v719_v60, %v703_v58  ;;  %v749_v9 = vld [vmem:[%s5313_s1 + $0xde0] sm:$0xff]  ;;  %v815_v58 = vld [vmem:[%s5313_s1 + $0xff0] sm:$0xff] }
 0x17e   : > { %1603 = vmatmul.mubr.f32.gmra.mrb[60].mxu1 %v6001_v32  ;;  %4486 = vmatpush1.bf16.msra.mxu0 %v4485_v19  ;;  %v6055_v19 = vld [vmem:[%s5295_s8 + $0x90] sm:$0xff] }
 0x17f   : > { %4550 = vmatpush1.bf16.msra.mxu1 %v4549_v24  ;;  %1471 = vmatprep.mubr.f32.mxu0 %v6010_v41  ;;  %v686_v24 = vld [vmem:[%s5313_s1 + $0xbe8] sm:$0xff] }
 0x180   : > { %1608 = vmatprep.mubr.f32.mxu1 %v6010_v41  ;;  %4488 = vmatprep.subr.bf16.mxu0 %v4487_v47  ;;  %v688_v47 = vld [vmem:[%s5313_s1 + $0xbf8] sm:$0xff] }
 0x181   : > { %1472 = vmatmul.mubr.f32.gmra.mrb[62].mxu0 %v6019_v51  ;;  %4552 = vmatprep.subr.bf16.mxu1 %v4551_v33  ;;  %v669_v33 = vld [vmem:[%s5313_s1 + $0xb60] sm:$0xff]  ;;  %v4567_v56 = vpack.c.bf16 %v688_v47, %v672_v26 }
 0x182   : > { %1609 = vmatmul.mubr.f32.gmra.mrb[62].mxu1 %v6019_v51  ;;  %4490 = vmatpush1.bf16.msra.mxu0 %v4489_v49  ;;  %v4503_v49 = vpack.c.bf16 %v686_v24, %v670_v39  ;;  %v4505_v8 = vpack.c.bf16 %v685_v34, %v669_v33  ;;  %v4513_v39 = vpack.c.bf16 %v749_v9, %v733_v23  ;;  %v1913_v24 = vld [vmem:[%s237_s11] sm:$0xff] }
 0x183   : > { %4554 = vmatpush1.bf16.msra.mxu1 %v4553_v0  ;;  %1477 = vmatprep.mubr.f32.mxu0 %v6028_v59  ;;  %v718_v0 = vld [vmem:[%s5313_s1 + $0xce8] sm:$0xff]  ;;  %v765_v47 = vld [vmem:[%s5313_s1 + $0xe60] sm:$0xff]  ;;  %v767_v33 = vld [vmem:[%s5313_s1 + $0xe70] sm:$0xff] }
 0x184   : > { %1614 = vmatprep.mubr.f32.mxu1 %v6028_v59  ;;  %4492 = vmatprep.subr.bf16.mxu0 %v4491_v46  ;;  %v704_v46 = vld [vmem:[%s5313_s1 + $0xc78] sm:$0xff]  ;;  %v4507_v18 = vpack.c.bf16 %v718_v0, %v702_v40  ;;  %v1915_v0 = vadd.f32 1.0, %v1913_v24 }
 0x185   : > { %1478 = vmatmul.mubr.f32.gmra.mrb[64].mxu0 %v6037_v14  ;;  %4556 = vmatprep.subr.bf16.mxu1 %v4555_v53  ;;  %v6082_v53 = vld [vmem:[%s5295_s8 + $0xb8] sm:$0xff] }
 0x186   : > { %1615 = vmatmul.mubr.f32.gmra.mrb[64].mxu1 %v6037_v14  ;;  %4494 = vmatpush1.bf16.msra.mxu0 %v4493_v54  ;;  %v701_v54 = vld [vmem:[%s5313_s1 + $0xc60] sm:$0xff]  ;;  %v816_v40 = vld [vmem:[%s5313_s1 + $0xff8] sm:$0xff] }
 0x187   : > { %4558 = vmatpush1.bf16.msra.mxu1 %v4557_v6  ;;  %1483 = vmatprep.mubr.f32.mxu0 %v6046_v43  ;;  %v4571_v6 = vpack.c.bf16 %v720_v48, %v704_v46  ;;  %v4509_v2 = vpack.c.bf16 %v717_v57, %v701_v54  ;;  %v4581_v48 = vpack.c.bf16 %v783_v36, %v767_v33  ;;  %v799_v57 = vld [vmem:[%s5313_s1 + $0xf70] sm:$0xff] }
 0x188   : > { %1620 = vmatprep.mubr.f32.mxu1 %v6046_v43  ;;  %4496 = vmatprep.subr.bf16.mxu0 %v4495_v13  ;;  %v750_v13 = vld [vmem:[%s5313_s1 + $0xde8] sm:$0xff]  ;;  %v4583_v54 = vpack.c.bf16 %v816_v40, %v800_v38 }
 0x189   : > { %1484 = vmatmul.mubr.f32.gmra.mrb[66].mxu0 %v6055_v19  ;;  %4560 = vmatprep.subr.bf16.mxu1 %v4559_v37  ;;  %v752_v37 = vld [vmem:[%s5313_s1 + $0xdf8] sm:$0xff] }
 0x18a   : > { %1621 = vmatmul.mubr.f32.gmra.mrb[66].mxu1 %v6055_v19  ;;  %4498 = vmatpush1.bf16.msra.mxu0 %v4497_v21  ;;  %v4511_v21 = vpack.c.bf16 %v750_v13, %v734_v27  ;;  %v4575_v11 = vpack.c.bf16 %v752_v37, %v736_v1  ;;  %v4585_v13 = vpack.c.bf16 %v815_v58, %v799_v57 }
 0x18b   : > { %4562 = vmatpush1.bf16.msra.mxu1 %v4561_v10  ;;  %1489 = vmatprep.mubr.f32.mxu0 %v6064_v42  ;;  %v735_v10 = vld [vmem:[%s5313_s1 + $0xd70] sm:$0xff] }
 0x18c   : > { %1626 = vmatprep.mubr.f32.mxu1 %v6064_v42  ;;  %4500 = vmatprep.subr.bf16.mxu0 %v4499_v31  ;;  %v766_v31 = vld [vmem:[%s5313_s1 + $0xe68] sm:$0xff] }
 0x18d   : > { %1490 = vmatmul.mubr.f32.gmra.mrb[68].mxu0 %v6075_v45  ;;  %4564 = vmatprep.subr.bf16.mxu1 %v4563_v35  ;;  %v784_v35 = vld [vmem:[%s5313_s1 + $0xef8] sm:$0xff]  ;;  %v4515_v26 = vpack.c.bf16 %v782_v15, %v766_v31 }
 0x18e   : > { %1627 = vmatmul.mubr.f32.gmra.mrb[68].mxu1 %v6075_v45  ;;  %4502 = vmatpush1.bf16.msra.mxu0 %v4501_v25  ;;  %v4577_v25 = vpack.c.bf16 %v751_v50, %v735_v10  ;;  %v4579_v34 = vpack.c.bf16 %v784_v35, %v768_v17 }
 0x18f   : > { %4566 = vmatpush1.bf16.msra.mxu1 %v4565_v30  ;;  %1495 = vmatprep.mubr.f32.mxu0 %v6082_v53  ;;  %v781_v30 = vld [vmem:[%s5313_s1 + $0xee0] sm:$0xff] }
 0x190   : > { %1632 = vmatprep.mubr.f32.mxu1 %v6082_v53  ;;  %4504 = vmatprep.subr.bf16.mxu0 %v4503_v49  ;;  %v798_v49 = vld [vmem:[%s5313_s1 + $0xf68] sm:$0xff]  ;;  %v4517_v46 = vpack.c.bf16 %v781_v30, %v765_v47 }
 0x191   : > { %1496 = vmatmul.mubr.f32.gmra.mrb[70].mxu0 %v6093_v61  ;;  %4568 = vmatprep.subr.bf16.mxu1 %v4567_v56  ;;  %v1921_v56 = vlaneseq }
 0x192   : > { %1633 = vmatmul.mubr.f32.gmra.mrb[70].mxu1 %v6093_v61  ;;  %4506 = vmatpush1.bf16.msra.mxu0 %v4505_v8 }
 0x193   : > { %4570 = vmatpush1.bf16.msra.mxu1 %v4569_v63  ;;  %4508 = vmatprep.subr.bf16.mxu0 %v4507_v18  ;;  %v797_v63 = vld [vmem:[%s5313_s1 + $0xf60] sm:$0xff]  ;;  %v6123_v60 = vshrl.u32 %v1921_v56, 7 }
 0x194   : > { %4572 = vmatprep.subr.bf16.mxu1 %v4571_v6  ;;  %1703 = vmatprep.mubr.f32.mxu0 %v5858_v4  ;;  %v813_v18 = vld [vmem:[%s5313_s1 + $0xfe0] sm:$0xff]  ;;  %v1917_v6 = vmul.f32 4.0, %v1915_v0 }
 0x195   : > { %1840 = vmatprep.mubr.f32.mxu1 %v5858_v4  ;;  %v814_v4 = vld [vmem:[%s5313_s1 + $0xfe8] sm:$0xff]  ;;  %7414 = vst [vmem:[#allocation20_spill] sm:$0xff] %v6123_v60  ;;  %v4521_v27 = vpack.c.bf16 %v813_v18, %v797_v63  ;;  %v7374_v37 = vsub.s32 0, %v6123_v60  ;;  %v6131_v23 = vcvt.s32.f32 %v6123_v60  ;;  %v7370_v31 = vsub.s32 4, %v6123_v60 }
 0x196   : > { %4510 = vmatpush1.bf16.msra.mxu0 %v4509_v2  ;;  %v4519_v8 = vpack.c.bf16 %v814_v4, %v798_v49  ;;  %v4066_v1 = vadd.f32 -0.5, %v1917_v6  ;;  %v7373_v2 = vsub.s32 2, %v6123_v60  ;;  %v7369_v15 = vsub.s32 6, %v6123_v60 }
 0x197   : > { %4574 = vmatpush1.bf16.msra.mxu1 %v4573_v3  ;;  %4512 = vmatprep.subr.bf16.mxu0 %v4511_v21  ;;  %v7372_v3 = vsub.s32 1, %v6123_v60  ;;  %v7371_v21 = vsub.s32 3, %v6123_v60  ;;  %7415 = vst [vmem:[#allocation21_spill] sm:$0xff] %v6131_v23  ;;  %v7368_v17 = vsub.s32 5, %v6123_v60  ;;  %v7367_v35 = vsub.s32 7, %v6123_v60 }
 0x198   : > { %4576 = vmatprep.subr.bf16.mxu1 %v4575_v11  ;;  %v1929_v9 = vrot.slane %v4066_v1, %v7374_v37  ;;  %v1937_v10 = vrot.slane %v4066_v1, %v7373_v2 }
 0x199   : > { %v1933_v11 = vrot.slane %v4066_v1, %v7372_v3  ;;  %v1941_v50 = vrot.slane %v4066_v1, %v7371_v21  ;;  %v1949_v47 = vrot.slane %v4066_v1, %v7368_v17  ;;  %v1957_v30 = vrot.slane %v4066_v1, %v7367_v35 }
 0x19a   : > { %4514 = vmatpush1.bf16.msra.mxu0 %v4513_v39 }
 0x19b   : > { %4578 = vmatpush1.bf16.msra.mxu1 %v4577_v25  ;;  %4516 = vmatprep.subr.bf16.mxu0 %v4515_v26  ;;  %v2007_v39 = vsub.f32 %v1933_v11, %v6131_v23  ;;  %v2009_v24 = vsub.f32 %v1941_v50, %v6131_v23  ;;  %v1945_v25 = vrot.slane %v4066_v1, %v7370_v31 }
 0x19c   : > { %4580 = vmatprep.subr.bf16.mxu1 %v4579_v34  ;;  %v1953_v26 = vrot.slane %v4066_v1, %v7369_v15  ;;  %v2011_v4 = vsub.f32 %v1949_v47, %v6131_v23  ;;  %v2013_v40 = vsub.f32 %v1957_v30, %v6131_v23 }
 0x19d   : > { %v2023_v33 = vand.u32 2147483647, %v2007_v39  ;;  %v2025_v34 = vand.u32 2147483647, %v2009_v24  ;;  %v2010_v36 = vsub.f32 %v1945_v25, %v6131_v23 }
 0x19e   : > { %4518 = vmatpush1.bf16.msra.mxu0 %v4517_v46  ;;  %v2012_v49 = vsub.f32 %v1953_v26, %v6131_v23  ;;  %v2029_v63 = vand.u32 2147483647, %v2013_v40 }
 0x19f   : > { %4582 = vmatpush1.bf16.msra.mxu1 %v4581_v48  ;;  %4520 = vmatprep.subr.bf16.mxu0 %v4519_v8  ;;  %v2039_v0 = vsub.f32 1.0, %v2023_v33  ;;  %v2026_v56 = vand.u32 2147483647, %v2010_v36  ;;  %v2027_v48 = vand.u32 2147483647, %v2011_v4 }
 0x1a0   : > { %4584 = vmatprep.subr.bf16.mxu1 %v4583_v54  ;;  %v2028_v46 = vand.u32 2147483647, %v2012_v49 }
 0x1a1   : > { %v2042_v54 = vsub.f32 1.0, %v2026_v56  ;;  %v2043_v6 = vsub.f32 1.0, %v2027_v48 }
 0x1a2   : > { %4522 = vmatpush1.bf16.msra.mxu0 %v4521_v27  ;;  %v2044_v58 = vsub.f32 1.0, %v2028_v46 }
 0x1a3   : > { %4586 = vmatpush1.bf16.msra.mxu1 %v4585_v13  ;;  %v6200_v26 = vmax.f32 %v2043_v6, 0.0 }
 0x1a4   : > { %v6198_v25 = vmax.f32 %v2044_v58, 0.0 }
 0x1a5   : > { %1704 = vmatmul.mubr.f32.vlgmr.msra.gmra.mrb[72].mxu0 %v5893_v5 }
 0x1a6   : > { %1841 = vmatmul.mubr.f32.vlgmr.msra.gmra.mrb[72].mxu1 %v5893_v5  ;;  %1709 = vmatprep.mubr.f32.mxu0 %v5902_v28  ;;  %v2006_v5 = vsub.f32 %v1929_v9, %v6131_v23 }
 0x1a7   : > { %1846 = vmatprep.mubr.f32.mxu1 %v5902_v28  ;;  %v2008_v28 = vsub.f32 %v1937_v10, %v6131_v23 }
 0x1a9   : > { %1710 = vmatmul.mubr.f32.gmra.mrb[74].mxu0 %v5911_v20 }
 0x1aa   : > { %1847 = vmatmul.mubr.f32.gmra.mrb[74].mxu1 %v5911_v20  ;;  %1715 = vmatprep.mubr.f32.mxu0 %v5920_v29  ;;  %v2022_v20 = vand.u32 2147483647, %v2006_v5  ;;  %v6196_v5 = vmax.f32 %v2042_v54, 0.0 }
 0x1ab   : > { %1852 = vmatprep.mubr.f32.mxu1 %v5920_v29  ;;  %v2024_v29 = vand.u32 2147483647, %v2008_v28 }
 0x1ac   : > { %v2038_v38 = vsub.f32 1.0, %v2022_v20 }
 0x1ad   : > { %1716 = vmatmul.mubr.f32.gmra.mrb[76].mxu0 %v5929_v55 }
 0x1ae   : > { %1853 = vmatmul.mubr.f32.gmra.mrb[76].mxu1 %v5929_v55  ;;  %1721 = vmatprep.mubr.f32.mxu0 %v5938_v44  ;;  %v2040_v55 = vsub.f32 1.0, %v2024_v29  ;;  %v6177_v8 = vmax.f32 %v2038_v38, 0.0 }
 0x1af   : > { %1858 = vmatprep.mubr.f32.mxu1 %v5938_v44  ;;  %v2041_v44 = vsub.f32 1.0, %v2025_v34 }
 0x1b0   : > { %v6180_v18 = vmax.f32 %v2040_v55, 0.0 }
 0x1b1   : > { %1722 = vmatmul.mubr.f32.gmra.mrb[78].mxu0 %v5947_v52 }
 0x1b2   : > { %1859 = vmatmul.mubr.f32.gmra.mrb[78].mxu1 %v5947_v52  ;;  %1727 = vmatprep.mubr.f32.mxu0 %v5956_v16  ;;  %v6183_v52 = vmax.f32 %v2039_v0, 0.0 }
 0x1b3   : > { %1864 = vmatprep.mubr.f32.mxu1 %v5956_v16  ;;  %v6186_v16 = vmax.f32 %v2041_v44, 0.0 }
 0x1b5   : > { %1728 = vmatmul.mubr.f32.gmra.mrb[80].mxu0 %v5965_v62 }
 0x1b6   : > { %1865 = vmatmul.mubr.f32.gmra.mrb[80].mxu1 %v5965_v62  ;;  %1733 = vmatprep.mubr.f32.mxu0 %v5974_v7  ;;  %v2045_v62 = vsub.f32 1.0, %v2029_v63 }
 0x1b7   : > { %1870 = vmatprep.mubr.f32.mxu1 %v5974_v7 }
 0x1b8   : > { %v883_v57 = vpop.f32.mrb[0].mxu0  ;;  %v6204_v33 = vmax.f32 %v2045_v62, 0.0 }
 0x1b9   : > { %v2070_v27 = vmul.f32 %v6177_v8, %v883_v57  ;;  %v1020_v13 = vpop.f32.mrb[0].mxu1  ;;  %v885_v1 = vpop.f32.mrb[1].mxu0  ;;  %1734 = vmatmul.mubr.f32.gmra.mrb[82].mxu0 %v5983_v12 }
 0x1ba   : > { %v2072_v9 = vmul.f32 %v6180_v18, %v1020_v13  ;;  %v2071_v10 = vmul.f32 %v6183_v52, %v885_v1  ;;  %v1022_v11 = vpop.f32.mrb[1].mxu1  ;;  %1871 = vmatmul.mubr.f32.gmra.mrb[82].mxu1 %v5983_v12  ;;  %1739 = vmatprep.mubr.f32.mxu0 %v5992_v22 }
 0x1bb   : > { %v2262_v7 = vrot.slane %v2070_v27, 4  ;;  %v2073_v50 = vmul.f32 %v6186_v16, %v1022_v11  ;;  %1876 = vmatprep.mubr.f32.mxu1 %v5992_v22 }
 0x1bc   : > { %v2274_v28 = vrot.slane %v2072_v9, 4  ;;  %v2268_v39 = vrot.slane %v2071_v10, 4  ;;  %v889_v24 = vpop.f32.mrb[2].mxu0 }
 0x1bd   : > { %v2263_v47 = vadd.f32 %v2262_v7, %v2070_v27  ;;  %v2280_v20 = vrot.slane %v2073_v50, 4  ;;  %v2086_v12 = vmul.f32 %v6177_v8, %v889_v24  ;;  %v1026_v30 = vpop.f32.mrb[2].mxu1  ;;  %v891_v29 = vpop.f32.mrb[3].mxu0  ;;  %1740 = vmatmul.mubr.f32.gmra.mrb[84].mxu0 %v6001_v32 }
 0x1be   : > { %v2275_v22 = vadd.f32 %v2274_v28, %v2072_v9  ;;  %v2269_v34 = vadd.f32 %v2268_v39, %v2071_v10  ;;  %v2088_v36 = vmul.f32 %v6180_v18, %v1026_v30  ;;  %v2087_v49 = vmul.f32 %v6183_v52, %v891_v29  ;;  %v1028_v4 = vpop.f32.mrb[3].mxu1  ;;  %1877 = vmatmul.mubr.f32.gmra.mrb[84].mxu1 %v6001_v32 }
 0x1bf   : > { %v2264_v38 = vrot.slane %v2263_v47, 2  ;;  %v2281_v40 = vadd.f32 %v2280_v20, %v2073_v50  ;;  %v2358_v55 = vrot.slane %v2086_v12, 4  ;;  %v2089_v0 = vmul.f32 %v6186_v16, %v1028_v4  ;;  %1745 = vmatprep.mubr.f32.mxu0 %v6010_v41  ;;  %1882 = vmatprep.mubr.f32.mxu1 %v6010_v41 }
 0x1c0   : > { %v2276_v44 = vrot.slane %v2275_v22, 2  ;;  %v2270_v56 = vrot.slane %v2269_v34, 2  ;;  %v2370_v46 = vrot.slane %v2088_v36, 4  ;;  %v2364_v48 = vrot.slane %v2087_v49, 4  ;;  %v895_v63 = vpop.f32.mrb[4].mxu0 }
 0x1c1   : > { %v2265_v54 = vadd.f32 %v2264_v38, %v2263_v47  ;;  %v2282_v57 = vrot.slane %v2281_v40, 2  ;;  %v2359_v58 = vadd.f32 %v2358_v55, %v2086_v12  ;;  %v2376_v6 = vrot.slane %v2089_v0, 4  ;;  %v1032_v32 = vpop.f32.mrb[4].mxu1  ;;  %v897_v27 = vpop.f32.mrb[5].mxu0  ;;  %1746 = vmatmul.mubr.f32.gmra.mrb[86].mxu0 %v6019_v51 }
 0x1c2   : > { %v2277_v13 = vadd.f32 %v2276_v44, %v2275_v22  ;;  %v2271_v1 = vadd.f32 %v2270_v56, %v2269_v34  ;;  %v2371_v62 = vadd.f32 %v2370_v46, %v2088_v36  ;;  %v2365_v9 = vadd.f32 %v2364_v48, %v2087_v49  ;;  %v1034_v10 = vpop.f32.mrb[5].mxu1  ;;  %1883 = vmatmul.mubr.f32.gmra.mrb[86].mxu1 %v6019_v51 }
 0x1c3   : > { %v2266_v41 = vrot.slane %v2265_v54, 1  ;;  %v2283_v11 = vadd.f32 %v2282_v57, %v2281_v40  ;;  %v2360_v7 = vrot.slane %v2359_v58, 2  ;;  %v2377_v50 = vadd.f32 %v2376_v6, %v2089_v0  ;;  %1751 = vmatprep.mubr.f32.mxu0 %v6028_v59  ;;  %1888 = vmatprep.mubr.f32.mxu1 %v6028_v59 }
 0x1c4   : > { %v2278_v28 = vrot.slane %v2277_v13, 1  ;;  %v2272_v39 = vrot.slane %v2271_v1, 1  ;;  %v2372_v24 = vrot.slane %v2371_v62, 2  ;;  %v2366_v47 = vrot.slane %v2365_v9, 2  ;;  %v901_v20 = vpop.f32.mrb[6].mxu0 }
 0x1c5   : > { %v2267_v12 = vadd.f32 %v2266_v41, %v2265_v54  ;;  %v2284_v30 = vrot.slane %v2283_v11, 1  ;;  %v2361_v29 = vadd.f32 %v2360_v7, %v2359_v58  ;;  %v2378_v22 = vrot.slane %v2377_v50, 2  ;;  %v1038_v34 = vpop.f32.mrb[6].mxu1  ;;  %v903_v36 = vpop.f32.mrb[7].mxu0  ;;  %1752 = vmatmul.mubr.f32.gmra.mrb[88].mxu0 %v6037_v14 }
 0x1c6   : > { %v2279_v51 = vadd.f32 %v2278_v28, %v2277_v13  ;;  %v2273_v49 = vadd.f32 %v2272_v39, %v2271_v1  ;;  %v2373_v4 = vadd.f32 %v2372_v24, %v2371_v62  ;;  %v2367_v38 = vadd.f32 %v2366_v47, %v2365_v9  ;;  %v1040_v40 = vpop.f32.mrb[7].mxu1  ;;  %1889 = vmatmul.mubr.f32.gmra.mrb[88].mxu1 %v6037_v14 }
 0x1c7   : > { %v2285_v59 = vadd.f32 %v2284_v30, %v2283_v11  ;;  %v2362_v55 = vrot.slane %v2361_v29, 1  ;;  %v2379_v0 = vadd.f32 %v2378_v22, %v2377_v50  ;;  %v2102_v44 = vmul.f32 %v6177_v8, %v895_v63  ;;  %1757 = vmatprep.mubr.f32.mxu0 %v6046_v43  ;;  %1894 = vmatprep.mubr.f32.mxu1 %v6046_v43 }
 0x1c8   : > { %v2374_v56 = vrot.slane %v2373_v4, 1  ;;  %v2368_v46 = vrot.slane %v2367_v38, 1  ;;  %v2104_v48 = vmul.f32 %v6180_v18, %v1032_v32  ;;  %v2103_v54 = vmul.f32 %v6183_v52, %v897_v27  ;;  %v6223_v57 = vpop.f32.mrb[8].mxu0 }
 0x1c9   : > { %v2363_v58 = vadd.f32 %v2362_v55, %v2361_v29  ;;  %v2380_v6 = vrot.slane %v2379_v0, 1  ;;  %v2454_v14 = vrot.slane %v2102_v44, 4  ;;  %v2105_v13 = vmul.f32 %v6186_v16, %v1034_v10  ;;  %v6226_v1 = vpop.f32.mrb[8].mxu1  ;;  %v6228_v63 = vpop.f32.mrb[9].mxu0  ;;  %1758 = vmatmul.mubr.f32.gmra.mrb[90].mxu0 %v6055_v19 }
 0x1ca   : > { %v2375_v43 = vadd.f32 %v2374_v56, %v2373_v4  ;;  %v2369_v62 = vadd.f32 %v2368_v46, %v2367_v38  ;;  %v2466_v9 = vrot.slane %v2104_v48, 4  ;;  %v2460_v32 = vrot.slane %v2103_v54, 4  ;;  %v6231_v41 = vpop.f32.mrb[9].mxu1  ;;  %1895 = vmatmul.mubr.f32.gmra.mrb[90].mxu1 %v6055_v19  ;;  %1763 = vmatprep.mubr.f32.mxu0 %v6064_v42 }
 0x1cb   : > { %v3607_v27 = vsel %vm3606_vm0, %v2363_v58, %v2267_v12  ;;  %v2381_v10 = vadd.f32 %v2380_v6, %v2379_v0  ;;  %v2455_v11 = vadd.f32 %v2454_v14, %v2102_v44  ;;  %v2472_v7 = vrot.slane %v2105_v13, 4  ;;  %1900 = vmatprep.mubr.f32.mxu1 %v6064_v42 }
 0x1cc   : > { %v3627_v50 = vsel %vm3606_vm0, %v2375_v43, %v2279_v51  ;;  %v3620_v28 = vsel %vm3606_vm0, %v2369_v62, %v2273_v49  ;;  %v2467_v39 = vadd.f32 %v2466_v9, %v2104_v48  ;;  %v2461_v24 = vadd.f32 %v2460_v32, %v2103_v54  ;;  %v6239_v47 = vpop.f32.mrb[10].mxu0 }
 0x1cd   : > { %v3634_v30 = vsel %vm3606_vm0, %v2381_v10, %v2285_v59  ;;  %v2456_v19 = vrot.slane %v2455_v11, 2  ;;  %v2473_v29 = vadd.f32 %v2472_v7, %v2105_v13  ;;  %v2118_v22 = vmul.f32 %v6177_v8, %v901_v20  ;;  %v6243_v12 = vpop.f32.mrb[10].mxu1  ;;  %v6245_v4 = vpop.f32.mrb[11].mxu0  ;;  %1764 = vmatmul.mubr.f32.gmra.mrb[92].mxu0 %v6075_v45 }
 0x1ce   : > { %v2468_v42 = vrot.slane %v2467_v39, 2  ;;  %v2462_v51 = vrot.slane %v2461_v24, 2  ;;  %v2120_v49 = vmul.f32 %v6180_v18, %v1038_v34  ;;  %v2119_v38 = vmul.f32 %v6183_v52, %v903_v36  ;;  %v6250_v55 = vpop.f32.mrb[11].mxu1  ;;  %1901 = vmatmul.mubr.f32.gmra.mrb[92].mxu1 %v6075_v45  ;;  %1769 = vmatprep.mubr.f32.mxu0 %v6082_v53 }
 0x1cf   : > { %v2457_v59 = vadd.f32 %v2456_v19, %v2455_v11  ;;  %v2474_v20 = vrot.slane %v2473_v29, 2  ;;  %v2550_v0 = vrot.slane %v2118_v22, 4  ;;  %v2121_v44 = vmul.f32 %v6186_v16, %v1040_v40  ;;  %1906 = vmatprep.mubr.f32.mxu1 %v6082_v53 }
 0x1d0   : > { %v2469_v56 = vadd.f32 %v2468_v42, %v2467_v39  ;;  %v2463_v46 = vadd.f32 %v2462_v51, %v2461_v24  ;;  %v2562_v48 = vrot.slane %v2120_v49, 4  ;;  %v2556_v34 = vrot.slane %v2119_v38, 4  ;;  %v6256_v54 = vpop.f32.mrb[12].mxu0 }
 0x1d1   : > { %v2458_v36 = vrot.slane %v2457_v59, 1  ;;  %v2475_v58 = vadd.f32 %v2474_v20, %v2473_v29  ;;  %v2551_v6 = vadd.f32 %v2550_v0, %v2118_v22  ;;  %v2568_v45 = vrot.slane %v2121_v44, 4  ;;  %v6258_v14 = vpop.f32.mrb[12].mxu1  ;;  %v6260_v13 = vpop.f32.mrb[13].mxu0  ;;  %1770 = vmatmul.mubr.f32.gmra.mrb[94].mxu0 %v6093_v61 }
 0x1d2   : > { %v2470_v40 = vrot.slane %v2469_v56, 1  ;;  %v2464_v43 = vrot.slane %v2463_v46, 1  ;;  %v2563_v53 = vadd.f32 %v2562_v48, %v2120_v49  ;;  %v2557_v62 = vadd.f32 %v2556_v34, %v2119_v38  ;;  %v6263_v9 = vpop.f32.mrb[13].mxu1  ;;  %1907 = vmatmul.mubr.f32.gmra.mrb[94].mxu1 %v6093_v61 }
 0x1d3   : > { %v2459_v32 = vadd.f32 %v2458_v36, %v2457_v59  ;;  %v2476_v10 = vrot.slane %v2475_v58, 1  ;;  %v2552_v11 = vrot.slane %v2551_v6, 2  ;;  %v2569_v7 = vadd.f32 %v2568_v45, %v2121_v44 }
 0x1d4   : > { %v2471_v39 = vadd.f32 %v2470_v40, %v2469_v56  ;;  %v2465_v24 = vadd.f32 %v2464_v43, %v2463_v46  ;;  %v2564_v19 = vrot.slane %v2563_v53, 2  ;;  %v2558_v29 = vrot.slane %v2557_v62, 2  ;;  %v6266_v22 = vpop.f32.mrb[14].mxu0 }
 0x1d5   : > { %v3609_v42 = vsel %vm3608_vm1, %v2459_v32, %v3607_v27  ;;  %v2477_v51 = vadd.f32 %v2476_v10, %v2475_v58  ;;  %v2553_v20 = vadd.f32 %v2552_v11, %v2551_v6  ;;  %v2570_v49 = vrot.slane %v2569_v7, 2  ;;  %v6269_v38 = vpop.f32.mrb[14].mxu1  ;;  %v6271_v0 = vpop.f32.mrb[15].mxu0 }
 0x1d6   : > { %v3628_v61 = vsel %vm3608_vm1, %v2471_v39, %v3627_v50  ;;  %v3621_v59 = vsel %vm3608_vm1, %v2465_v24, %v3620_v28  ;;  %v2565_v44 = vadd.f32 %v2564_v19, %v2563_v53  ;;  %v2559_v56 = vadd.f32 %v2558_v29, %v2557_v62  ;;  %v6275_v46 = vpop.f32.mrb[15].mxu1 }
 0x1d7   : > { %v3635_v48 = vsel %vm3608_vm1, %v2477_v51, %v3634_v30  ;;  %v2554_v34 = vrot.slane %v2553_v20, 1  ;;  %v2571_v36 = vadd.f32 %v2570_v49, %v2569_v7  ;;  %v2134_v27 = vmul.f32 %v6177_v8, %v6223_v57 }
 0x1d8   : > { %v2566_v58 = vrot.slane %v2565_v44, 1  ;;  %v2560_v6 = vrot.slane %v2559_v56, 1  ;;  %v2136_v45 = vmul.f32 %v6180_v18, %v6226_v1  ;;  %v2135_v50 = vmul.f32 %v6183_v52, %v6228_v63  ;;  %v6284_v28 = vpop.f32.mrb[16].mxu0 }
 0x1d9   : > { %v2555_v40 = vadd.f32 %v2554_v34, %v2553_v20  ;;  %v2572_v43 = vrot.slane %v2571_v36, 1  ;;  %v2646_v53 = vrot.slane %v2134_v27, 4  ;;  %v2137_v30 = vmul.f32 %v6186_v16, %v6231_v41  ;;  %v6288_v62 = vpop.f32.mrb[16].mxu1  ;;  %v6290_v32 = vpop.f32.mrb[17].mxu0 }
 0x1da   : > { %v2567_v57 = vadd.f32 %v2566_v58, %v2565_v44  ;;  %v2561_v10 = vadd.f32 %v2560_v6, %v2559_v56  ;;  %v2658_v11 = vrot.slane %v2136_v45, 4  ;;  %v2652_v1 = vrot.slane %v2135_v50, 4  ;;  %v6292_v7 = vpop.f32.mrb[17].mxu1 }
 0x1db   : > { %v3611_v63 = vsel %vm3610_vm2, %v2555_v40, %v3609_v42  ;;  %v2573_v39 = vadd.f32 %v2572_v43, %v2571_v36  ;;  %v2647_v24 = vadd.f32 %v2646_v53, %v2134_v27  ;;  %v2664_v19 = vrot.slane %v2137_v30, 4 }
 0x1dc   : > { %v3629_v29 = vsel %vm3610_vm2, %v2567_v57, %v3628_v61  ;;  %v3622_v41 = vsel %vm3610_vm2, %v2561_v10, %v3621_v59  ;;  %v2659_v51 = vadd.f32 %v2658_v11, %v2136_v45  ;;  %v2653_v20 = vadd.f32 %v2652_v1, %v2135_v50  ;;  %v6297_v49 = vpop.f32.mrb[18].mxu0 }
 0x1dd   : > { %v3636_v44 = vsel %vm3610_vm2, %v2573_v39, %v3635_v48  ;;  %v2648_v56 = vrot.slane %v2647_v24, 2  ;;  %v2665_v34 = vadd.f32 %v2664_v19, %v2137_v30  ;;  %v2150_v58 = vmul.f32 %v6177_v8, %v6239_v47  ;;  %v6302_v6 = vpop.f32.mrb[18].mxu1  ;;  %v6304_v42 = vpop.f32.mrb[19].mxu0 }
 0x1de   : > { %v2660_v36 = vrot.slane %v2659_v51, 2  ;;  %v2654_v27 = vrot.slane %v2653_v20, 2  ;;  %v2152_v61 = vmul.f32 %v6180_v18, %v6243_v12  ;;  %v2151_v59 = vmul.f32 %v6183_v52, %v6245_v4  ;;  %v6310_v45 = vpop.f32.mrb[19].mxu1 }
 0x1df   : > { %v2649_v48 = vadd.f32 %v2648_v56, %v2647_v24  ;;  %v2666_v50 = vrot.slane %v2665_v34, 2  ;;  %v2742_v40 = vrot.slane %v2150_v58, 4  ;;  %v2153_v47 = vmul.f32 %v6186_v16, %v6250_v55 }
 0x1e0   : > { %v2661_v43 = vadd.f32 %v2660_v36, %v2659_v51  ;;  %v2655_v53 = vadd.f32 %v2654_v27, %v2653_v20  ;;  %v2754_v30 = vrot.slane %v2152_v61, 4  ;;  %v2748_v57 = vrot.slane %v2151_v59, 4  ;;  %v6314_v10 = vpop.f32.mrb[20].mxu0 }
 0x1e1   : > { %v2650_v11 = vrot.slane %v2649_v48, 1  ;;  %v2667_v12 = vadd.f32 %v2666_v50, %v2665_v34  ;;  %v2743_v1 = vadd.f32 %v2742_v40, %v2150_v58  ;;  %v2760_v39 = vrot.slane %v2153_v47, 4  ;;  %v6316_v4 = vpop.f32.mrb[20].mxu1  ;;  %v6318_v19 = vpop.f32.mrb[21].mxu0 }
 0x1e2   : > { %v2662_v24 = vrot.slane %v2661_v43, 1  ;;  %v2656_v56 = vrot.slane %v2655_v53, 1  ;;  %v2755_v35 = vadd.f32 %v2754_v30, %v2152_v61  ;;  %v2749_v17 = vadd.f32 %v2748_v57, %v2151_v59  ;;  %v6320_v55 = vpop.f32.mrb[21].mxu1 }
 0x1e3   : > { %v2651_v51 = vadd.f32 %v2650_v11, %v2649_v48  ;;  %v2668_v20 = vrot.slane %v2667_v12, 1  ;;  %v2744_v36 = vrot.slane %v2743_v1, 2  ;;  %v2761_v27 = vadd.f32 %v2760_v39, %v2153_v47 }
 0x1e4   : > { %v2663_v15 = vadd.f32 %v2662_v24, %v2661_v43  ;;  %v2657_v31 = vadd.f32 %v2656_v56, %v2655_v53  ;;  %v2756_v21 = vrot.slane %v2755_v35, 2  ;;  %v2750_v34 = vrot.slane %v2749_v17, 2  ;;  %v6322_v58 = vpop.f32.mrb[22].mxu0 }
 0x1e5   : > { %v3613_v50 = vsel %vm3612_vm3, %v2651_v51, %v3611_v63  ;;  %v2669_v40 = vadd.f32 %v2668_v20, %v2667_v12  ;;  %v2745_v3 = vadd.f32 %v2744_v36, %v2743_v1  ;;  %v2762_v2 = vrot.slane %v2761_v27, 2  ;;  %v6325_v37 = vpop.f32.mrb[22].mxu1  ;;  %v6327_v61 = vpop.f32.mrb[23].mxu0 }
 0x1e6   : > { %v3630_v59 = vsel %vm3612_vm3, %v2663_v15, %v3629_v29  ;;  %v3623_v48 = vsel %vm3612_vm3, %v2657_v31, %v3622_v41  ;;  %v2757_v47 = vadd.f32 %v2756_v21, %v2755_v35  ;;  %v2751_v43 = vadd.f32 %v2750_v34, %v2749_v17  ;;  %v6331_v53 = vpop.f32.mrb[23].mxu1 }
 0x1e7   : > { %v3637_v30 = vsel %vm3612_vm3, %v2669_v40, %v3636_v44  ;;  %v2746_v57 = vrot.slane %v2745_v3, 1  ;;  %v2763_v11 = vadd.f32 %v2762_v2, %v2761_v27  ;;  %v2166_v63 = vmul.f32 %v6177_v8, %v6256_v54 }
 0x1e8   : > { %v2758_v12 = vrot.slane %v2757_v47, 1  ;;  %v2752_v1 = vrot.slane %v2751_v43, 1  ;;  %v2168_v39 = vmul.f32 %v6180_v18, %v6258_v14  ;;  %v2167_v15 = vmul.f32 %v6183_v52, %v6260_v13 }
 0x1e9   : > { %v2747_v31 = vadd.f32 %v2746_v57, %v2745_v3  ;;  %v2764_v21 = vrot.slane %v2763_v11, 1  ;;  %v2838_v17 = vrot.slane %v2166_v63, 4  ;;  %v2169_v35 = vmul.f32 %v6186_v16, %v6263_v9 }
 0x1ea   : > { %v2759_v29 = vadd.f32 %v2758_v12, %v2757_v47  ;;  %v2753_v41 = vadd.f32 %v2752_v1, %v2751_v43  ;;  %v2850_v2 = vrot.slane %v2168_v39, 4  ;;  %v2844_v44 = vrot.slane %v2167_v15, 4 }
 0x1eb   : > { %v3615_v54 = vsel %vm3614_vm4, %v2747_v31, %v3613_v50  ;;  %v2765_v24 = vadd.f32 %v2764_v21, %v2763_v11  ;;  %v2839_v56 = vadd.f32 %v2838_v17, %v2166_v63  ;;  %v2856_v51 = vrot.slane %v2169_v35, 4 }
 0x1ec   : > { %v3631_v14 = vsel %vm3614_vm4, %v2759_v29, %v3630_v59  ;;  %v3624_v13 = vsel %vm3614_vm4, %v2753_v41, %v3623_v48  ;;  %v2851_v3 = vadd.f32 %v2850_v2, %v2168_v39  ;;  %v2845_v20 = vadd.f32 %v2844_v44, %v2167_v15 }
 0x1ed   : > { %v3638_v36 = vsel %vm3614_vm4, %v2765_v24, %v3637_v30  ;;  %v2840_v27 = vrot.slane %v2839_v56, 2  ;;  %v2857_v9 = vadd.f32 %v2856_v51, %v2169_v35  ;;  %v2182_v34 = vmul.f32 %v6177_v8, %v6266_v22 }
 0x1ee   : > { %v2852_v40 = vrot.slane %v2851_v3, 2  ;;  %v2846_v47 = vrot.slane %v2845_v20, 2  ;;  %v2184_v50 = vmul.f32 %v6180_v18, %v6269_v38  ;;  %v2183_v43 = vmul.f32 %v6183_v52, %v6271_v0 }
 0x1ef   : > { %v2841_v59 = vadd.f32 %v2840_v27, %v2839_v56  ;;  %v2858_v57 = vrot.slane %v2857_v9, 2  ;;  %v2934_v48 = vrot.slane %v2182_v34, 4  ;;  %v2185_v11 = vmul.f32 %v6186_v16, %v6275_v46 }
 0x1f0   : > { %v2853_v30 = vadd.f32 %v2852_v40, %v2851_v3  ;;  %v2847_v63 = vadd.f32 %v2846_v47, %v2845_v20  ;;  %v2946_v12 = vrot.slane %v2184_v50, 4  ;;  %v2940_v1 = vrot.slane %v2183_v43, 4 }
 0x1f1   : > { %v2842_v22 = vrot.slane %v2841_v59, 1  ;;  %v2859_v39 = vadd.f32 %v2858_v57, %v2857_v9  ;;  %v2935_v15 = vadd.f32 %v2934_v48, %v2182_v34  ;;  %v2952_v31 = vrot.slane %v2185_v11, 4 }
 0x1f2   : > { %v2854_v21 = vrot.slane %v2853_v30, 1  ;;  %v2848_v38 = vrot.slane %v2847_v63, 1  ;;  %v2947_v17 = vadd.f32 %v2946_v12, %v2184_v50  ;;  %v2941_v0 = vadd.f32 %v2940_v1, %v2183_v43 }
 0x1f3   : > { %v2843_v35 = vadd.f32 %v2842_v22, %v2841_v59  ;;  %v2860_v29 = vrot.slane %v2859_v39, 1  ;;  %v2936_v41 = vrot.slane %v2935_v15, 2  ;;  %v2953_v2 = vadd.f32 %v2952_v31, %v2185_v11 }
 0x1f4   : > { %v2855_v44 = vadd.f32 %v2854_v21, %v2853_v30  ;;  %v2849_v46 = vadd.f32 %v2848_v38, %v2847_v63  ;;  %v2948_v24 = vrot.slane %v2947_v17, 2  ;;  %v2942_v56 = vrot.slane %v2941_v0, 2 }
 0x1f5   : > { %v3617_v51 = vsel %vm3616_vm5, %v2843_v35, %v3615_v54  ;;  %v2861_v3 = vadd.f32 %v2860_v29, %v2859_v39  ;;  %v2937_v20 = vadd.f32 %v2936_v41, %v2935_v15  ;;  %v2954_v27 = vrot.slane %v2953_v2, 2 }
 0x1f6   : > { %v3632_v9 = vsel %vm3616_vm5, %v2855_v44, %v3631_v14  ;;  %v3625_v34 = vsel %vm3616_vm5, %v2849_v46, %v3624_v13  ;;  %v2949_v40 = vadd.f32 %v2948_v24, %v2947_v17  ;;  %v2943_v47 = vadd.f32 %v2942_v56, %v2941_v0 }
 0x1f7   : > { %v3639_v50 = vsel %vm3616_vm5, %v2861_v3, %v3638_v36  ;;  %v2938_v43 = vrot.slane %v2937_v20, 1  ;;  %v2955_v59 = vadd.f32 %v2954_v27, %v2953_v2  ;;  %v2198_v57 = vmul.f32 %v6177_v8, %v6284_v28 }
 0x1f8   : > { %v2950_v48 = vrot.slane %v2949_v40, 1  ;;  %v2944_v54 = vrot.slane %v2943_v47, 1  ;;  %v2200_v11 = vmul.f32 %v6180_v18, %v6288_v62  ;;  %v2199_v14 = vmul.f32 %v6183_v52, %v6290_v32  ;;  %v6366_v13 = vpop.f32.mrb[24].mxu0 }
 0x1f9   : > { %v2939_v30 = vadd.f32 %v2938_v43, %v2937_v20  ;;  %v2956_v63 = vrot.slane %v2955_v59, 1  ;;  %v3030_v12 = vrot.slane %v2198_v57, 4  ;;  %v2201_v36 = vmul.f32 %v6186_v16, %v6292_v7  ;;  %v6370_v1 = vpop.f32.mrb[24].mxu1  ;;  %v6372_v22 = vpop.f32.mrb[25].mxu0 }
 0x1fa   : > { %v2951_v28 = vadd.f32 %v2950_v48, %v2949_v40  ;;  %v2945_v39 = vadd.f32 %v2944_v54, %v2943_v47  ;;  %v3042_v15 = vrot.slane %v2200_v11, 4  ;;  %v3036_v31 = vrot.slane %v2199_v14, 4  ;;  %v6374_v62 = vpop.f32.mrb[25].mxu1 }
 0x1fb   : > { %v3619_v32 = vsel %vm3618_vm6, %v2939_v30, %v3617_v51  ;;  %v2957_v21 = vadd.f32 %v2956_v63, %v2955_v59  ;;  %v3031_v38 = vadd.f32 %v3030_v12, %v2198_v57  ;;  %v3048_v17 = vrot.slane %v2201_v36, 4 }
 0x1fc   : > { %3805 = vst [vmem:[%s6377_s5] sm:$0xff] %v3619_v32  ;;  %v3633_v7 = vsel %vm3618_vm6, %v2951_v28, %v3632_v9  ;;  %v3626_v0 = vsel %vm3618_vm6, %v2945_v39, %v3625_v34  ;;  %v3043_v35 = vadd.f32 %v3042_v15, %v2200_v11  ;;  %v3037_v29 = vadd.f32 %v3036_v31, %v2199_v14  ;;  %v6382_v41 = vpop.f32.mrb[26].mxu0 }
 0x1fd   : > { %3807 = vst [vmem:[%s6377_s5 + $0x10] sm:$0xff] %v3633_v7  ;;  %3806 = vst [vmem:[%s6377_s5 + $0x8] sm:$0xff] %v3626_v0  ;;  %v3640_v2 = vsel %vm3618_vm6, %v2957_v21, %v3639_v50  ;;  %v3032_v44 = vrot.slane %v3031_v38, 2  ;;  %v3049_v46 = vadd.f32 %v3048_v17, %v2201_v36  ;;  %v2214_v24 = vmul.f32 %v6177_v8, %v6297_v49  ;;  %v6389_v56 = vpop.f32.mrb[26].mxu1  ;;  %v6391_v51 = vpop.f32.mrb[27].mxu0 }
 0x1fe   : > { %3808 = vst [vmem:[%s6377_s5 + $0x18] sm:$0xff] %v3640_v2  ;;  %v3044_v3 = vrot.slane %v3043_v35, 2  ;;  %v3038_v20 = vrot.slane %v3037_v29, 2  ;;  %v2216_v27 = vmul.f32 %v6180_v18, %v6302_v6  ;;  %v2215_v9 = vmul.f32 %v6183_v52, %v6304_v42  ;;  %v6398_v34 = vpop.f32.mrb[27].mxu1 }
 0x1ff   : > { %v3033_v40 = vadd.f32 %v3032_v44, %v3031_v38  ;;  %v3050_v47 = vrot.slane %v3049_v46, 2  ;;  %v3126_v50 = vrot.slane %v2214_v24, 4  ;;  %v2217_v49 = vmul.f32 %v6186_v16, %v6310_v45 }
 0x200   : > { %v3045_v43 = vadd.f32 %v3044_v3, %v3043_v35  ;;  %v3039_v59 = vadd.f32 %v3038_v20, %v3037_v29  ;;  %v3138_v57 = vrot.slane %v2216_v27, 4  ;;  %v3132_v48 = vrot.slane %v2215_v9, 4  ;;  %v6402_v54 = vpop.f32.mrb[28].mxu0 }
 0x201   : > { %v3034_v11 = vrot.slane %v3033_v40, 1  ;;  %v3051_v14 = vadd.f32 %v3050_v47, %v3049_v46  ;;  %v3127_v6 = vadd.f32 %v3126_v50, %v2214_v24  ;;  %v3144_v30 = vrot.slane %v2217_v49, 4  ;;  %v6404_v63 = vpop.f32.mrb[28].mxu1  ;;  %v6406_v42 = vpop.f32.mrb[29].mxu0 }
 0x202   : > { %v3046_v12 = vrot.slane %v3045_v43, 1  ;;  %v3040_v36 = vrot.slane %v3039_v59, 1  ;;  %v3139_v28 = vadd.f32 %v3138_v57, %v2216_v27  ;;  %v3133_v39 = vadd.f32 %v3132_v48, %v2215_v9  ;;  %v6408_v15 = vpop.f32.mrb[29].mxu1 }
 0x203   : > { %v3035_v45 = vadd.f32 %v3034_v11, %v3033_v40  ;;  %v3052_v31 = vrot.slane %v3051_v14, 1  ;;  %v3128_v32 = vrot.slane %v3127_v6, 2  ;;  %v3145_v21 = vadd.f32 %v3144_v30, %v2217_v49 }
 0x204   : > { %v3047_v38 = vadd.f32 %v3046_v12, %v3045_v43  ;;  %v3041_v17 = vadd.f32 %v3040_v36, %v3039_v59  ;;  %v3140_v7 = vrot.slane %v3139_v28, 2  ;;  %v3134_v0 = vrot.slane %v3133_v39, 2  ;;  %v6410_v35 = vpop.f32.mrb[30].mxu0 }
 0x205   : > { %v3053_v29 = vadd.f32 %v3052_v31, %v3051_v14  ;;  %v3129_v2 = vadd.f32 %v3128_v32, %v3127_v6  ;;  %v3146_v44 = vrot.slane %v3145_v21, 2  ;;  %v2230_v46 = vmul.f32 %v6177_v8, %v6314_v10  ;;  %v6414_v24 = vpop.f32.mrb[30].mxu1  ;;  %v6416_v3 = vpop.f32.mrb[31].mxu0 }
 0x206   : > { %v3141_v20 = vadd.f32 %v3140_v7, %v3139_v28  ;;  %v3135_v27 = vadd.f32 %v3134_v0, %v3133_v39  ;;  %v2232_v9 = vmul.f32 %v6180_v18, %v6316_v4  ;;  %v2231_v40 = vmul.f32 %v6183_v52, %v6318_v19  ;;  %v6422_v47 = vpop.f32.mrb[31].mxu1 }
 0x207   : > { %v3130_v50 = vrot.slane %v3129_v2, 1  ;;  %v3147_v49 = vadd.f32 %v3146_v44, %v3145_v21  ;;  %v3222_v43 = vrot.slane %v2230_v46, 4  ;;  %v2233_v10 = vmul.f32 %v6186_v16, %v6320_v55 }
 0x208   : > { %v3142_v59 = vrot.slane %v3141_v20, 1  ;;  %v3136_v57 = vrot.slane %v3135_v27, 1  ;;  %v3234_v48 = vrot.slane %v2232_v9, 4  ;;  %v3228_v11 = vrot.slane %v2231_v40, 4  ;;  %v6426_v14 = vpop.f32.mrb[32].mxu0 }
 0x209   : > { %v3131_v6 = vadd.f32 %v3130_v50, %v3129_v2  ;;  %v3148_v30 = vrot.slane %v3147_v49, 1  ;;  %v3223_v4 = vadd.f32 %v3222_v43, %v2230_v46  ;;  %v3240_v12 = vrot.slane %v2233_v10, 4  ;;  %v6428_v36 = vpop.f32.mrb[32].mxu1  ;;  %v6430_v19 = vpop.f32.mrb[33].mxu0 }
 0x20a   : > { %v3143_v28 = vadd.f32 %v3142_v59, %v3141_v20  ;;  %v3137_v39 = vadd.f32 %v3136_v57, %v3135_v27  ;;  %v3235_v31 = vadd.f32 %v3234_v48, %v2232_v9  ;;  %v3229_v32 = vadd.f32 %v3228_v11, %v2231_v40  ;;  %v6432_v21 = vpop.f32.mrb[33].mxu1 }
 0x20b   : > { %v3725_v55 = vsel %vm3606_vm0, %v3131_v6, %v3035_v45  ;;  %v3149_v7 = vadd.f32 %v3148_v30, %v3147_v49  ;;  %v3224_v0 = vrot.slane %v3223_v4, 2  ;;  %v3241_v44 = vadd.f32 %v3240_v12, %v2233_v10 }
 0x20c   : > { %v3731_v2 = vsel %vm3606_vm0, %v3143_v28, %v3047_v38  ;;  %v3728_v46 = vsel %vm3606_vm0, %v3137_v39, %v3041_v17  ;;  %v3236_v50 = vrot.slane %v3235_v31, 2  ;;  %v3230_v43 = vrot.slane %v3229_v32, 2  ;;  %v6437_v23 = vpop.f32.mrb[34].mxu0 }
 0x20d   : > { %v3734_v20 = vsel %vm3606_vm0, %v3149_v7, %v3053_v29  ;;  %v3225_v27 = vadd.f32 %v3224_v0, %v3223_v4  ;;  %v3242_v9 = vrot.slane %v3241_v44, 2  ;;  %v2246_v40 = vmul.f32 %v6177_v8, %v6322_v58  ;;  %v6442_v59 = vpop.f32.mrb[34].mxu1  ;;  %v6444_v45 = vpop.f32.mrb[35].mxu0 }
 0x20e   : > { %v3237_v49 = vadd.f32 %v3236_v50, %v3235_v31  ;;  %v3231_v10 = vadd.f32 %v3230_v43, %v3229_v32  ;;  %v2248_v38 = vmul.f32 %v6180_v18, %v6325_v37  ;;  %v2247_v17 = vmul.f32 %v6183_v52, %v6327_v61  ;;  %v6450_v57 = vpop.f32.mrb[35].mxu1 }
 0x20f   : > { %v3226_v29 = vrot.slane %v3225_v27, 1  ;;  %v3243_v48 = vadd.f32 %v3242_v9, %v3241_v44  ;;  %v3318_v11 = vrot.slane %v2246_v40, 4  ;;  %v2249_v8 = vmul.f32 %v6186_v16, %v6331_v53 }
 0x210   : > { %v3238_v58 = vrot.slane %v3237_v49, 1  ;;  %v3232_v6 = vrot.slane %v3231_v10, 1  ;;  %v3330_v30 = vrot.slane %v2248_v38, 4  ;;  %v3324_v4 = vrot.slane %v2247_v17, 4  ;;  %v6454_v12 = vpop.f32.mrb[36].mxu0 }
 0x211   : > { %v3227_v28 = vadd.f32 %v3226_v29, %v3225_v27  ;;  %v3244_v39 = vrot.slane %v3243_v48, 1  ;;  %v3319_v37 = vadd.f32 %v3318_v11, %v2246_v40  ;;  %v3336_v18 = vrot.slane %v2249_v8, 4  ;;  %v6456_v31 = vpop.f32.mrb[36].mxu1  ;;  %v6458_v52 = vpop.f32.mrb[37].mxu0 }
 0x212   : > { %v3239_v61 = vadd.f32 %v3238_v58, %v3237_v49  ;;  %v3233_v32 = vadd.f32 %v3232_v6, %v3231_v10  ;;  %v3331_v7 = vadd.f32 %v3330_v30, %v2248_v38  ;;  %v3325_v0 = vadd.f32 %v3324_v4, %v2247_v17  ;;  %v6460_v44 = vpop.f32.mrb[37].mxu1 }
 0x213   : > { %v3726_v16 = vsel %vm3608_vm1, %v3227_v28, %v3725_v55  ;;  %v3245_v53 = vadd.f32 %v3244_v39, %v3243_v48  ;;  %v3320_v50 = vrot.slane %v3319_v37, 2  ;;  %v3337_v43 = vadd.f32 %v3336_v18, %v2249_v8 }
 0x214   : > { %v3732_v27 = vsel %vm3608_vm1, %v3239_v61, %v3731_v2  ;;  %v3729_v9 = vsel %vm3608_vm1, %v3233_v32, %v3728_v46  ;;  %v3332_v40 = vrot.slane %v3331_v7, 2  ;;  %v3326_v29 = vrot.slane %v3325_v0, 2  ;;  %v6465_v11 = vpop.f32.mrb[38].mxu0 }
 0x215   : > { %v3735_v49 = vsel %vm3608_vm1, %v3245_v53, %v3734_v20  ;;  %v3321_v10 = vadd.f32 %v3320_v50, %v3319_v37  ;;  %v3338_v38 = vrot.slane %v3337_v43, 2  ;;  %v2074_v17 = vmul.f32 %v6196_v5, %v6366_v13  ;;  %v6470_v58 = vpop.f32.mrb[38].mxu1  ;;  %v6472_v55 = vpop.f32.mrb[39].mxu0 }
 0x216   : > { %v3333_v48 = vadd.f32 %v3332_v40, %v3331_v7  ;;  %v3327_v8 = vadd.f32 %v3326_v29, %v3325_v0  ;;  %v2076_v2 = vmul.f32 %v6198_v25, %v6370_v1  ;;  %v2075_v46 = vmul.f32 %v6200_v26, %v6372_v22  ;;  %v6478_v6 = vpop.f32.mrb[39].mxu1 }
 0x217   : > { %v3322_v20 = vrot.slane %v3321_v10, 1  ;;  %v3339_v30 = vadd.f32 %v3338_v38, %v3337_v43  ;;  %v2286_v4 = vrot.slane %v2074_v17, 4  ;;  %v2077_v13 = vmul.f32 %v6204_v33, %v6374_v62 }
 0x218   : > { %v3334_v28 = vrot.slane %v3333_v48, 1  ;;  %v3328_v39 = vrot.slane %v3327_v8, 1  ;;  %v2298_v37 = vrot.slane %v2076_v2, 4  ;;  %v2292_v18 = vrot.slane %v2075_v46, 4  ;;  %v6482_v61 = vpop.f32.mrb[40].mxu0 }
 0x219   : > { %7416 = vst [vmem:[#allocation22_spill] sm:$0xff] %v6482_v61  ;;  %v3323_v32 = vadd.f32 %v3322_v20, %v3321_v10  ;;  %v3340_v1 = vrot.slane %v3339_v30, 1  ;;  %v2287_v7 = vadd.f32 %v2286_v4, %v2074_v17  ;;  %v2304_v0 = vrot.slane %v2077_v13, 4  ;;  %v6484_v22 = vpop.f32.mrb[40].mxu1  ;;  %v6486_v53 = vpop.f32.mrb[41].mxu0 }
 0x21a   : > { %7417 = vst [vmem:[#allocation23_spill] sm:$0xff] %v6486_v53  ;;  %v3335_v50 = vadd.f32 %v3334_v28, %v3333_v48  ;;  %v3329_v43 = vadd.f32 %v3328_v39, %v3327_v8  ;;  %v2299_v62 = vadd.f32 %v2298_v37, %v2076_v2  ;;  %v2293_v40 = vadd.f32 %v2292_v18, %v2075_v46  ;;  %v6488_v29 = vpop.f32.mrb[41].mxu1 }
 0x21b   : > { %v3727_v38 = vsel %vm3610_vm2, %v3323_v32, %v3726_v16  ;;  %v3341_v60 = vadd.f32 %v3340_v1, %v3339_v30  ;;  %v2288_v61 = vrot.slane %v2287_v7, 2  ;;  %v2305_v10 = vadd.f32 %v2304_v0, %v2077_v13 }
 0x21c   : > { %3821 = vst [vmem:[%s6377_s5 + $0x80] sm:$0xf] %v3727_v38  ;;  %v3733_v17 = vsel %vm3610_vm2, %v3335_v50, %v3732_v27  ;;  %v3730_v20 = vsel %vm3610_vm2, %v3329_v43, %v3729_v9  ;;  %v2300_v4 = vrot.slane %v2299_v62, 2  ;;  %v2294_v53 = vrot.slane %v2293_v40, 2  ;;  %v6494_v48 = vpop.f32.mrb[42].mxu0 }
 0x21d   : > { %3823 = vst [vmem:[%s6377_s5 + $0x90] sm:$0xf] %v3733_v17  ;;  %3822 = vst [vmem:[%s6377_s5 + $0x88] sm:$0xf] %v3730_v20  ;;  %v3736_v8 = vsel %vm3610_vm2, %v3341_v60, %v3735_v49  ;;  %v2289_v2 = vadd.f32 %v2288_v61, %v2287_v7  ;;  %v2306_v46 = vrot.slane %v2305_v10, 2  ;;  %v2090_v16 = vmul.f32 %v6196_v5, %v6382_v41  ;;  %v6501_v30 = vpop.f32.mrb[42].mxu1 }
 0x21e   : > { %v6503_v13 = vpop.f32.mrb[43].mxu0  ;;  %3824 = vst [vmem:[%s6377_s5 + $0x98] sm:$0xf] %v3736_v8  ;;  %v2301_v27 = vadd.f32 %v2300_v4, %v2299_v62  ;;  %v2295_v9 = vadd.f32 %v2294_v53, %v2293_v40  ;;  %v2092_v28 = vmul.f32 %v6198_v25, %v6389_v56  ;;  %v2091_v39 = vmul.f32 %v6200_v26, %v6391_v51  ;;  %v6510_v37 = vpop.f32.mrb[43].mxu1 }
 0x21f   : > { %7418 = vst [vmem:[#allocation24_spill] sm:$0xff] %v6503_v13  ;;  %7419 = vst [vmem:[#allocation25_spill] sm:$0xff] %v6510_v37  ;;  %v2290_v60 = vrot.slane %v2289_v2, 1  ;;  %v2307_v49 = vadd.f32 %v2306_v46, %v2305_v10  ;;  %v2382_v18 = vrot.slane %v2090_v16, 4  ;;  %v2093_v41 = vmul.f32 %v6204_v33, %v6398_v34 }
 0x220   : > { %v2302_v61 = vrot.slane %v2301_v27, 1  ;;  %v2296_v32 = vrot.slane %v2295_v9, 1  ;;  %v2394_v1 = vrot.slane %v2092_v28, 4  ;;  %v2388_v7 = vrot.slane %v2091_v39, 4  ;;  %v6514_v0 = vpop.f32.mrb[44].mxu0 }
 0x221   : > { %7420 = vst [vmem:[#allocation26_spill] sm:$0xff] %v6514_v0  ;;  %v2291_v53 = vadd.f32 %v2290_v60, %v2289_v2  ;;  %v2308_v50 = vrot.slane %v2307_v49, 1  ;;  %v2383_v56 = vadd.f32 %v2382_v18, %v2090_v16  ;;  %v2400_v43 = vrot.slane %v2093_v41, 4  ;;  %v6516_v62 = vpop.f32.mrb[44].mxu1  ;;  %v6518_v51 = vpop.f32.mrb[45].mxu0 }
 0x222   : > { %7421 = vst [vmem:[#allocation27_spill] sm:$0xff] %v6516_v62  ;;  %7422 = vst [vmem:[#allocation28_spill] sm:$0xff] %v6518_v51  ;;  %v2303_v40 = vadd.f32 %v2302_v61, %v2301_v27  ;;  %v2297_v38 = vadd.f32 %v2296_v32, %v2295_v9  ;;  %v2395_v10 = vadd.f32 %v2394_v1, %v2092_v28  ;;  %v6520_v20 = vpop.f32.mrb[45].mxu1 }
 0x223   : > { %v2389_v17 = vadd.f32 %v2388_v7, %v2091_v39  ;;  %7423 = vst [vmem:[#allocation29_spill] sm:$0xff] %v6520_v20  ;;  %v2309_v34 = vadd.f32 %v2308_v50, %v2307_v49  ;;  %v2384_v4 = vrot.slane %v2383_v56, 2  ;;  %v2401_v8 = vadd.f32 %v2400_v43, %v2093_v41 }
 0x224   : > { %v2106_v46 = vmul.f32 %v6196_v5, %v6402_v54  ;;  %v2396_v2 = vrot.slane %v2395_v10, 2  ;;  %v2108_v16 = vmul.f32 %v6198_v25, %v6404_v63  ;;  %v2107_v18 = vmul.f32 %v6200_v26, %v6406_v42  ;;  %v6528_v27 = vpop.f32.mrb[46].mxu0 }
 0x225   : > { %v2390_v60 = vrot.slane %v2389_v17, 2  ;;  %7424 = vst [vmem:[#allocation30_spill] sm:$0xff] %v6528_v27  ;;  %v2385_v9 = vadd.f32 %v2384_v4, %v2383_v56  ;;  %v2402_v28 = vrot.slane %v2401_v8, 2  ;;  %v2109_v49 = vmul.f32 %v6204_v33, %v6408_v15  ;;  %v6532_v41 = vpop.f32.mrb[46].mxu1  ;;  %v6534_v61 = vpop.f32.mrb[47].mxu0 }
 0x226   : > { %v2478_v39 = vrot.slane %v2106_v46, 4  ;;  %7425 = vst [vmem:[#allocation31_spill] sm:$0xff] %v6532_v41  ;;  %7426 = vst [vmem:[#allocation32_spill] sm:$0xff] %v6534_v61  ;;  %v2397_v54 = vadd.f32 %v2396_v2, %v2395_v10  ;;  %v2490_v1 = vrot.slane %v2108_v16, 4  ;;  %v2484_v7 = vrot.slane %v2107_v18, 4  ;;  %v6536_v63 = vpop.f32.mrb[47].mxu1 }
 0x227   : > { %v2391_v32 = vadd.f32 %v2390_v60, %v2389_v17  ;;  %7427 = vst [vmem:[#allocation33_spill] sm:$0xff] %v6536_v63  ;;  %v2386_v50 = vrot.slane %v2385_v9, 1  ;;  %v2403_v42 = vadd.f32 %v2402_v28, %v2401_v8  ;;  %v2496_v27 = vrot.slane %v2109_v49, 4 }
 0x228   : > { %v2479_v43 = vadd.f32 %v2478_v39, %v2106_v46  ;;  %v2398_v56 = vrot.slane %v2397_v54, 1  ;;  %v2491_v20 = vadd.f32 %v2490_v1, %v2108_v16  ;;  %v2485_v51 = vadd.f32 %v2484_v7, %v2107_v18 }
 0x229   : > { %v2392_v4 = vrot.slane %v2391_v32, 1  ;;  %v2387_v62 = vadd.f32 %v2386_v50, %v2385_v9  ;;  %v2404_v15 = vrot.slane %v2403_v42, 1  ;;  %v2497_v41 = vadd.f32 %v2496_v27, %v2109_v49 }
 0x22a   : > { %v2480_v0 = vrot.slane %v2479_v43, 2  ;;  %v2399_v37 = vadd.f32 %v2398_v56, %v2397_v54  ;;  %v2492_v10 = vrot.slane %v2491_v20, 2  ;;  %v2486_v17 = vrot.slane %v2485_v51, 2 }
 0x22b   : > { %v2393_v61 = vadd.f32 %v2392_v4, %v2391_v32  ;;  %v3641_v2 = vsel %vm3606_vm0, %v2387_v62, %v2291_v53  ;;  %v2405_v60 = vadd.f32 %v2404_v15, %v2403_v42  ;;  %v2498_v13 = vrot.slane %v2497_v41, 2 }
 0x22c   : > { %v2481_v63 = vadd.f32 %v2480_v0, %v2479_v43  ;;  %v3655_v8 = vsel %vm3606_vm0, %v2399_v37, %v2303_v40  ;;  %v2493_v28 = vadd.f32 %v2492_v10, %v2491_v20  ;;  %v2487_v16 = vadd.f32 %v2486_v17, %v2485_v51 }
 0x22d   : > { %v3648_v46 = vsel %vm3606_vm0, %v2393_v61, %v2297_v38  ;;  %v3662_v18 = vsel %vm3606_vm0, %v2405_v60, %v2309_v34  ;;  %v2499_v39 = vadd.f32 %v2498_v13, %v2497_v41  ;;  %v2122_v27 = vmul.f32 %v6196_v5, %v6410_v35 }
 0x22e   : > { %v2482_v9 = vrot.slane %v2481_v63, 1  ;;  %v2494_v49 = vrot.slane %v2493_v28, 1  ;;  %v2488_v54 = vrot.slane %v2487_v16, 1  ;;  %v2124_v53 = vmul.f32 %v6198_v25, %v6414_v24 }
 0x22f   : > { %v2123_v0 = vmul.f32 %v6200_v26, %v6416_v3  ;;  %v2500_v62 = vrot.slane %v2499_v39, 1  ;;  %v2574_v40 = vrot.slane %v2122_v27, 4  ;;  %v2125_v51 = vmul.f32 %v6204_v33, %v6422_v47 }
 0x230   : > { %v2483_v37 = vadd.f32 %v2482_v9, %v2481_v63  ;;  %v2495_v38 = vadd.f32 %v2494_v49, %v2493_v28  ;;  %v2489_v20 = vadd.f32 %v2488_v54, %v2487_v16  ;;  %v2586_v13 = vrot.slane %v2124_v53, 4 }
 0x231   : > { %v2580_v34 = vrot.slane %v2123_v0, 4  ;;  %v2501_v41 = vadd.f32 %v2500_v62, %v2499_v39  ;;  %v2575_v61 = vadd.f32 %v2574_v40, %v2122_v27  ;;  %v2592_v32 = vrot.slane %v2125_v51, 4 }
 0x232   : > { %v3642_v35 = vsel %vm3608_vm1, %v2483_v37, %v3641_v2  ;;  %v3656_v24 = vsel %vm3608_vm1, %v2495_v38, %v3655_v8  ;;  %v3649_v1 = vsel %vm3608_vm1, %v2489_v20, %v3648_v46  ;;  %v2587_v3 = vadd.f32 %v2586_v13, %v2124_v53 }
 0x233   : > { %v2581_v7 = vadd.f32 %v2580_v34, %v2123_v0  ;;  %v3663_v63 = vsel %vm3608_vm1, %v2501_v41, %v3662_v18  ;;  %v2576_v50 = vrot.slane %v2575_v61, 2  ;;  %v2593_v42 = vadd.f32 %v2592_v32, %v2125_v51 }
 0x234   : > { %v2138_v47 = vmul.f32 %v6196_v5, %v6426_v14  ;;  %v2588_v43 = vrot.slane %v2587_v3, 2  ;;  %v2140_v4 = vmul.f32 %v6198_v25, %v6428_v36  ;;  %v2139_v15 = vmul.f32 %v6200_v26, %v6430_v19 }
 0x235   : > { %v2582_v56 = vrot.slane %v2581_v7, 2  ;;  %v2577_v10 = vadd.f32 %v2576_v50, %v2575_v61  ;;  %v2594_v17 = vrot.slane %v2593_v42, 2  ;;  %v2141_v60 = vmul.f32 %v6204_v33, %v6432_v21 }
 0x236   : > { %v2670_v2 = vrot.slane %v2138_v47, 4  ;;  %v2589_v8 = vadd.f32 %v2588_v43, %v2587_v3  ;;  %v2682_v28 = vrot.slane %v2140_v4, 4  ;;  %v2676_v16 = vrot.slane %v2139_v15, 4 }
 0x237   : > { %v2583_v46 = vadd.f32 %v2582_v56, %v2581_v7  ;;  %v2578_v18 = vrot.slane %v2577_v10, 1  ;;  %v2595_v14 = vadd.f32 %v2594_v17, %v2593_v42  ;;  %v2688_v39 = vrot.slane %v2141_v60, 4 }
 0x238   : > { %v2671_v9 = vadd.f32 %v2670_v2, %v2138_v47  ;;  %v2590_v27 = vrot.slane %v2589_v8, 1  ;;  %v2683_v36 = vadd.f32 %v2682_v28, %v2140_v4  ;;  %v2677_v54 = vadd.f32 %v2676_v16, %v2139_v15  ;;  %v6562_v53 = vpop.f32.mrb[48].mxu0 }
 0x239   : > { %v2584_v49 = vrot.slane %v2583_v46, 1  ;;  %v2579_v19 = vadd.f32 %v2578_v18, %v2577_v10  ;;  %v2596_v0 = vrot.slane %v2595_v14, 1  ;;  %v2689_v62 = vadd.f32 %v2688_v39, %v2141_v60  ;;  %v6564_v40 = vpop.f32.mrb[48].mxu1  ;;  %v6566_v21 = vpop.f32.mrb[49].mxu0 }
 0x23a   : > { %v2672_v37 = vrot.slane %v2671_v9, 2  ;;  %v2591_v51 = vadd.f32 %v2590_v27, %v2589_v8  ;;  %v2684_v20 = vrot.slane %v2683_v36, 2  ;;  %v2678_v13 = vrot.slane %v2677_v54, 2  ;;  %v6568_v34 = vpop.f32.mrb[49].mxu1 }
 0x23b   : > { %v2585_v38 = vadd.f32 %v2584_v49, %v2583_v46  ;;  %v3643_v41 = vsel %vm3610_vm2, %v2579_v19, %v3642_v35  ;;  %v2597_v61 = vadd.f32 %v2596_v0, %v2595_v14  ;;  %v2690_v3 = vrot.slane %v2689_v62, 2 }
 0x23c   : > { %v2673_v32 = vadd.f32 %v2672_v37, %v2671_v9  ;;  %v3657_v7 = vsel %vm3610_vm2, %v2591_v51, %v3656_v24  ;;  %v2685_v42 = vadd.f32 %v2684_v20, %v2683_v36  ;;  %v2679_v47 = vadd.f32 %v2678_v13, %v2677_v54  ;;  %v6573_v43 = vpop.f32.mrb[50].mxu0 }
 0x23d   : > { %v3650_v50 = vsel %vm3610_vm2, %v2585_v38, %v3649_v1  ;;  %v3664_v56 = vsel %vm3610_vm2, %v2597_v61, %v3663_v63  ;;  %v2691_v15 = vadd.f32 %v2690_v3, %v2689_v62  ;;  %v2154_v10 = vmul.f32 %v6196_v5, %v6437_v23  ;;  %v6578_v17 = vpop.f32.mrb[50].mxu1  ;;  %v6580_v35 = vpop.f32.mrb[51].mxu0 }
 0x23e   : > { %v2674_v4 = vrot.slane %v2673_v32, 1  ;;  %v2686_v2 = vrot.slane %v2685_v42, 1  ;;  %v2680_v60 = vrot.slane %v2679_v47, 1  ;;  %v2156_v24 = vmul.f32 %v6198_v25, %v6442_v59  ;;  %v6586_v8 = vpop.f32.mrb[51].mxu1 }
 0x23f   : > { %v2155_v1 = vmul.f32 %v6200_v26, %v6444_v45  ;;  %v2692_v46 = vrot.slane %v2691_v15, 1  ;;  %v2766_v28 = vrot.slane %v2154_v10, 4  ;;  %v2157_v23 = vmul.f32 %v6204_v33, %v6450_v57 }
 0x240   : > { %v2675_v63 = vadd.f32 %v2674_v4, %v2673_v32  ;;  %v2687_v16 = vadd.f32 %v2686_v2, %v2685_v42  ;;  %v2681_v18 = vadd.f32 %v2680_v60, %v2679_v47  ;;  %v2778_v14 = vrot.slane %v2156_v24, 4  ;;  %v6590_v39 = vpop.f32.mrb[52].mxu0 }
 0x241   : > { %v2772_v9 = vrot.slane %v2155_v1, 4  ;;  %v2693_v59 = vadd.f32 %v2692_v46, %v2691_v15  ;;  %v2767_v49 = vadd.f32 %v2766_v28, %v2154_v10  ;;  %v2784_v36 = vrot.slane %v2157_v23, 4  ;;  %v6593_v45 = vpop.f32.mrb[52].mxu1  ;;  %v6595_v54 = vpop.f32.mrb[53].mxu0 }
 0x242   : > { %v3644_v27 = vsel %vm3612_vm3, %v2675_v63, %v3643_v41  ;;  %v3658_v19 = vsel %vm3612_vm3, %v2687_v16, %v3657_v7  ;;  %v3651_v0 = vsel %vm3612_vm3, %v2681_v18, %v3650_v50  ;;  %v2779_v57 = vadd.f32 %v2778_v14, %v2156_v24  ;;  %v6599_v62 = vpop.f32.mrb[53].mxu1 }
 0x243   : > { %v2773_v37 = vadd.f32 %v2772_v9, %v2155_v1  ;;  %v3665_v51 = vsel %vm3612_vm3, %v2693_v59, %v3664_v56  ;;  %v2768_v38 = vrot.slane %v2767_v49, 2  ;;  %v2785_v20 = vadd.f32 %v2784_v36, %v2157_v23 }
 0x244   : > { %v2170_v13 = vmul.f32 %v6196_v5, %v6454_v12  ;;  %v2780_v41 = vrot.slane %v2779_v57, 2  ;;  %v2172_v32 = vmul.f32 %v6198_v25, %v6456_v31  ;;  %v2171_v3 = vmul.f32 %v6200_v26, %v6458_v52  ;;  %v6608_v7 = vpop.f32.mrb[54].mxu0 }
 0x245   : > { %v2774_v61 = vrot.slane %v2773_v37, 2  ;;  %v2769_v50 = vadd.f32 %v2768_v38, %v2767_v49  ;;  %v2786_v42 = vrot.slane %v2785_v20, 2  ;;  %v2173_v56 = vmul.f32 %v6204_v33, %v6460_v44  ;;  %v6612_v4 = vpop.f32.mrb[54].mxu1  ;;  %v6614_v15 = vpop.f32.mrb[55].mxu0 }
 0x246   : > { %v2862_v47 = vrot.slane %v2170_v13, 4  ;;  %v2781_v12 = vadd.f32 %v2780_v41, %v2779_v57  ;;  %v2874_v2 = vrot.slane %v2172_v32, 4  ;;  %v2868_v60 = vrot.slane %v2171_v3, 4  ;;  %v6616_v31 = vpop.f32.mrb[55].mxu1 }
 0x247   : > { %v2775_v10 = vadd.f32 %v2774_v61, %v2773_v37  ;;  %v2770_v24 = vrot.slane %v2769_v50, 1  ;;  %v2787_v52 = vadd.f32 %v2786_v42, %v2785_v20  ;;  %v2880_v63 = vrot.slane %v2173_v56, 4 }
 0x248   : > { %v2863_v1 = vadd.f32 %v2862_v47, %v2170_v13  ;;  %v2782_v46 = vrot.slane %v2781_v12, 1  ;;  %v2875_v23 = vadd.f32 %v2874_v2, %v2172_v32  ;;  %v2869_v16 = vadd.f32 %v2868_v60, %v2171_v3  ;;  %v6618_v18 = vpop.f32.mrb[56].mxu0 }
 0x249   : > { %v2776_v28 = vrot.slane %v2775_v10, 1  ;;  %v2771_v44 = vadd.f32 %v2770_v24, %v2769_v50  ;;  %v2788_v14 = vrot.slane %v2787_v52, 1  ;;  %v2881_v59 = vadd.f32 %v2880_v63, %v2173_v56  ;;  %v6620_v49 = vpop.f32.mrb[56].mxu1  ;;  %v6622_v36 = vpop.f32.mrb[57].mxu0 }
 0x24a   : > { %v2864_v9 = vrot.slane %v2863_v1, 2  ;;  %v2783_v57 = vadd.f32 %v2782_v46, %v2781_v12  ;;  %v2876_v38 = vrot.slane %v2875_v23, 2  ;;  %v2870_v20 = vrot.slane %v2869_v16, 2  ;;  %v6624_v13 = vpop.f32.mrb[57].mxu1 }
 0x24b   : > { %v2777_v37 = vadd.f32 %v2776_v28, %v2775_v10  ;;  %v3645_v41 = vsel %vm3614_vm4, %v2771_v44, %v3644_v27  ;;  %v2789_v61 = vadd.f32 %v2788_v14, %v2787_v52  ;;  %v2882_v3 = vrot.slane %v2881_v59, 2 }
 0x24c   : > { %v2865_v32 = vadd.f32 %v2864_v9, %v2863_v1  ;;  %v3659_v50 = vsel %vm3614_vm4, %v2783_v57, %v3658_v19  ;;  %v2877_v47 = vadd.f32 %v2876_v38, %v2875_v23  ;;  %v2871_v56 = vadd.f32 %v2870_v20, %v2869_v16  ;;  %v6629_v2 = vpop.f32.mrb[58].mxu0 }
 0x24d   : > { %v3652_v42 = vsel %vm3614_vm4, %v2777_v37, %v3651_v0  ;;  %v3666_v12 = vsel %vm3614_vm4, %v2789_v61, %v3665_v51  ;;  %v2883_v60 = vadd.f32 %v2882_v3, %v2881_v59  ;;  %v2186_v24 = vmul.f32 %v6196_v5, %v6465_v11  ;;  %v6634_v63 = vpop.f32.mrb[58].mxu1  ;;  %v6636_v27 = vpop.f32.mrb[59].mxu0 }
 0x24e   : > { %v2866_v10 = vrot.slane %v2865_v32, 1  ;;  %v2878_v52 = vrot.slane %v2877_v47, 1  ;;  %v2872_v1 = vrot.slane %v2871_v56, 1  ;;  %v2188_v19 = vmul.f32 %v6198_v25, %v6470_v58  ;;  %v6642_v46 = vpop.f32.mrb[59].mxu1 }
 0x24f   : > { %v2187_v0 = vmul.f32 %v6200_v26, %v6472_v55  ;;  %7428 = vst [vmem:[#allocation34_spill] sm:$0xff] %v6642_v46  ;;  %v2884_v28 = vrot.slane %v2883_v60, 1  ;;  %v2958_v23 = vrot.slane %v2186_v24, 4  ;;  %v2189_v11 = vmul.f32 %v6204_v33, %v6478_v6 }
 0x250   : > { %v2867_v51 = vadd.f32 %v2866_v10, %v2865_v32  ;;  %v2879_v16 = vadd.f32 %v2878_v52, %v2877_v47  ;;  %v2873_v44 = vadd.f32 %v2872_v1, %v2871_v56  ;;  %v2970_v14 = vrot.slane %v2188_v19, 4  ;;  %v6646_v59 = vpop.f32.mrb[60].mxu0 }
 0x251   : > { %v2964_v9 = vrot.slane %v2187_v0, 4  ;;  %7429 = vst [vmem:[#allocation35_spill] sm:$0xff] %v6646_v59  ;;  %v2885_v58 = vadd.f32 %v2884_v28, %v2883_v60  ;;  %v2959_v37 = vadd.f32 %v2958_v23, %v2186_v24  ;;  %v2976_v38 = vrot.slane %v2189_v11, 4  ;;  %v6649_v55 = vpop.f32.mrb[60].mxu1  ;;  %v6651_v20 = vpop.f32.mrb[61].mxu0  ;;  %v7434_v28 = vld [vmem:[#allocation23_spill] sm:$0xff] }
 0x252   : > { %v3646_v57 = vsel %vm3616_vm5, %v2867_v51, %v3645_v41  ;;  %7430 = vst [vmem:[#allocation36_spill] sm:$0xff] %v6649_v55  ;;  %7431 = vst [vmem:[#allocation37_spill] sm:$0xff] %v6651_v20  ;;  %v3660_v61 = vsel %vm3616_vm5, %v2879_v16, %v3659_v50  ;;  %v3653_v32 = vsel %vm3616_vm5, %v2873_v44, %v3652_v42  ;;  %v6655_v47 = vpop.f32.mrb[61].mxu1  ;;  %v7433_v41 = vld [vmem:[#allocation22_spill] sm:$0xff] }
 0x253   : > { %v2971_v6 = vadd.f32 %v2970_v14, %v2188_v19  ;;  %v2965_v3 = vadd.f32 %v2964_v9, %v2187_v0  ;;  %7432 = vst [vmem:[#allocation38_spill] sm:$0xff] %v6655_v47  ;;  %v3667_v56 = vsel %vm3616_vm5, %v2885_v58, %v3666_v12  ;;  %v2960_v10 = vrot.slane %v2959_v37, 2 }
 0x254   : > { %v2977_v52 = vadd.f32 %v2976_v38, %v2189_v11  ;;  %v2202_v60 = vmul.f32 %v6196_v5, %v7433_v41  ;;  %v2204_v51 = vmul.f32 %v6198_v25, %v6484_v22  ;;  %v2203_v50 = vmul.f32 %v6200_v26, %v7434_v28  ;;  %v6664_v42 = vpop.f32.mrb[62].mxu0 }
 0x255   : > { %v2972_v24 = vrot.slane %v2971_v6, 2  ;;  %v2966_v1 = vrot.slane %v2965_v3, 2  ;;  %7435 = vst [vmem:[#allocation22_spill] sm:$0xff] %v6664_v42  ;;  %v2961_v19 = vadd.f32 %v2960_v10, %v2959_v37  ;;  %v2205_v12 = vmul.f32 %v6204_v33, %v6488_v29  ;;  %v6668_v11 = vpop.f32.mrb[62].mxu1  ;;  %v6670_v16 = vpop.f32.mrb[63].mxu0 }
 0x256   : > { %v2978_v0 = vrot.slane %v2977_v52, 2  ;;  %v3054_v23 = vrot.slane %v2202_v60, 4  ;;  %7436 = vst [vmem:[#allocation23_spill] sm:$0xff] %v6668_v11  ;;  %7437 = vst [vmem:[#allocation39_spill] sm:$0xff] %v6670_v16  ;;  %v3066_v9 = vrot.slane %v2204_v51, 4  ;;  %v3060_v58 = vrot.slane %v2203_v50, 4 }
 0x257   : > { %v2973_v44 = vadd.f32 %v2972_v24, %v2971_v6  ;;  %v2967_v14 = vadd.f32 %v2966_v1, %v2965_v3  ;;  %v6672_v22 = vpop.f32.mrb[63].mxu1  ;;  %v2962_v38 = vrot.slane %v2961_v19, 1  ;;  %v3072_v42 = vrot.slane %v2205_v12, 4 }
 0x258   : > { %7438 = vst [vmem:[#allocation40_spill] sm:$0xff] %v6672_v22  ;;  %v2979_v41 = vadd.f32 %v2978_v0, %v2977_v52  ;;  %v3055_v28 = vadd.f32 %v3054_v23, %v2202_v60  ;;  %v3067_v47 = vadd.f32 %v3066_v9, %v2204_v51  ;;  %v3061_v20 = vadd.f32 %v3060_v58, %v2203_v50  ;;  %v6674_v55 = vpop.f32.mrb[64].mxu0 }
 0x259   : > { %v2974_v37 = vrot.slane %v2973_v44, 1  ;;  %v2968_v10 = vrot.slane %v2967_v14, 1  ;;  %7439 = vst [vmem:[#allocation41_spill] sm:$0xff] %v6674_v55  ;;  %v2963_v29 = vadd.f32 %v2962_v38, %v2961_v19  ;;  %v3073_v6 = vadd.f32 %v3072_v42, %v2205_v12  ;;  %v6676_v3 = vpop.f32.mrb[64].mxu1  ;;  %v6678_v24 = vpop.f32.mrb[65].mxu0 }
 0x25a   : > { %v2980_v11 = vrot.slane %v2979_v41, 1  ;;  %v3056_v16 = vrot.slane %v3055_v28, 2  ;;  %7440 = vst [vmem:[#allocation42_spill] sm:$0xff] %v6676_v3  ;;  %7441 = vst [vmem:[#allocation43_spill] sm:$0xff] %v6678_v24  ;;  %v3068_v60 = vrot.slane %v3067_v47, 2  ;;  %v3062_v0 = vrot.slane %v3061_v20, 2 }
 0x25b   : > { %v2975_v1 = vadd.f32 %v2974_v37, %v2973_v44  ;;  %v2969_v52 = vadd.f32 %v2968_v10, %v2967_v14  ;;  %v6680_v23 = vpop.f32.mrb[65].mxu1  ;;  %v3647_v51 = vsel %vm3618_vm6, %v2963_v29, %v3646_v57  ;;  %v3074_v19 = vrot.slane %v3073_v6, 2 }
 0x25c   : > { %7442 = vst [vmem:[#allocation44_spill] sm:$0xff] %v6680_v23  ;;  %v2981_v50 = vadd.f32 %v2980_v11, %v2979_v41  ;;  %v3057_v9 = vadd.f32 %v3056_v16, %v3055_v28  ;;  %3809 = vst [vmem:[%s6377_s5 + $0x20] sm:$0xff] %v3647_v51  ;;  %v3069_v58 = vadd.f32 %v3068_v60, %v3067_v47  ;;  %v6686_v44 = vpop.f32.mrb[66].mxu0  ;;  %v7446_v47 = vld [vmem:[#allocation24_spill] sm:$0xff] }
 0x25d   : > { %v3661_v42 = vsel %vm3618_vm6, %v2975_v1, %v3660_v61  ;;  %v3654_v12 = vsel %vm3618_vm6, %v2969_v52, %v3653_v32  ;;  %v3063_v38 = vadd.f32 %v3062_v0, %v3061_v20  ;;  %7443 = vst [vmem:[#allocation45_spill] sm:$0xff] %v6686_v44  ;;  %v3075_v10 = vadd.f32 %v3074_v19, %v3073_v6  ;;  %v6693_v11 = vpop.f32.mrb[66].mxu1  ;;  %v6695_v16 = vpop.f32.mrb[67].mxu0  ;;  %v7448_v1 = vld [vmem:[#allocation25_spill] sm:$0xff] }
 0x25e   : > { %3811 = vst [vmem:[%s6377_s5 + $0x30] sm:$0xff] %v3661_v42  ;;  %3810 = vst [vmem:[%s6377_s5 + $0x28] sm:$0xff] %v3654_v12  ;;  %v3668_v14 = vsel %vm3618_vm6, %v2981_v50, %v3667_v56  ;;  %v3058_v37 = vrot.slane %v3057_v9, 1  ;;  %v2218_v57 = vmul.f32 %v6196_v5, %v6494_v48  ;;  %v3070_v61 = vrot.slane %v3069_v58, 1  ;;  %v6702_v28 = vpop.f32.mrb[67].mxu1  ;;  %v7450_v12 = vld [vmem:[#allocation26_spill] sm:$0xff] }
 0x25f   : > { %7444 = vst [vmem:[#allocation46_spill] sm:$0xff] %v6693_v11  ;;  %7445 = vst [vmem:[#allocation47_spill] sm:$0xff] %v6695_v16  ;;  %v3064_v32 = vrot.slane %v3063_v38, 1  ;;  %v2220_v20 = vmul.f32 %v6198_v25, %v6501_v30  ;;  %v2219_v41 = vmul.f32 %v6200_v26, %v7446_v47  ;;  %v3076_v29 = vrot.slane %v3075_v10, 1  ;;  %v7453_v16 = vld [vmem:[#allocation27_spill] sm:$0xff] }
 0x260   : > { %3812 = vst [vmem:[%s6377_s5 + $0x38] sm:$0xff] %v3668_v14  ;;  %7447 = vst [vmem:[#allocation24_spill] sm:$0xff] %v6702_v28  ;;  %v3059_v56 = vadd.f32 %v3058_v37, %v3057_v9  ;;  %v3150_v6 = vrot.slane %v2218_v57, 4  ;;  %v2221_v48 = vmul.f32 %v6204_v33, %v7448_v1  ;;  %v3071_v52 = vadd.f32 %v3070_v61, %v3069_v58  ;;  %v6706_v50 = vpop.f32.mrb[68].mxu0 }
 0x261   : > { %v3065_v60 = vadd.f32 %v3064_v32, %v3063_v38  ;;  %v3162_v0 = vrot.slane %v2220_v20, 4  ;;  %v3156_v51 = vrot.slane %v2219_v41, 4  ;;  %7449 = vst [vmem:[#allocation25_spill] sm:$0xff] %v6706_v50  ;;  %v3077_v19 = vadd.f32 %v3076_v29, %v3075_v10  ;;  %v6710_v47 = vpop.f32.mrb[68].mxu1  ;;  %v6712_v9 = vpop.f32.mrb[69].mxu0  ;;  %v7454_v38 = vld [vmem:[#allocation28_spill] sm:$0xff] }
 0x262   : > { %v3151_v42 = vadd.f32 %v3150_v6, %v2218_v57  ;;  %v3168_v30 = vrot.slane %v2221_v48, 4  ;;  %v2234_v14 = vmul.f32 %v6196_v5, %v7450_v12  ;;  %7451 = vst [vmem:[#allocation26_spill] sm:$0xff] %v6710_v47  ;;  %7452 = vst [vmem:[#allocation48_spill] sm:$0xff] %v6712_v9  ;;  %v2236_v58 = vmul.f32 %v6198_v25, %v7453_v16  ;;  %v6718_v32 = vpop.f32.mrb[69].mxu1  ;;  %v7456_v6 = vld [vmem:[#allocation29_spill] sm:$0xff] }
 0x263   : > { %v3163_v37 = vadd.f32 %v3162_v0, %v2220_v20  ;;  %v3157_v28 = vadd.f32 %v3156_v51, %v2219_v41  ;;  %v2235_v61 = vmul.f32 %v6200_v26, %v7454_v38  ;;  %7455 = vst [vmem:[#allocation27_spill] sm:$0xff] %v6718_v32  ;;  %v2237_v1 = vmul.f32 %v6204_v33, %v7456_v6 }
 0x264   : > { %v3152_v10 = vrot.slane %v3151_v42, 2  ;;  %v3169_v57 = vadd.f32 %v3168_v30, %v2221_v48  ;;  %v3246_v29 = vrot.slane %v2234_v14, 4  ;;  %v3258_v50 = vrot.slane %v2236_v58, 4  ;;  %v6722_v20 = vpop.f32.mrb[70].mxu0 }
 0x265   : > { %v3164_v12 = vrot.slane %v3163_v37, 2  ;;  %v3158_v47 = vrot.slane %v3157_v28, 2  ;;  %v3252_v9 = vrot.slane %v2235_v61, 4  ;;  %7457 = vst [vmem:[#allocation28_spill] sm:$0xff] %v6722_v20  ;;  %v3264_v51 = vrot.slane %v2237_v1, 4  ;;  %v6724_v11 = vpop.f32.mrb[70].mxu1 }
 0x266   : > { %v3153_v41 = vadd.f32 %v3152_v10, %v3151_v42  ;;  %v3170_v0 = vrot.slane %v3169_v57, 2  ;;  %v3247_v16 = vadd.f32 %v3246_v29, %v2234_v14  ;;  %7458 = vst [vmem:[#allocation29_spill] sm:$0xff] %v6724_v11  ;;  %v6726_v38 = vpop.f32.mrb[71].mxu0  ;;  %v3259_v30 = vadd.f32 %v3258_v50, %v2236_v58  ;;  %v6728_v23 = vpop.f32.mrb[71].mxu1 }
 0x267   : > { %7459 = vst [vmem:[#allocation49_spill] sm:$0xff] %v6726_v38  ;;  %v3165_v32 = vadd.f32 %v3164_v12, %v3163_v37  ;;  %v3159_v48 = vadd.f32 %v3158_v47, %v3157_v28  ;;  %v3253_v44 = vadd.f32 %v3252_v9, %v2235_v61  ;;  %v3265_v55 = vadd.f32 %v3264_v51, %v2237_v1 }
 0x268   : > { %v3154_v6 = vrot.slane %v3153_v41, 1  ;;  %v3171_v24 = vadd.f32 %v3170_v0, %v3169_v57  ;;  %v3248_v3 = vrot.slane %v3247_v16, 2  ;;  %v3260_v42 = vrot.slane %v3259_v30, 2 }
 0x269   : > { %v3166_v22 = vrot.slane %v3165_v32, 1  ;;  %v3160_v20 = vrot.slane %v3159_v48, 1  ;;  %v3254_v10 = vrot.slane %v3253_v44, 2  ;;  %v3266_v11 = vrot.slane %v3265_v55, 2 }
 0x26a   : > { %v3155_v14 = vadd.f32 %v3154_v6, %v3153_v41  ;;  %v3172_v29 = vrot.slane %v3171_v24, 1  ;;  %v3249_v59 = vadd.f32 %v3248_v3, %v3247_v16  ;;  %v3261_v37 = vadd.f32 %v3260_v42, %v3259_v30  ;;  %v7462_v16 = vld [vmem:[#allocation32_spill] sm:$0xff] }
 0x26b   : > { %v3167_v46 = vadd.f32 %v3166_v22, %v3165_v32  ;;  %v3161_v38 = vadd.f32 %v3160_v20, %v3159_v48  ;;  %v3255_v28 = vadd.f32 %v3254_v10, %v3253_v44  ;;  %v3267_v58 = vadd.f32 %v3266_v11, %v3265_v55  ;;  %v7460_v22 = vld [vmem:[#allocation30_spill] sm:$0xff] }
 0x26c   : > { %v3737_v50 = vsel %vm3606_vm0, %v3155_v14, %v3059_v56  ;;  %v3173_v47 = vadd.f32 %v3172_v29, %v3171_v24  ;;  %v3250_v9 = vrot.slane %v3249_v59, 1  ;;  %v3262_v1 = vrot.slane %v3261_v37, 1  ;;  %v7461_v56 = vld [vmem:[#allocation31_spill] sm:$0xff] }
 0x26d   : > { %v3743_v61 = vsel %vm3606_vm0, %v3167_v46, %v3071_v52  ;;  %v3740_v57 = vsel %vm3606_vm0, %v3161_v38, %v3065_v60  ;;  %v3256_v12 = vrot.slane %v3255_v28, 1  ;;  %v3268_v0 = vrot.slane %v3267_v58, 1  ;;  %v1914_v46 = vld [vmem:[%s237_s11 + $0x8] sm:$0xff] }
 0x26e   : > { %v3746_v41 = vsel %vm3606_vm0, %v3173_v47, %v3077_v19  ;;  %v3251_v3 = vadd.f32 %v3250_v9, %v3249_v59  ;;  %v2250_v32 = vmul.f32 %v6196_v5, %v7460_v22  ;;  %v3263_v44 = vadd.f32 %v3262_v1, %v3261_v37  ;;  %v7463_v19 = vld [vmem:[#allocation33_spill] sm:$0xff] }
 0x26f   : > { %v3257_v20 = vadd.f32 %v3256_v12, %v3255_v28  ;;  %v2252_v24 = vmul.f32 %v6198_v25, %v7461_v56  ;;  %v2251_v55 = vmul.f32 %v6200_v26, %v7462_v16  ;;  %v3269_v52 = vadd.f32 %v3268_v0, %v3267_v58  ;;  %v7464_v12 = vld [vmem:[#allocation20_spill] sm:$0xff] }
 0x270   : > { %v3738_v11 = vsel %vm3608_vm1, %v3251_v3, %v3737_v50  ;;  %v3342_v60 = vrot.slane %v2250_v32, 4  ;;  %v2253_v59 = vmul.f32 %v6204_v33, %v7463_v19  ;;  %v3744_v51 = vsel %vm3608_vm1, %v3263_v44, %v3743_v61 }
 0x271   : > { %v3741_v5 = vsel %vm3608_vm1, %v3257_v20, %v3740_v57  ;;  %v3354_v38 = vrot.slane %v2252_v24, 4  ;;  %v3348_v48 = vrot.slane %v2251_v55, 4  ;;  %v3747_v25 = vsel %vm3608_vm1, %v3269_v52, %v3746_v41 }
 0x272   : > { %v3343_v30 = vadd.f32 %v3342_v60, %v2250_v32  ;;  %v3360_v6 = vrot.slane %v2253_v59, 4  ;;  %v1916_v26 = vadd.f32 1.0, %v1914_v46  ;;  %v7465_v3 = vsub.s32 0, %v7464_v12  ;;  %v7469_v60 = vld [vmem:[#allocation21_spill] sm:$0xff] }
 0x273   : > { %v3355_v42 = vadd.f32 %v3354_v38, %v2252_v24  ;;  %v3349_v10 = vadd.f32 %v3348_v48, %v2251_v55  ;;  %v7466_v0 = vsub.s32 2, %v7464_v12  ;;  %v7467_v20 = vsub.s32 1, %v7464_v12 }
 0x274   : > { %v3344_v14 = vrot.slane %v3343_v30, 2  ;;  %v3361_v29 = vadd.f32 %v3360_v6, %v2253_v59  ;;  %v1918_v37 = vmul.f32 4.0, %v1916_v26  ;;  %v7468_v24 = vsub.s32 3, %v7464_v12 }
 0x275   : > { %v3356_v28 = vrot.slane %v3355_v42, 2  ;;  %v3350_v50 = vrot.slane %v3349_v10, 2 }
 0x276   : > { %v3345_v47 = vadd.f32 %v3344_v14, %v3343_v30  ;;  %v3362_v33 = vrot.slane %v3361_v29, 2  ;;  %v4067_v9 = vadd.f32 -0.5, %v1918_v37 }
 0x277   : > { %v3357_v58 = vadd.f32 %v3356_v28, %v3355_v42  ;;  %v3351_v61 = vadd.f32 %v3350_v50, %v3349_v10 }
 0x278   : > { %v3346_v57 = vrot.slane %v3345_v47, 1  ;;  %v3363_v1 = vadd.f32 %v3362_v33, %v3361_v29  ;;  %v1961_v41 = vrot.slane %v4067_v9, %v7465_v3  ;;  %v1969_v22 = vrot.slane %v4067_v9, %v7466_v0  ;;  %v6756_v55 = vpop.f32.mrb[72].mxu0 }
 0x279   : > { %v3358_v32 = vrot.slane %v3357_v58, 1  ;;  %v3352_v44 = vrot.slane %v3351_v61, 1  ;;  %v1965_v56 = vrot.slane %v4067_v9, %v7467_v20  ;;  %v1973_v16 = vrot.slane %v4067_v9, %v7468_v24  ;;  %v6760_v38 = vpop.f32.mrb[72].mxu1  ;;  %v6762_v48 = vpop.f32.mrb[73].mxu0 }
 0x27a   : > { %v3347_v46 = vadd.f32 %v3346_v57, %v3345_v47  ;;  %v3364_v52 = vrot.slane %v3363_v1, 1  ;;  %v2014_v19 = vsub.f32 %v1961_v41, %v7469_v60  ;;  %v2016_v59 = vsub.f32 %v1969_v22, %v7469_v60  ;;  %v6766_v10 = vpop.f32.mrb[73].mxu1 }
 0x27b   : > { %v3359_v30 = vadd.f32 %v3358_v32, %v3357_v58  ;;  %v3353_v6 = vadd.f32 %v3352_v44, %v3351_v61  ;;  %v2015_v26 = vsub.f32 %v1965_v56, %v7469_v60  ;;  %v2017_v42 = vsub.f32 %v1973_v16, %v7469_v60  ;;  %7470 = vst [vmem:[#allocation30_spill] sm:$0xff] %v6766_v10 }
 0x27c   : > { %v3739_v14 = vsel %vm3610_vm2, %v3347_v46, %v3738_v11  ;;  %v3365_v29 = vadd.f32 %v3364_v52, %v3363_v1  ;;  %v2030_v37 = vand.u32 2147483647, %v2014_v19  ;;  %v2032_v28 = vand.u32 2147483647, %v2016_v59  ;;  %v6772_v61 = vpop.f32.mrb[74].mxu0 }
 0x27d   : > { %3825 = vst [vmem:[%s6377_s5 + $0xa0] sm:$0xf] %v3739_v14  ;;  %v3745_v50 = vsel %vm3610_vm2, %v3359_v30, %v3744_v51  ;;  %v3742_v47 = vsel %vm3610_vm2, %v3353_v6, %v3741_v5  ;;  %v2031_v33 = vand.u32 2147483647, %v2015_v26  ;;  %v2033_v58 = vand.u32 2147483647, %v2017_v42 }
 0x27e   : > { %3827 = vst [vmem:[%s6377_s5 + $0xb0] sm:$0xf] %v3745_v50  ;;  %3826 = vst [vmem:[%s6377_s5 + $0xa8] sm:$0xf] %v3742_v47  ;;  %v3748_v57 = vsel %vm3610_vm2, %v3365_v29, %v3747_v25  ;;  %v2046_v3 = vsub.f32 1.0, %v2030_v37  ;;  %v2048_v41 = vsub.f32 1.0, %v2032_v28 }
 0x27f   : > { %v7471_v11 = vsub.s32 4, %v7464_v12  ;;  %v6781_v0 = vpop.f32.mrb[74].mxu1  ;;  %v6783_v22 = vpop.f32.mrb[75].mxu0  ;;  %3828 = vst [vmem:[%s6377_s5 + $0xb8] sm:$0xf] %v3748_v57  ;;  %v2047_v51 = vsub.f32 1.0, %v2031_v33 }
 0x280   : > { %v2049_v5 = vsub.f32 1.0, %v2033_v58  ;;  %v7472_v32 = vsub.s32 6, %v7464_v12  ;;  %v7473_v20 = vsub.s32 5, %v7464_v12  ;;  %v6794_v56 = vpop.f32.mrb[75].mxu1  ;;  %v6796_v24 = vmax.f32 %v2046_v3, 0.0  ;;  %v6814_v42 = vpop.f32.mrb[76].mxu0 }
 0x281   : > { %v6779_v1 = vrot.slane %v4067_v9, %v7471_v11  ;;  %7474 = vst [vmem:[#allocation31_spill] sm:$0xff] %v6794_v56  ;;  %v6798_v16 = vmax.f32 %v2048_v41, 0.0  ;;  %v7475_v52 = vsub.s32 7, %v7464_v12  ;;  %v6806_v59 = vmax.f32 %v2047_v51, 0.0  ;;  %7476 = vst [vmem:[#allocation32_spill] sm:$0xff] %v6814_v42  ;;  %v6824_v37 = vpop.f32.mrb[76].mxu1 }
 0x282   : > { %v6788_v44 = vrot.slane %v4067_v9, %v7472_v32  ;;  %v6792_v25 = vrot.slane %v4067_v9, %v7473_v20  ;;  %v6808_v30 = vmax.f32 %v2049_v5, 0.0  ;;  %v2078_v14 = vmul.f32 %v6796_v24, %v6562_v53  ;;  %7477 = vst [vmem:[#allocation33_spill] sm:$0xff] %v6824_v37  ;;  %v6826_v28 = vpop.f32.mrb[77].mxu0 }
 0x283   : > { %v6804_v19 = vrot.slane %v4067_v9, %v7475_v52  ;;  %v2080_v12 = vmul.f32 %v6798_v16, %v6564_v40  ;;  %v2094_v9 = vmul.f32 %v6796_v24, %v6573_v43  ;;  %v2096_v29 = vmul.f32 %v6798_v16, %v6578_v17  ;;  %7478 = vst [vmem:[#allocation20_spill] sm:$0xff] %v6826_v28  ;;  %v6836_v43 = vpop.f32.mrb[77].mxu1 }
 0x284   : > { %v2079_v50 = vmul.f32 %v6806_v59, %v6566_v21  ;;  %v2081_v47 = vmul.f32 %v6808_v30, %v6568_v34  ;;  %v2095_v53 = vmul.f32 %v6806_v59, %v6580_v35  ;;  %v2097_v40 = vmul.f32 %v6808_v30, %v6586_v8  ;;  %7479 = vst [vmem:[#allocation21_spill] sm:$0xff] %v6836_v43  ;;  %v6838_v21 = vpop.f32.mrb[78].mxu0 }
 0x285   : > { %v2310_v33 = vrot.slane %v2078_v14, 4  ;;  %v2322_v17 = vrot.slane %v2080_v12, 4  ;;  %v2406_v58 = vrot.slane %v2094_v9, 4  ;;  %v2418_v57 = vrot.slane %v2096_v29, 4  ;;  %7480 = vst [vmem:[#allocation50_spill] sm:$0xff] %v6838_v21  ;;  %v6840_v35 = vpop.f32.mrb[78].mxu1 }
 0x286   : > { %v2316_v3 = vrot.slane %v2079_v50, 4  ;;  %v2328_v41 = vrot.slane %v2081_v47, 4  ;;  %v2412_v11 = vrot.slane %v2095_v53, 4  ;;  %v2424_v51 = vrot.slane %v2097_v40, 4  ;;  %7481 = vst [vmem:[#allocation51_spill] sm:$0xff] %v6840_v35  ;;  %v6842_v52 = vpop.f32.mrb[79].mxu0 }
 0x287   : > { %v2311_v5 = vadd.f32 %v2310_v33, %v2078_v14  ;;  %v2323_v34 = vadd.f32 %v2322_v17, %v2080_v12  ;;  %v2407_v32 = vadd.f32 %v2406_v58, %v2094_v9  ;;  %v2419_v20 = vadd.f32 %v2418_v57, %v2096_v29  ;;  %7482 = vst [vmem:[#allocation52_spill] sm:$0xff] %v6842_v52  ;;  %v6844_v43 = vpop.f32.mrb[79].mxu1 }
 0x288   : > { %v2317_v8 = vadd.f32 %v2316_v3, %v2079_v50  ;;  %v2329_v26 = vadd.f32 %v2328_v41, %v2081_v47  ;;  %v2413_v6 = vadd.f32 %v2412_v11, %v2095_v53  ;;  %v2425_v46 = vadd.f32 %v2424_v51, %v2097_v40  ;;  %7483 = vst [vmem:[#allocation53_spill] sm:$0xff] %v6844_v43  ;;  %v6846_v9 = vpop.f32.mrb[80].mxu0 }
 0x289   : > { %v2312_v28 = vrot.slane %v2311_v5, 2  ;;  %v2324_v37 = vrot.slane %v2323_v34, 2  ;;  %v2408_v56 = vrot.slane %v2407_v32, 2  ;;  %v2420_v10 = vrot.slane %v2419_v20, 2  ;;  %7484 = vst [vmem:[#allocation54_spill] sm:$0xff] %v6846_v9  ;;  %v6848_v50 = vpop.f32.mrb[80].mxu1 }
 0x28a   : > { %v2318_v42 = vrot.slane %v2317_v8, 2  ;;  %v2330_v21 = vrot.slane %v2329_v26, 2  ;;  %v2414_v14 = vrot.slane %v2413_v6, 2  ;;  %v2426_v12 = vrot.slane %v2425_v46, 2  ;;  %v6850_v47 = vpop.f32.mrb[81].mxu0  ;;  %v6852_v41 = vpop.f32.mrb[81].mxu1 }
 0x28b   : > { %v2313_v29 = vadd.f32 %v2312_v28, %v2311_v5  ;;  %v2325_v33 = vadd.f32 %v2324_v37, %v2323_v34  ;;  %v2409_v17 = vadd.f32 %v2408_v56, %v2407_v32  ;;  %v2421_v58 = vadd.f32 %v2420_v10, %v2419_v20 }
 0x28c   : > { %v2319_v53 = vadd.f32 %v2318_v42, %v2317_v8  ;;  %v2331_v40 = vadd.f32 %v2330_v21, %v2329_v26  ;;  %v2415_v57 = vadd.f32 %v2414_v14, %v2413_v6  ;;  %v2427_v3 = vadd.f32 %v2426_v12, %v2425_v46  ;;  %v6854_v56 = vpop.f32.mrb[82].mxu0 }
 0x28d   : > { %v2314_v11 = vrot.slane %v2313_v29, 1  ;;  %v2326_v51 = vrot.slane %v2325_v33, 1  ;;  %v2410_v43 = vrot.slane %v2409_v17, 1  ;;  %v2422_v52 = vrot.slane %v2421_v58, 1  ;;  %v6856_v42 = vpop.f32.mrb[82].mxu1  ;;  %v6858_v6 = vpop.f32.mrb[83].mxu0 }
 0x28e   : > { %v2320_v35 = vrot.slane %v2319_v53, 1  ;;  %v2332_v9 = vrot.slane %v2331_v40, 1  ;;  %v2416_v28 = vrot.slane %v2415_v57, 1  ;;  %v2428_v37 = vrot.slane %v2427_v3, 1  ;;  %v6860_v8 = vpop.f32.mrb[83].mxu1 }
 0x28f   : > { %v2315_v10 = vadd.f32 %v2314_v11, %v2313_v29  ;;  %v2327_v5 = vadd.f32 %v2326_v51, %v2325_v33  ;;  %v2411_v34 = vadd.f32 %v2410_v43, %v2409_v17  ;;  %v2423_v32 = vadd.f32 %v2422_v52, %v2421_v58  ;;  %7485 = vst [vmem:[#allocation55_spill] sm:$0xff] %v6860_v8 }
 0x290   : > { %v2321_v46 = vadd.f32 %v2320_v35, %v2319_v53  ;;  %v2333_v26 = vadd.f32 %v2332_v9, %v2331_v40  ;;  %v2417_v21 = vadd.f32 %v2416_v28, %v2415_v57  ;;  %v2429_v20 = vadd.f32 %v2428_v37, %v2427_v3  ;;  %v6882_v17 = vpop.f32.mrb[84].mxu0 }
 0x291   : > { %v6863_v14 = vsel %vm3606_vm0, %v2411_v34, %v2315_v10  ;;  %v6866_v12 = vsel %vm3606_vm0, %v2423_v32, %v2327_v5  ;;  %v2110_v43 = vmul.f32 %v6796_v24, %v6590_v39  ;;  %v2112_v52 = vmul.f32 %v6798_v16, %v6593_v45  ;;  %7486 = vst [vmem:[#allocation56_spill] sm:$0xff] %v6882_v17  ;;  %v6888_v40 = vpop.f32.mrb[84].mxu1  ;;  %v6890_v57 = vpop.f32.mrb[85].mxu0 }
 0x292   : > { %v6873_v29 = vsel %vm3606_vm0, %v2417_v21, %v2321_v46  ;;  %v6876_v35 = vsel %vm3606_vm0, %v2429_v20, %v2333_v26  ;;  %v2111_v9 = vmul.f32 %v6806_v59, %v6595_v54  ;;  %v2113_v33 = vmul.f32 %v6808_v30, %v6599_v62  ;;  %7487 = vst [vmem:[#allocation57_spill] sm:$0xff] %v6888_v40  ;;  %v6896_v51 = vpop.f32.mrb[85].mxu1 }
 0x293   : > { %v2502_v58 = vrot.slane %v2110_v43, 4  ;;  %v2514_v53 = vrot.slane %v2112_v52, 4  ;;  %v2126_v39 = vmul.f32 %v6796_v24, %v6608_v7  ;;  %v2128_v45 = vmul.f32 %v6798_v16, %v6612_v4  ;;  %7488 = vst [vmem:[#allocation58_spill] sm:$0xff] %v6890_v57  ;;  %7489 = vst [vmem:[#allocation59_spill] sm:$0xff] %v6896_v51 }
 0x294   : > { %v2508_v3 = vrot.slane %v2111_v9, 4  ;;  %v2520_v11 = vrot.slane %v2113_v33, 4  ;;  %v2127_v54 = vmul.f32 %v6806_v59, %v6614_v15  ;;  %v2129_v62 = vmul.f32 %v6808_v30, %v6616_v31  ;;  %v6898_v57 = vpop.f32.mrb[86].mxu0 }
 0x295   : > { %v2503_v28 = vadd.f32 %v2502_v58, %v2110_v43  ;;  %v2515_v37 = vadd.f32 %v2514_v53, %v2112_v52  ;;  %v2598_v7 = vrot.slane %v2126_v39, 4  ;;  %v2610_v10 = vrot.slane %v2128_v45, 4  ;;  %7490 = vst [vmem:[#allocation60_spill] sm:$0xff] %v6898_v57  ;;  %v6900_v15 = vpop.f32.mrb[86].mxu1  ;;  %v6902_v43 = vpop.f32.mrb[87].mxu0 }
 0x296   : > { %v2509_v5 = vadd.f32 %v2508_v3, %v2111_v9  ;;  %v2521_v4 = vadd.f32 %v2520_v11, %v2113_v33  ;;  %v2604_v34 = vrot.slane %v2127_v54, 4  ;;  %v2616_v32 = vrot.slane %v2129_v62, 4  ;;  %7491 = vst [vmem:[#allocation61_spill] sm:$0xff] %v6900_v15  ;;  %7492 = vst [vmem:[#allocation62_spill] sm:$0xff] %v6902_v43  ;;  %v6904_v52 = vpop.f32.mrb[87].mxu1 }
 0x297   : > { %v2504_v46 = vrot.slane %v2503_v28, 2  ;;  %v2516_v26 = vrot.slane %v2515_v37, 2  ;;  %v2599_v21 = vadd.f32 %v2598_v7, %v2126_v39  ;;  %v2611_v20 = vadd.f32 %v2610_v10, %v2128_v45  ;;  %7493 = vst [vmem:[#allocation63_spill] sm:$0xff] %v6904_v52 }
 0x298   : > { %v2510_v40 = vrot.slane %v2509_v5, 2  ;;  %v2522_v31 = vrot.slane %v2521_v4, 2  ;;  %v2605_v17 = vadd.f32 %v2604_v34, %v2127_v54  ;;  %v2617_v51 = vadd.f32 %v2616_v32, %v2129_v62  ;;  %v6906_v8 = vpop.f32.mrb[88].mxu0 }
 0x299   : > { %v2505_v9 = vadd.f32 %v2504_v46, %v2503_v28  ;;  %v2517_v33 = vadd.f32 %v2516_v26, %v2515_v37  ;;  %v2600_v58 = vrot.slane %v2599_v21, 2  ;;  %v2612_v53 = vrot.slane %v2611_v20, 2 }
 0x29a   : > { %v2511_v3 = vadd.f32 %v2510_v40, %v2509_v5  ;;  %v2523_v11 = vadd.f32 %v2522_v31, %v2521_v4  ;;  %v2606_v39 = vrot.slane %v2605_v17, 2  ;;  %v2618_v45 = vrot.slane %v2617_v51, 2 }
 0x29b   : > { %v2506_v7 = vrot.slane %v2505_v9, 1  ;;  %v2518_v10 = vrot.slane %v2517_v33, 1  ;;  %v2601_v57 = vadd.f32 %v2600_v58, %v2599_v21  ;;  %v2613_v15 = vadd.f32 %v2612_v53, %v2611_v20  ;;  %v6916_v58 = vpop.f32.mrb[88].mxu1 }
 0x29c   : > { %v2512_v54 = vrot.slane %v2511_v3, 1  ;;  %v2524_v62 = vrot.slane %v2523_v11, 1  ;;  %v2607_v34 = vadd.f32 %v2606_v39, %v2605_v17  ;;  %v2619_v32 = vadd.f32 %v2618_v45, %v2617_v51  ;;  %v6944_v39 = vpop.f32.mrb[89].mxu1 }
 0x29d   : > { %v2507_v43 = vadd.f32 %v2506_v7, %v2505_v9  ;;  %v2519_v52 = vadd.f32 %v2518_v10, %v2517_v33  ;;  %v2602_v28 = vrot.slane %v2601_v57, 1  ;;  %v2614_v37 = vrot.slane %v2613_v15, 1  ;;  %v7494_v10 = vld [vmem:[#allocation34_spill] sm:$0xff] }
 0x29e   : > { %v2513_v46 = vadd.f32 %v2512_v54, %v2511_v3  ;;  %v2525_v26 = vadd.f32 %v2524_v62, %v2523_v11  ;;  %v2608_v40 = vrot.slane %v2607_v34, 1  ;;  %v2620_v5 = vrot.slane %v2619_v32, 1  ;;  %v6942_v11 = vpop.f32.mrb[89].mxu0 }
 0x29f   : > { %v3670_v4 = vsel %vm3608_vm1, %v2507_v43, %v6863_v14  ;;  %v3684_v21 = vsel %vm3608_vm1, %v2519_v52, %v6866_v12  ;;  %v2603_v20 = vadd.f32 %v2602_v28, %v2601_v57  ;;  %v2615_v31 = vadd.f32 %v2614_v37, %v2613_v15 }
 0x2a0   : > { %v3677_v17 = vsel %vm3608_vm1, %v2513_v46, %v6873_v29  ;;  %v3691_v51 = vsel %vm3608_vm1, %v2525_v26, %v6876_v35  ;;  %v2609_v9 = vadd.f32 %v2608_v40, %v2607_v34  ;;  %v2621_v33 = vadd.f32 %v2620_v5, %v2619_v32 }
 0x2a1   : > { %v6919_v53 = vsel %vm3610_vm2, %v2603_v20, %v3670_v4  ;;  %v6922_v14 = vsel %vm3610_vm2, %v2615_v31, %v3684_v21  ;;  %v2142_v12 = vmul.f32 %v6796_v24, %v6618_v18  ;;  %v2144_v57 = vmul.f32 %v6798_v16, %v6620_v49  ;;  %v6950_v4 = vpop.f32.mrb[90].mxu0  ;;  %v6952_v21 = vpop.f32.mrb[90].mxu1 }
 0x2a2   : > { %v6929_v29 = vsel %vm3610_vm2, %v2609_v9, %v3677_v17  ;;  %v6932_v35 = vsel %vm3610_vm2, %v2621_v33, %v3691_v51  ;;  %v2143_v15 = vmul.f32 %v6806_v59, %v6622_v36  ;;  %v2145_v43 = vmul.f32 %v6808_v30, %v6624_v13  ;;  %7495 = vst [vmem:[#allocation34_spill] sm:$0xff] %v6950_v4  ;;  %v6954_v51 = vpop.f32.mrb[91].mxu0  ;;  %v6956_v9 = vpop.f32.mrb[91].mxu1 }
 0x2a3   : > { %v2694_v52 = vrot.slane %v2142_v12, 4  ;;  %v2706_v3 = vrot.slane %v2144_v57, 4  ;;  %v2158_v18 = vmul.f32 %v6796_v24, %v6629_v2  ;;  %v2160_v49 = vmul.f32 %v6798_v16, %v6634_v63  ;;  %7496 = vst [vmem:[#allocation64_spill] sm:$0xff] %v6952_v21  ;;  %7497 = vst [vmem:[#allocation65_spill] sm:$0xff] %v6954_v51 }
 0x2a4   : > { %v2700_v45 = vrot.slane %v2143_v15, 4  ;;  %v2712_v7 = vrot.slane %v2145_v43, 4  ;;  %v2159_v36 = vmul.f32 %v6806_v59, %v6636_v27  ;;  %v2161_v13 = vmul.f32 %v6808_v30, %v7494_v10  ;;  %7498 = vst [vmem:[#allocation66_spill] sm:$0xff] %v6956_v9 }
 0x2a5   : > { %v2695_v54 = vadd.f32 %v2694_v52, %v2142_v12  ;;  %v2707_v62 = vadd.f32 %v2706_v3, %v2144_v57  ;;  %v2790_v34 = vrot.slane %v2158_v18, 4  ;;  %v2802_v32 = vrot.slane %v2160_v49, 4 }
 0x2a6   : > { %v2701_v2 = vadd.f32 %v2700_v45, %v2143_v15  ;;  %v2713_v28 = vadd.f32 %v2712_v7, %v2145_v43  ;;  %v2796_v37 = vrot.slane %v2159_v36, 4  ;;  %v2808_v63 = vrot.slane %v2161_v13, 4 }
 0x2a7   : > { %v2696_v46 = vrot.slane %v2695_v54, 2  ;;  %v2708_v26 = vrot.slane %v2707_v62, 2  ;;  %v2791_v40 = vadd.f32 %v2790_v34, %v2158_v18  ;;  %v2803_v5 = vadd.f32 %v2802_v32, %v2160_v49  ;;  %v6958_v34 = vpop.f32.mrb[92].mxu0 }
 0x2a8   : > { %v2702_v27 = vrot.slane %v2701_v2, 2  ;;  %v2714_v20 = vrot.slane %v2713_v28, 2  ;;  %v2797_v31 = vadd.f32 %v2796_v37, %v2159_v36  ;;  %v2809_v17 = vadd.f32 %v2808_v63, %v2161_v13  ;;  %7499 = vst [vmem:[#allocation67_spill] sm:$0xff] %v6958_v34 }
 0x2a9   : > { %v2697_v33 = vadd.f32 %v2696_v46, %v2695_v54  ;;  %v2709_v12 = vadd.f32 %v2708_v26, %v2707_v62  ;;  %v2792_v57 = vrot.slane %v2791_v40, 2  ;;  %v2804_v15 = vrot.slane %v2803_v5, 2 }
 0x2aa   : > { %v2703_v43 = vadd.f32 %v2702_v27, %v2701_v2  ;;  %v2715_v52 = vadd.f32 %v2714_v20, %v2713_v28  ;;  %v2798_v3 = vrot.slane %v2797_v31, 2  ;;  %v2810_v18 = vrot.slane %v2809_v17, 2  ;;  %v6960_v27 = vpop.f32.mrb[92].mxu1 }
 0x2ab   : > { %v2698_v49 = vrot.slane %v2697_v33, 1  ;;  %v2710_v45 = vrot.slane %v2709_v12, 1  ;;  %v2793_v7 = vadd.f32 %v2792_v57, %v2791_v40  ;;  %v2805_v10 = vadd.f32 %v2804_v15, %v2803_v5  ;;  %7500 = vst [vmem:[#allocation68_spill] sm:$0xff] %v6960_v27 }
 0x2ac   : > { %v2704_v36 = vrot.slane %v2703_v43, 1  ;;  %v2716_v13 = vrot.slane %v2715_v52, 1  ;;  %v2799_v32 = vadd.f32 %v2798_v3, %v2797_v31  ;;  %v2811_v37 = vadd.f32 %v2810_v18, %v2809_v17  ;;  %v6980_v3 = vpop.f32.mrb[93].mxu0 }
 0x2ad   : > { %v2699_v63 = vadd.f32 %v2698_v49, %v2697_v33  ;;  %v2711_v9 = vadd.f32 %v2710_v45, %v2709_v12  ;;  %v2794_v54 = vrot.slane %v2793_v7, 1  ;;  %v2806_v62 = vrot.slane %v2805_v10, 1  ;;  %v7505_v49 = vld [vmem:[#allocation37_spill] sm:$0xff] }
 0x2ae   : > { %v2705_v46 = vadd.f32 %v2704_v36, %v2703_v43  ;;  %v2717_v26 = vadd.f32 %v2716_v13, %v2715_v52  ;;  %v2800_v2 = vrot.slane %v2799_v32, 1  ;;  %v2812_v28 = vrot.slane %v2811_v37, 1 }
 0x2af   : > { %v3672_v40 = vsel %vm3612_vm3, %v2699_v63, %v6919_v53  ;;  %v3686_v5 = vsel %vm3612_vm3, %v2711_v9, %v6922_v14  ;;  %v2795_v20 = vadd.f32 %v2794_v54, %v2793_v7  ;;  %v2807_v57 = vadd.f32 %v2806_v62, %v2805_v10  ;;  %v7501_v53 = vld [vmem:[#allocation35_spill] sm:$0xff]  ;;  %v7502_v14 = vld [vmem:[#allocation36_spill] sm:$0xff]  ;;  %v7506_v7 = vld [vmem:[#allocation38_spill] sm:$0xff] }
 0x2b0   : > { %v3679_v31 = vsel %vm3612_vm3, %v2705_v46, %v6929_v29  ;;  %v3693_v17 = vsel %vm3612_vm3, %v2717_v26, %v6932_v35  ;;  %v2801_v33 = vadd.f32 %v2800_v2, %v2799_v32  ;;  %v2813_v12 = vadd.f32 %v2812_v28, %v2811_v37  ;;  %7503 = vst [vmem:[#allocation35_spill] sm:$0xff] %v6980_v3  ;;  %v6982_v29 = vpop.f32.mrb[93].mxu1  ;;  %v7507_v32 = vld [vmem:[#allocation22_spill] sm:$0xff]  ;;  %v7508_v63 = vld [vmem:[#allocation23_spill] sm:$0xff]  ;;  %v7510_v28 = vld [vmem:[#allocation40_spill] sm:$0xff] }
 0x2b1   : > { %v6971_v15 = vsel %vm3614_vm4, %v2795_v20, %v3672_v40  ;;  %v6974_v43 = vsel %vm3614_vm4, %v2807_v57, %v3686_v5  ;;  %v2174_v52 = vmul.f32 %v6796_v24, %v7501_v53  ;;  %v2176_v9 = vmul.f32 %v6798_v16, %v7502_v14  ;;  %7504 = vst [vmem:[#allocation36_spill] sm:$0xff] %v6982_v29  ;;  %v7509_v26 = vld [vmem:[#allocation39_spill] sm:$0xff] }
 0x2b2   : > { %v3680_v35 = vsel %vm3614_vm4, %v2801_v33, %v3679_v31  ;;  %v3694_v18 = vsel %vm3614_vm4, %v2813_v12, %v3693_v17  ;;  %v2175_v45 = vmul.f32 %v6806_v59, %v7505_v49  ;;  %v2177_v10 = vmul.f32 %v6808_v30, %v7506_v7  ;;  %v6998_v17 = vpop.f32.mrb[94].mxu0  ;;  %v7000_v33 = vpop.f32.mrb[94].mxu1 }
 0x2b3   : > { %v2886_v36 = vrot.slane %v2174_v52, 4  ;;  %v2898_v13 = vrot.slane %v2176_v9, 4  ;;  %v2190_v37 = vmul.f32 %v6796_v24, %v7507_v32  ;;  %v2192_v54 = vmul.f32 %v6798_v16, %v7508_v63  ;;  %7511 = vst [vmem:[#allocation37_spill] sm:$0xff] %v6998_v17  ;;  %7512 = vst [vmem:[#allocation38_spill] sm:$0xff] %v7000_v33  ;;  %v7002_v7 = vpop.f32.mrb[95].mxu0  ;;  %v7004_v32 = vpop.f32.mrb[95].mxu1 }
 0x2b4   : > { %v2892_v62 = vrot.slane %v2175_v45, 4  ;;  %v2904_v46 = vrot.slane %v2177_v10, 4  ;;  %v2191_v2 = vmul.f32 %v6806_v59, %v7509_v26  ;;  %v2193_v40 = vmul.f32 %v6808_v30, %v7510_v28  ;;  %7513 = vst [vmem:[#allocation22_spill] sm:$0xff] %v7002_v7  ;;  %7514 = vst [vmem:[#allocation23_spill] sm:$0xff] %v7004_v32 }
 0x2b5   : > { %v2887_v5 = vadd.f32 %v2886_v36, %v2174_v52  ;;  %v2899_v20 = vadd.f32 %v2898_v13, %v2176_v9  ;;  %v2982_v57 = vrot.slane %v2190_v37, 4  ;;  %v2994_v31 = vrot.slane %v2192_v54, 4 }
 0x2b6   : > { %v2893_v12 = vadd.f32 %v2892_v62, %v2175_v45  ;;  %v2905_v53 = vadd.f32 %v2904_v46, %v2177_v10  ;;  %v2988_v14 = vrot.slane %v2191_v2, 4  ;;  %v3000_v49 = vrot.slane %v2193_v40, 4 }
 0x2b7   : > { %v2888_v63 = vrot.slane %v2887_v5, 2  ;;  %v2900_v26 = vrot.slane %v2899_v20, 2  ;;  %v2983_v29 = vadd.f32 %v2982_v57, %v2190_v37  ;;  %v2995_v28 = vadd.f32 %v2994_v31, %v2192_v54 }
 0x2b8   : > { %v2894_v52 = vrot.slane %v2893_v12, 2  ;;  %v2906_v9 = vrot.slane %v2905_v53, 2  ;;  %v2989_v36 = vadd.f32 %v2988_v14, %v2191_v2  ;;  %v3001_v13 = vadd.f32 %v3000_v49, %v2193_v40 }
 0x2b9   : > { %v2889_v3 = vadd.f32 %v2888_v63, %v2887_v5  ;;  %v2901_v17 = vadd.f32 %v2900_v26, %v2899_v20  ;;  %v2984_v27 = vrot.slane %v2983_v29, 2  ;;  %v2996_v33 = vrot.slane %v2995_v28, 2  ;;  %v7516_v63 = vld [vmem:[#allocation42_spill] sm:$0xff]  ;;  %v7518_v26 = vld [vmem:[#allocation44_spill] sm:$0xff] }
 0x2ba   : > { %v2895_v45 = vadd.f32 %v2894_v52, %v2893_v12  ;;  %v2907_v10 = vadd.f32 %v2906_v9, %v2905_v53  ;;  %v2990_v62 = vrot.slane %v2989_v36, 2  ;;  %v3002_v46 = vrot.slane %v3001_v13, 2 }
 0x2bb   : > { %v2890_v34 = vrot.slane %v2889_v3, 1  ;;  %v2902_v7 = vrot.slane %v2901_v17, 1  ;;  %v2985_v51 = vadd.f32 %v2984_v27, %v2983_v29  ;;  %v2997_v32 = vadd.f32 %v2996_v33, %v2995_v28 }
 0x2bc   : > { %v2896_v21 = vrot.slane %v2895_v45, 1  ;;  %v2908_v4 = vrot.slane %v2907_v10, 1  ;;  %v2991_v37 = vadd.f32 %v2990_v62, %v2989_v36  ;;  %v3003_v54 = vadd.f32 %v3002_v46, %v3001_v13  ;;  %v7519_v36 = vld [vmem:[#allocation45_spill] sm:$0xff] }
 0x2bd   : > { %v2891_v57 = vadd.f32 %v2890_v34, %v2889_v3  ;;  %v2903_v31 = vadd.f32 %v2902_v7, %v2901_v17  ;;  %v2986_v2 = vrot.slane %v2985_v51, 1  ;;  %v2998_v40 = vrot.slane %v2997_v32, 1  ;;  %v7515_v7 = vld [vmem:[#allocation41_spill] sm:$0xff] }
 0x2be   : > { %v2897_v5 = vadd.f32 %v2896_v21, %v2895_v45  ;;  %v2909_v20 = vadd.f32 %v2908_v4, %v2907_v10  ;;  %v2992_v12 = vrot.slane %v2991_v37, 1  ;;  %v3004_v53 = vrot.slane %v3003_v54, 1  ;;  %v7520_v45 = vld [vmem:[#allocation46_spill] sm:$0xff] }
 0x2bf   : > { %v3674_v14 = vsel %vm3616_vm5, %v2891_v57, %v6971_v15  ;;  %v3688_v27 = vsel %vm3616_vm5, %v2903_v31, %v6974_v43  ;;  %v2987_v29 = vadd.f32 %v2986_v2, %v2985_v51  ;;  %v2999_v33 = vadd.f32 %v2998_v40, %v2997_v32  ;;  %v7517_v32 = vld [vmem:[#allocation43_spill] sm:$0xff]  ;;  %v7522_v57 = vld [vmem:[#allocation24_spill] sm:$0xff] }
 0x2c0   : > { %v3681_v34 = vsel %vm3616_vm5, %v2897_v5, %v3680_v35  ;;  %v3695_v3 = vsel %vm3616_vm5, %v2909_v20, %v3694_v18  ;;  %v2993_v21 = vadd.f32 %v2992_v12, %v2991_v37  ;;  %v3005_v17 = vadd.f32 %v3004_v53, %v3003_v54  ;;  %v7521_v37 = vld [vmem:[#allocation47_spill] sm:$0xff] }
 0x2c1   : > { %v3675_v4 = vsel %vm3618_vm6, %v2987_v29, %v3674_v14  ;;  %v3689_v49 = vsel %vm3618_vm6, %v2999_v33, %v3688_v27  ;;  %v2206_v15 = vmul.f32 %v6796_v24, %v7515_v7  ;;  %v2208_v43 = vmul.f32 %v6798_v16, %v7516_v63 }
 0x2c2   : > { %3813 = vst [vmem:[%s6377_s5 + $0x40] sm:$0xff] %v3675_v4  ;;  %3815 = vst [vmem:[%s6377_s5 + $0x50] sm:$0xff] %v3689_v49  ;;  %v3682_v51 = vsel %vm3618_vm6, %v2993_v21, %v3681_v34  ;;  %v3696_v35 = vsel %vm3618_vm6, %v3005_v17, %v3695_v3  ;;  %v2207_v18 = vmul.f32 %v6806_v59, %v7517_v32 }
 0x2c3   : > { %v2209_v28 = vmul.f32 %v6808_v30, %v7518_v26  ;;  %3814 = vst [vmem:[%s6377_s5 + $0x48] sm:$0xff] %v3682_v51  ;;  %3816 = vst [vmem:[%s6377_s5 + $0x58] sm:$0xff] %v3696_v35  ;;  %v3078_v52 = vrot.slane %v2206_v15, 4  ;;  %v3090_v9 = vrot.slane %v2208_v43, 4  ;;  %v2222_v13 = vmul.f32 %v6796_v24, %v7519_v36 }
 0x2c4   : > { %v2224_v10 = vmul.f32 %v6798_v16, %v7520_v45  ;;  %v3084_v62 = vrot.slane %v2207_v18, 4  ;;  %v2223_v54 = vmul.f32 %v6806_v59, %v7521_v37  ;;  %v2225_v31 = vmul.f32 %v6808_v30, %v7522_v57 }
 0x2c5   : > { %v3096_v46 = vrot.slane %v2209_v28, 4  ;;  %v3079_v2 = vadd.f32 %v3078_v52, %v2206_v15  ;;  %v3091_v40 = vadd.f32 %v3090_v9, %v2208_v43  ;;  %v3174_v5 = vrot.slane %v2222_v13, 4 }
 0x2c6   : > { %v3186_v20 = vrot.slane %v2224_v10, 4  ;;  %v3085_v12 = vadd.f32 %v3084_v62, %v2207_v18  ;;  %v3180_v14 = vrot.slane %v2223_v54, 4  ;;  %v3192_v27 = vrot.slane %v2225_v31, 4 }
 0x2c7   : > { %v3097_v53 = vadd.f32 %v3096_v46, %v2209_v28  ;;  %v3080_v29 = vrot.slane %v3079_v2, 2  ;;  %v3092_v33 = vrot.slane %v3091_v40, 2  ;;  %v3175_v34 = vadd.f32 %v3174_v5, %v2222_v13 }
 0x2c8   : > { %v3187_v3 = vadd.f32 %v3186_v20, %v2224_v10  ;;  %v3086_v21 = vrot.slane %v3085_v12, 2  ;;  %v3181_v4 = vadd.f32 %v3180_v14, %v2223_v54  ;;  %v3193_v49 = vadd.f32 %v3192_v27, %v2225_v31  ;;  %v7524_v14 = vld [vmem:[#allocation26_spill] sm:$0xff] }
 0x2c9   : > { %v3098_v17 = vrot.slane %v3097_v53, 2  ;;  %v3081_v7 = vadd.f32 %v3080_v29, %v3079_v2  ;;  %v3093_v63 = vadd.f32 %v3092_v33, %v3091_v40  ;;  %v3176_v51 = vrot.slane %v3175_v34, 2 }
 0x2ca   : > { %v3188_v35 = vrot.slane %v3187_v3, 2  ;;  %v3087_v15 = vadd.f32 %v3086_v21, %v3085_v12  ;;  %v3182_v32 = vrot.slane %v3181_v4, 2  ;;  %v3194_v26 = vrot.slane %v3193_v49, 2  ;;  %v7523_v12 = vld [vmem:[#allocation25_spill] sm:$0xff]  ;;  %v7526_v21 = vld [vmem:[#allocation27_spill] sm:$0xff] }
 0x2cb   : > { %v3099_v43 = vadd.f32 %v3098_v17, %v3097_v53  ;;  %v3082_v18 = vrot.slane %v3081_v7, 1  ;;  %v3094_v28 = vrot.slane %v3093_v63, 1  ;;  %v3177_v52 = vadd.f32 %v3176_v51, %v3175_v34  ;;  %v7525_v34 = vld [vmem:[#allocation48_spill] sm:$0xff] }
 0x2cc   : > { %v3189_v9 = vadd.f32 %v3188_v35, %v3187_v3  ;;  %v3088_v36 = vrot.slane %v3087_v15, 1  ;;  %v3183_v13 = vadd.f32 %v3182_v32, %v3181_v4  ;;  %v3195_v10 = vadd.f32 %v3194_v26, %v3193_v49 }
 0x2cd   : > { %v3100_v45 = vrot.slane %v3099_v43, 1  ;;  %v3083_v62 = vadd.f32 %v3082_v18, %v3081_v7  ;;  %v3095_v46 = vadd.f32 %v3094_v28, %v3093_v63  ;;  %v3178_v37 = vrot.slane %v3177_v52, 1  ;;  %v7527_v18 = vld [vmem:[#allocation28_spill] sm:$0xff] }
 0x2ce   : > { %v3190_v54 = vrot.slane %v3189_v9, 1  ;;  %v3089_v57 = vadd.f32 %v3088_v36, %v3087_v15  ;;  %v3184_v2 = vrot.slane %v3183_v13, 1  ;;  %v3196_v40 = vrot.slane %v3195_v10, 1 }
 0x2cf   : > { %v3101_v31 = vadd.f32 %v3100_v45, %v3099_v43  ;;  %v3179_v5 = vadd.f32 %v3178_v37, %v3177_v52  ;;  %v2238_v53 = vmul.f32 %v6796_v24, %v7523_v12  ;;  %v2240_v27 = vmul.f32 %v6798_v16, %v7524_v14  ;;  %v7528_v52 = vld [vmem:[#allocation29_spill] sm:$0xff] }
 0x2d0   : > { %v3191_v20 = vadd.f32 %v3190_v54, %v3189_v9  ;;  %v3185_v29 = vadd.f32 %v3184_v2, %v3183_v13  ;;  %v3197_v33 = vadd.f32 %v3196_v40, %v3195_v10  ;;  %v2239_v3 = vmul.f32 %v6806_v59, %v7525_v34  ;;  %v7529_v13 = vld [vmem:[#allocation49_spill] sm:$0xff] }
 0x2d1   : > { %v2241_v17 = vmul.f32 %v6808_v30, %v7526_v21  ;;  %v3749_v4 = vsel %vm3606_vm0, %v3179_v5, %v3083_v62  ;;  %v3270_v7 = vrot.slane %v2238_v53, 4  ;;  %v3282_v63 = vrot.slane %v2240_v27, 4 }
 0x2d2   : > { %v3755_v49 = vsel %vm3606_vm0, %v3191_v20, %v3095_v46  ;;  %v3752_v51 = vsel %vm3606_vm0, %v3185_v29, %v3089_v57  ;;  %v3758_v35 = vsel %vm3606_vm0, %v3197_v33, %v3101_v31  ;;  %v3276_v15 = vrot.slane %v2239_v3, 4 }
 0x2d3   : > { %v3288_v43 = vrot.slane %v2241_v17, 4  ;;  %v3271_v32 = vadd.f32 %v3270_v7, %v2238_v53  ;;  %v3283_v26 = vadd.f32 %v3282_v63, %v2240_v27  ;;  %v2254_v28 = vmul.f32 %v6796_v24, %v7527_v18 }
 0x2d4   : > { %v2256_v9 = vmul.f32 %v6798_v16, %v7528_v52  ;;  %v3277_v36 = vadd.f32 %v3276_v15, %v2239_v3  ;;  %v2255_v10 = vmul.f32 %v6806_v59, %v7529_v13  ;;  %v2257_v62 = vmul.f32 %v6808_v30, %v6728_v23 }
 0x2d5   : > { %v3289_v45 = vadd.f32 %v3288_v43, %v2241_v17  ;;  %v3272_v46 = vrot.slane %v3271_v32, 2  ;;  %v3284_v37 = vrot.slane %v3283_v26, 2  ;;  %v3366_v54 = vrot.slane %v2254_v28, 4 }
 0x2d6   : > { %v3378_v57 = vrot.slane %v2256_v9, 4  ;;  %v3278_v31 = vrot.slane %v3277_v36, 2  ;;  %v3372_v40 = vrot.slane %v2255_v10, 4  ;;  %v3384_v5 = vrot.slane %v2257_v62, 4 }
 0x2d7   : > { %v3290_v2 = vrot.slane %v3289_v45, 2  ;;  %v3273_v24 = vadd.f32 %v3272_v46, %v3271_v32  ;;  %v3285_v20 = vadd.f32 %v3284_v37, %v3283_v26  ;;  %v3367_v12 = vadd.f32 %v3366_v54, %v2254_v28 }
 0x2d8   : > { %v3379_v16 = vadd.f32 %v3378_v57, %v2256_v9  ;;  %v3279_v53 = vadd.f32 %v3278_v31, %v3277_v36  ;;  %v3373_v27 = vadd.f32 %v3372_v40, %v2255_v10  ;;  %v3385_v29 = vadd.f32 %v3384_v5, %v2257_v62 }
 0x2d9   : > { %v3291_v14 = vadd.f32 %v3290_v2, %v3289_v45  ;;  %v3274_v59 = vrot.slane %v3273_v24, 1  ;;  %v3286_v33 = vrot.slane %v3285_v20, 1  ;;  %v3368_v34 = vrot.slane %v3367_v12, 2 }
 0x2da   : > { %v3380_v23 = vrot.slane %v3379_v16, 2  ;;  %v3280_v30 = vrot.slane %v3279_v53, 1  ;;  %v3374_v21 = vrot.slane %v3373_v27, 2  ;;  %v3386_v17 = vrot.slane %v3385_v29, 2 }
 0x2db   : > { %v3292_v3 = vrot.slane %v3291_v14, 1  ;;  %v3275_v7 = vadd.f32 %v3274_v59, %v3273_v24  ;;  %v3287_v63 = vadd.f32 %v3286_v33, %v3285_v20  ;;  %v3369_v15 = vadd.f32 %v3368_v34, %v3367_v12 }
 0x2dc   : > { %v3381_v43 = vadd.f32 %v3380_v23, %v3379_v16  ;;  %v3281_v32 = vadd.f32 %v3280_v30, %v3279_v53  ;;  %v3375_v18 = vadd.f32 %v3374_v21, %v3373_v27  ;;  %v3387_v28 = vadd.f32 %v3386_v17, %v3385_v29  ;;  %v7533_v21 = vld [vmem:[#allocation32_spill] sm:$0xff] }
 0x2dd   : > { %v3293_v26 = vadd.f32 %v3292_v3, %v3291_v14  ;;  %v3750_v52 = vsel %vm3608_vm1, %v3275_v7, %v3749_v4  ;;  %v3756_v9 = vsel %vm3608_vm1, %v3287_v63, %v3755_v49  ;;  %v3370_v36 = vrot.slane %v3369_v15, 1 }
 0x2de   : > { %v3382_v45 = vrot.slane %v3381_v43, 1  ;;  %v3753_v13 = vsel %vm3608_vm1, %v3281_v32, %v3752_v51  ;;  %v3376_v62 = vrot.slane %v3375_v18, 1  ;;  %v3388_v46 = vrot.slane %v3387_v28, 1  ;;  %v7535_v32 = vld [vmem:[#allocation31_spill] sm:$0xff] }
 0x2df   : > { %v3759_v10 = vsel %vm3608_vm1, %v3293_v26, %v3758_v35  ;;  %v3371_v37 = vadd.f32 %v3370_v36, %v3369_v15  ;;  %v7530_v57 = vsub.f32 %v6779_v1, %v7469_v60  ;;  %v7531_v4 = vsub.f32 %v6788_v44, %v7469_v60 }
 0x2e0   : > { %v3383_v54 = vadd.f32 %v3382_v45, %v3381_v43  ;;  %v3377_v2 = vadd.f32 %v3376_v62, %v3375_v18  ;;  %v3389_v51 = vadd.f32 %v3388_v46, %v3387_v28  ;;  %v7532_v35 = vsub.f32 %v6792_v25, %v7469_v60 }
 0x2e1   : > { %v2034_v31 = vand.u32 2147483647, %v7530_v57  ;;  %v2036_v49 = vand.u32 2147483647, %v7531_v4  ;;  %v2021_v5 = vsub.f32 %v6804_v19, %v7469_v60  ;;  %v3751_v24 = vsel %vm3610_vm2, %v3371_v37, %v3750_v52 }
 0x2e2   : > { %v2035_v40 = vand.u32 2147483647, %v7532_v35  ;;  %v3757_v1 = vsel %vm3610_vm2, %v3383_v54, %v3756_v9  ;;  %3829 = vst [vmem:[%s6377_s5 + $0xc0] sm:$0xf] %v3751_v24  ;;  %v3754_v44 = vsel %vm3610_vm2, %v3377_v2, %v3753_v13  ;;  %v3760_v16 = vsel %vm3610_vm2, %v3389_v51, %v3759_v10 }
 0x2e3   : > { %v2050_v20 = vsub.f32 1.0, %v2034_v31  ;;  %v2052_v12 = vsub.f32 1.0, %v2036_v49  ;;  %3831 = vst [vmem:[%s6377_s5 + $0xd0] sm:$0xf] %v3757_v1  ;;  %v2037_v14 = vand.u32 2147483647, %v2021_v5 }
 0x2e4   : > { %v2051_v53 = vsub.f32 1.0, %v2035_v40  ;;  %3830 = vst [vmem:[%s6377_s5 + $0xc8] sm:$0xf] %v3754_v44  ;;  %3832 = vst [vmem:[%s6377_s5 + $0xd8] sm:$0xf] %v3760_v16 }
 0x2e5   : > { %v7079_v25 = vmax.f32 %v2050_v20, 0.0  ;;  %v7081_v27 = vmax.f32 %v2052_v12, 0.0  ;;  %v2053_v19 = vsub.f32 1.0, %v2037_v14 }
 0x2e6   : > { %v7083_v60 = vmax.f32 %v2051_v53, 0.0 }
 0x2e7   : > { %v2082_v29 = vmul.f32 %v7079_v25, %v6756_v55  ;;  %v2084_v59 = vmul.f32 %v7081_v27, %v6760_v38  ;;  %v2098_v33 = vmul.f32 %v7079_v25, %v6772_v61  ;;  %v2100_v34 = vmul.f32 %v7081_v27, %v6781_v0  ;;  %v7534_v61 = vld [vmem:[#allocation30_spill] sm:$0xff] }
 0x2e8   : > { %v2083_v23 = vmul.f32 %v7083_v60, %v6762_v48  ;;  %v7095_v30 = vmax.f32 %v2053_v19, 0.0  ;;  %v2099_v3 = vmul.f32 %v7083_v60, %v6783_v22  ;;  %v2114_v55 = vmul.f32 %v7079_v25, %v7533_v21 }
 0x2e9   : > { %v2334_v17 = vrot.slane %v2082_v29, 4  ;;  %v2346_v7 = vrot.slane %v2084_v59, 4  ;;  %v2430_v38 = vrot.slane %v2098_v33, 4  ;;  %v2442_v63 = vrot.slane %v2100_v34, 4 }
 0x2ea   : > { %v2340_v15 = vrot.slane %v2083_v23, 4  ;;  %v2085_v43 = vmul.f32 %v7095_v30, %v7534_v61  ;;  %v2436_v0 = vrot.slane %v2099_v3, 4  ;;  %v2101_v48 = vmul.f32 %v7095_v30, %v7535_v32 }
 0x2eb   : > { %v2335_v26 = vadd.f32 %v2334_v17, %v2082_v29  ;;  %v2347_v18 = vadd.f32 %v2346_v7, %v2084_v59  ;;  %v2431_v28 = vadd.f32 %v2430_v38, %v2098_v33  ;;  %v2443_v52 = vadd.f32 %v2442_v63, %v2100_v34 }
 0x2ec   : > { %v2341_v22 = vadd.f32 %v2340_v15, %v2083_v23  ;;  %v2352_v9 = vrot.slane %v2085_v43, 4  ;;  %v2437_v36 = vadd.f32 %v2436_v0, %v2099_v3  ;;  %v2448_v45 = vrot.slane %v2101_v48, 4  ;;  %v7536_v15 = vld [vmem:[#allocation33_spill] sm:$0xff] }
 0x2ed   : > { %v2336_v13 = vrot.slane %v2335_v26, 2  ;;  %v2348_v10 = vrot.slane %v2347_v18, 2  ;;  %v2432_v62 = vrot.slane %v2431_v28, 2  ;;  %v2444_v46 = vrot.slane %v2443_v52, 2 }
 0x2ee   : > { %v2342_v37 = vrot.slane %v2341_v22, 2  ;;  %v2353_v54 = vadd.f32 %v2352_v9, %v2085_v43  ;;  %v2438_v57 = vrot.slane %v2437_v36, 2  ;;  %v2449_v31 = vadd.f32 %v2448_v45, %v2101_v48  ;;  %v7537_v48 = vld [vmem:[#allocation20_spill] sm:$0xff]  ;;  %v7539_v9 = vld [vmem:[#allocation50_spill] sm:$0xff] }
 0x2ef   : > { %v2337_v4 = vadd.f32 %v2336_v13, %v2335_v26  ;;  %v2349_v49 = vadd.f32 %v2348_v10, %v2347_v18  ;;  %v2433_v2 = vadd.f32 %v2432_v62, %v2431_v28  ;;  %v2445_v51 = vadd.f32 %v2444_v46, %v2443_v52  ;;  %v7538_v52 = vld [vmem:[#allocation21_spill] sm:$0xff]  ;;  %v7540_v10 = vld [vmem:[#allocation51_spill] sm:$0xff]  ;;  %v7541_v46 = vld [vmem:[#allocation52_spill] sm:$0xff] }
 0x2f0   : > { %v2343_v35 = vadd.f32 %v2342_v37, %v2341_v22  ;;  %v2354_v40 = vrot.slane %v2353_v54, 2  ;;  %v2439_v5 = vadd.f32 %v2438_v57, %v2437_v36  ;;  %v2450_v24 = vrot.slane %v2449_v31, 2 }
 0x2f1   : > { %v2338_v1 = vrot.slane %v2337_v4, 1  ;;  %v2350_v20 = vrot.slane %v2349_v49, 1  ;;  %v2434_v12 = vrot.slane %v2433_v2, 1  ;;  %v2446_v44 = vrot.slane %v2445_v51, 1 }
 0x2f2   : > { %v2344_v16 = vrot.slane %v2343_v35, 1  ;;  %v2355_v53 = vadd.f32 %v2354_v40, %v2353_v54  ;;  %v2440_v14 = vrot.slane %v2439_v5, 1  ;;  %v2451_v19 = vadd.f32 %v2450_v24, %v2449_v31 }
 0x2f3   : > { %v2339_v29 = vadd.f32 %v2338_v1, %v2337_v4  ;;  %v2351_v59 = vadd.f32 %v2350_v20, %v2349_v49  ;;  %v2435_v33 = vadd.f32 %v2434_v12, %v2433_v2  ;;  %v2447_v34 = vadd.f32 %v2446_v44, %v2445_v51  ;;  %v7542_v51 = vld [vmem:[#allocation53_spill] sm:$0xff] }
 0x2f4   : > { %v2345_v23 = vadd.f32 %v2344_v16, %v2343_v35  ;;  %v2356_v3 = vrot.slane %v2355_v53, 1  ;;  %v2441_v21 = vadd.f32 %v2440_v14, %v2439_v5  ;;  %v2452_v17 = vrot.slane %v2451_v19, 1 }
 0x2f5   : > { %v3697_v7 = vsel %vm3606_vm0, %v2435_v33, %v2339_v29  ;;  %v3711_v38 = vsel %vm3606_vm0, %v2447_v34, %v2351_v59  ;;  %v2526_v63 = vrot.slane %v2114_v55, 4  ;;  %v2116_v61 = vmul.f32 %v7081_v27, %v7536_v15 }
 0x2f6   : > { %v2357_v43 = vadd.f32 %v2356_v3, %v2355_v53  ;;  %v3704_v0 = vsel %vm3606_vm0, %v2441_v21, %v2345_v23  ;;  %v2453_v32 = vadd.f32 %v2452_v17, %v2451_v19  ;;  %v2115_v26 = vmul.f32 %v7083_v60, %v7537_v48 }
 0x2f7   : > { %v2527_v18 = vadd.f32 %v2526_v63, %v2114_v55  ;;  %v2538_v28 = vrot.slane %v2116_v61, 4  ;;  %v2117_v22 = vmul.f32 %v7095_v30, %v7538_v52  ;;  %v2130_v36 = vmul.f32 %v7079_v25, %v7539_v9 }
 0x2f8   : > { %v3718_v45 = vsel %vm3606_vm0, %v2453_v32, %v2357_v43  ;;  %v2532_v13 = vrot.slane %v2115_v26, 4  ;;  %v2132_v62 = vmul.f32 %v7081_v27, %v7540_v10  ;;  %v2131_v37 = vmul.f32 %v7083_v60, %v7541_v46  ;;  %v7543_v46 = vld [vmem:[#allocation54_spill] sm:$0xff] }
 0x2f9   : > { %v2528_v54 = vrot.slane %v2527_v18, 2  ;;  %v2539_v57 = vadd.f32 %v2538_v28, %v2116_v61  ;;  %v2544_v31 = vrot.slane %v2117_v22, 4  ;;  %v2622_v55 = vrot.slane %v2130_v36, 4 }
 0x2fa   : > { %v2533_v4 = vadd.f32 %v2532_v13, %v2115_v26  ;;  %v2634_v49 = vrot.slane %v2132_v62, 4  ;;  %v2628_v2 = vrot.slane %v2131_v37, 4  ;;  %v2133_v35 = vmul.f32 %v7095_v30, %v7542_v51 }
 0x2fb   : > { %v2529_v40 = vadd.f32 %v2528_v54, %v2527_v18  ;;  %v2540_v5 = vrot.slane %v2539_v57, 2  ;;  %v2545_v24 = vadd.f32 %v2544_v31, %v2117_v22  ;;  %v2623_v1 = vadd.f32 %v2622_v55, %v2130_v36 }
 0x2fc   : > { %v2534_v20 = vrot.slane %v2533_v4, 2  ;;  %v2635_v12 = vadd.f32 %v2634_v49, %v2132_v62  ;;  %v2629_v44 = vadd.f32 %v2628_v2, %v2131_v37  ;;  %v2640_v16 = vrot.slane %v2133_v35, 4 }
 0x2fd   : > { %v2530_v53 = vrot.slane %v2529_v40, 1  ;;  %v2541_v14 = vadd.f32 %v2540_v5, %v2539_v57  ;;  %v2546_v19 = vrot.slane %v2545_v24, 2  ;;  %v2624_v29 = vrot.slane %v2623_v1, 2 }
 0x2fe   : > { %v2535_v59 = vadd.f32 %v2534_v20, %v2533_v4  ;;  %v2636_v33 = vrot.slane %v2635_v12, 2  ;;  %v2630_v34 = vrot.slane %v2629_v44, 2  ;;  %v2641_v23 = vadd.f32 %v2640_v16, %v2133_v35 }
 0x2ff   : > { %v2531_v3 = vadd.f32 %v2530_v53, %v2529_v40  ;;  %v2542_v21 = vrot.slane %v2541_v14, 1  ;;  %v2547_v17 = vadd.f32 %v2546_v19, %v2545_v24  ;;  %v2625_v63 = vadd.f32 %v2624_v29, %v2623_v1 }
 0x300   : > { %v2536_v15 = vrot.slane %v2535_v59, 1  ;;  %v2637_v61 = vadd.f32 %v2636_v33, %v2635_v12  ;;  %v2631_v43 = vadd.f32 %v2630_v34, %v2629_v44  ;;  %v2642_v32 = vrot.slane %v2641_v23, 2 }
 0x301   : > { %v3698_v48 = vsel %vm3608_vm1, %v2531_v3, %v3697_v7  ;;  %v2543_v26 = vadd.f32 %v2542_v21, %v2541_v14  ;;  %v2548_v18 = vrot.slane %v2547_v17, 1  ;;  %v2626_v28 = vrot.slane %v2625_v63, 1 }
 0x302   : > { %v2537_v52 = vadd.f32 %v2536_v15, %v2535_v59  ;;  %v2638_v22 = vrot.slane %v2637_v61, 1  ;;  %v2632_v9 = vrot.slane %v2631_v43, 1  ;;  %v2643_v36 = vadd.f32 %v2642_v32, %v2641_v23 }
 0x303   : > { %v3712_v13 = vsel %vm3608_vm1, %v2543_v26, %v3711_v38  ;;  %v2549_v10 = vadd.f32 %v2548_v18, %v2547_v17  ;;  %v2627_v62 = vadd.f32 %v2626_v28, %v2625_v63  ;;  %v2146_v37 = vmul.f32 %v7079_v25, %v7543_v46 }
 0x304   : > { %v3705_v54 = vsel %vm3608_vm1, %v2537_v52, %v3704_v0  ;;  %v2639_v57 = vadd.f32 %v2638_v22, %v2637_v61  ;;  %v2633_v31 = vadd.f32 %v2632_v9, %v2631_v43  ;;  %v2644_v55 = vrot.slane %v2643_v36, 1 }
 0x305   : > { %v3719_v7 = vsel %vm3608_vm1, %v2549_v10, %v3718_v45  ;;  %v3699_v4 = vsel %vm3610_vm2, %v2627_v62, %v3698_v48  ;;  %v2718_v49 = vrot.slane %v2146_v37, 4  ;;  %v2148_v2 = vmul.f32 %v7081_v27, %v6848_v50 }
 0x306   : > { %v3713_v38 = vsel %vm3610_vm2, %v2639_v57, %v3712_v13  ;;  %v3706_v51 = vsel %vm3610_vm2, %v2633_v31, %v3705_v54  ;;  %v2645_v35 = vadd.f32 %v2644_v55, %v2643_v36  ;;  %v2147_v40 = vmul.f32 %v7083_v60, %v6850_v47 }
 0x307   : > { %v2719_v0 = vadd.f32 %v2718_v49, %v2146_v37  ;;  %v2730_v5 = vrot.slane %v2148_v2, 4  ;;  %v2149_v24 = vmul.f32 %v7095_v30, %v6852_v41  ;;  %v2162_v45 = vmul.f32 %v7079_v25, %v6854_v56  ;;  %v7544_v41 = vld [vmem:[#allocation55_spill] sm:$0xff] }
 0x308   : > { %v3720_v1 = vsel %vm3610_vm2, %v2645_v35, %v3719_v7  ;;  %v2724_v20 = vrot.slane %v2147_v40, 4  ;;  %v2164_v50 = vmul.f32 %v7081_v27, %v6856_v42  ;;  %v2163_v12 = vmul.f32 %v7083_v60, %v6858_v6 }
 0x309   : > { %v2720_v44 = vrot.slane %v2719_v0, 2  ;;  %v2731_v16 = vadd.f32 %v2730_v5, %v2148_v2  ;;  %v2736_v47 = vrot.slane %v2149_v24, 4  ;;  %v2814_v53 = vrot.slane %v2162_v45, 4 }
 0x30a   : > { %v2725_v14 = vadd.f32 %v2724_v20, %v2147_v40  ;;  %v2826_v19 = vrot.slane %v2164_v50, 4  ;;  %v2820_v29 = vrot.slane %v2163_v12, 4  ;;  %v2165_v59 = vmul.f32 %v7095_v30, %v7544_v41  ;;  %v7545_v40 = vld [vmem:[#allocation56_spill] sm:$0xff]  ;;  %v7548_v41 = vld [vmem:[#allocation59_spill] sm:$0xff] }
 0x30b   : > { %v2721_v56 = vadd.f32 %v2720_v44, %v2719_v0  ;;  %v2732_v33 = vrot.slane %v2731_v16, 2  ;;  %v2737_v34 = vadd.f32 %v2736_v47, %v2149_v24  ;;  %v2815_v23 = vadd.f32 %v2814_v53, %v2162_v45  ;;  %v7546_v44 = vld [vmem:[#allocation57_spill] sm:$0xff] }
 0x30c   : > { %v2726_v3 = vrot.slane %v2725_v14, 2  ;;  %v2827_v21 = vadd.f32 %v2826_v19, %v2164_v50  ;;  %v2821_v42 = vadd.f32 %v2820_v29, %v2163_v12  ;;  %v2832_v17 = vrot.slane %v2165_v59, 4 }
 0x30d   : > { %v2722_v63 = vrot.slane %v2721_v56, 1  ;;  %v2733_v6 = vadd.f32 %v2732_v33, %v2731_v16  ;;  %v2738_v15 = vrot.slane %v2737_v34, 2  ;;  %v2816_v61 = vrot.slane %v2815_v23, 2 }
 0x30e   : > { %v2727_v43 = vadd.f32 %v2726_v3, %v2725_v14  ;;  %v2828_v32 = vrot.slane %v2827_v21, 2  ;;  %v2822_v48 = vrot.slane %v2821_v42, 2  ;;  %v2833_v26 = vadd.f32 %v2832_v17, %v2165_v59  ;;  %v7547_v14 = vld [vmem:[#allocation58_spill] sm:$0xff] }
 0x30f   : > { %v2723_v18 = vadd.f32 %v2722_v63, %v2721_v56  ;;  %v2734_v28 = vrot.slane %v2733_v6, 1  ;;  %v2739_v52 = vadd.f32 %v2738_v15, %v2737_v34  ;;  %v2817_v22 = vadd.f32 %v2816_v61, %v2815_v23  ;;  %v7550_v23 = vld [vmem:[#allocation61_spill] sm:$0xff] }
 0x310   : > { %v2728_v9 = vrot.slane %v2727_v43, 1  ;;  %v2829_v36 = vadd.f32 %v2828_v32, %v2827_v21  ;;  %v2823_v13 = vadd.f32 %v2822_v48, %v2821_v42  ;;  %v2834_v10 = vrot.slane %v2833_v26, 2  ;;  %v7551_v21 = vld [vmem:[#allocation62_spill] sm:$0xff]  ;;  %v7552_v48 = vld [vmem:[#allocation63_spill] sm:$0xff] }
 0x311   : > { %v3700_v62 = vsel %vm3612_vm3, %v2723_v18, %v3699_v4  ;;  %v2735_v46 = vadd.f32 %v2734_v28, %v2733_v6  ;;  %v2740_v37 = vrot.slane %v2739_v52, 1  ;;  %v2818_v54 = vrot.slane %v2817_v22, 1 }
 0x312   : > { %v2729_v57 = vadd.f32 %v2728_v9, %v2727_v43  ;;  %v2830_v31 = vrot.slane %v2829_v36, 1  ;;  %v2824_v55 = vrot.slane %v2823_v13, 1  ;;  %v2835_v7 = vadd.f32 %v2834_v10, %v2833_v26 }
 0x313   : > { %v3714_v49 = vsel %vm3612_vm3, %v2735_v46, %v3713_v38  ;;  %v2741_v2 = vadd.f32 %v2740_v37, %v2739_v52  ;;  %v2819_v35 = vadd.f32 %v2818_v54, %v2817_v22  ;;  %v2178_v0 = vmul.f32 %v7079_v25, %v7545_v40 }
 0x314   : > { %v3707_v5 = vsel %vm3612_vm3, %v2729_v57, %v3706_v51  ;;  %v2831_v24 = vadd.f32 %v2830_v31, %v2829_v36  ;;  %v2825_v45 = vadd.f32 %v2824_v55, %v2823_v13  ;;  %v2836_v20 = vrot.slane %v2835_v7, 1 }
 0x315   : > { %v3721_v4 = vsel %vm3612_vm3, %v2741_v2, %v3720_v1  ;;  %v3701_v50 = vsel %vm3614_vm4, %v2819_v35, %v3700_v62  ;;  %v2910_v12 = vrot.slane %v2178_v0, 4  ;;  %v2180_v16 = vmul.f32 %v7081_v27, %v7546_v44  ;;  %v7549_v1 = vld [vmem:[#allocation60_spill] sm:$0xff] }
 0x316   : > { %v3715_v38 = vsel %vm3614_vm4, %v2831_v24, %v3714_v49  ;;  %v3708_v47 = vsel %vm3614_vm4, %v2825_v45, %v3707_v5  ;;  %v2837_v53 = vadd.f32 %v2836_v20, %v2835_v7  ;;  %v2179_v19 = vmul.f32 %v7083_v60, %v7547_v14 }
 0x317   : > { %v2911_v51 = vadd.f32 %v2910_v12, %v2178_v0  ;;  %v2922_v29 = vrot.slane %v2180_v16, 4  ;;  %v2181_v59 = vmul.f32 %v7095_v30, %v7548_v41  ;;  %v2194_v56 = vmul.f32 %v7079_v25, %v7549_v1 }
 0x318   : > { %v3722_v33 = vsel %vm3614_vm4, %v2837_v53, %v3721_v4  ;;  %v2916_v34 = vrot.slane %v2179_v19, 4  ;;  %v2196_v3 = vmul.f32 %v7081_v27, %v7550_v23  ;;  %v2195_v42 = vmul.f32 %v7083_v60, %v7551_v21 }
 0x319   : > { %v2912_v17 = vrot.slane %v2911_v51, 2  ;;  %v2923_v63 = vadd.f32 %v2922_v29, %v2180_v16  ;;  %v2928_v6 = vrot.slane %v2181_v59, 4  ;;  %v3006_v15 = vrot.slane %v2194_v56, 4 }
 0x31a   : > { %v2917_v61 = vadd.f32 %v2916_v34, %v2179_v19  ;;  %v3018_v43 = vrot.slane %v2196_v3, 4  ;;  %v3012_v32 = vrot.slane %v2195_v42, 4  ;;  %v2197_v26 = vmul.f32 %v7095_v30, %v7552_v48 }
 0x31b   : > { %v2913_v18 = vadd.f32 %v2912_v17, %v2911_v51  ;;  %v2924_v28 = vrot.slane %v2923_v63, 2  ;;  %v2929_v52 = vadd.f32 %v2928_v6, %v2181_v59  ;;  %v3007_v22 = vadd.f32 %v3006_v15, %v2194_v56  ;;  %v7553_v15 = vld [vmem:[#allocation34_spill] sm:$0xff] }
 0x31c   : > { %v2918_v9 = vrot.slane %v2917_v61, 2  ;;  %v3019_v36 = vadd.f32 %v3018_v43, %v2196_v3  ;;  %v3013_v13 = vadd.f32 %v3012_v32, %v2195_v42  ;;  %v3024_v10 = vrot.slane %v2197_v26, 4  ;;  %v7554_v32 = vld [vmem:[#allocation64_spill] sm:$0xff] }
 0x31d   : > { %v2914_v62 = vrot.slane %v2913_v18, 1  ;;  %v2925_v46 = vadd.f32 %v2924_v28, %v2923_v63  ;;  %v2930_v37 = vrot.slane %v2929_v52, 2  ;;  %v3008_v54 = vrot.slane %v3007_v22, 2 }
 0x31e   : > { %v2919_v57 = vadd.f32 %v2918_v9, %v2917_v61  ;;  %v3020_v31 = vrot.slane %v3019_v36, 2  ;;  %v3014_v55 = vrot.slane %v3013_v13, 2  ;;  %v3025_v7 = vadd.f32 %v3024_v10, %v2197_v26  ;;  %v7555_v26 = vld [vmem:[#allocation65_spill] sm:$0xff] }
 0x31f   : > { %v2915_v49 = vadd.f32 %v2914_v62, %v2913_v18  ;;  %v2926_v2 = vrot.slane %v2925_v46, 1  ;;  %v2931_v35 = vadd.f32 %v2930_v37, %v2929_v52  ;;  %v3009_v40 = vadd.f32 %v3008_v54, %v3007_v22 }
 0x320   : > { %v2920_v0 = vrot.slane %v2919_v57, 1  ;;  %v3021_v5 = vadd.f32 %v3020_v31, %v3019_v36  ;;  %v3015_v24 = vadd.f32 %v3014_v55, %v3013_v13  ;;  %v3026_v45 = vrot.slane %v3025_v7, 2  ;;  %v7556_v13 = vld [vmem:[#allocation66_spill] sm:$0xff] }
 0x321   : > { %v3702_v20 = vsel %vm3616_vm5, %v2915_v49, %v3701_v50  ;;  %v2927_v4 = vadd.f32 %v2926_v2, %v2925_v46  ;;  %v2932_v12 = vrot.slane %v2931_v35, 1  ;;  %v3010_v44 = vrot.slane %v3009_v40, 1 }
 0x322   : > { %v2921_v16 = vadd.f32 %v2920_v0, %v2919_v57  ;;  %v3022_v53 = vrot.slane %v3021_v5, 1  ;;  %v3016_v14 = vrot.slane %v3015_v24, 1  ;;  %v3027_v19 = vadd.f32 %v3026_v45, %v3025_v7 }
 0x323   : > { %v3716_v51 = vsel %vm3616_vm5, %v2927_v4, %v3715_v38  ;;  %v2933_v29 = vadd.f32 %v2932_v12, %v2931_v35  ;;  %v3011_v41 = vadd.f32 %v3010_v44, %v3009_v40  ;;  %v2210_v59 = vmul.f32 %v7079_v25, %v6906_v8 }
 0x324   : > { %v3709_v1 = vsel %vm3616_vm5, %v2921_v16, %v3708_v47  ;;  %v3023_v50 = vadd.f32 %v3022_v53, %v3021_v5  ;;  %v3017_v56 = vadd.f32 %v3016_v14, %v3015_v24  ;;  %v3028_v34 = vrot.slane %v3027_v19, 1 }
 0x325   : > { %v3723_v23 = vsel %vm3616_vm5, %v2933_v29, %v3722_v33  ;;  %v3703_v3 = vsel %vm3618_vm6, %v3011_v41, %v3702_v20  ;;  %v3102_v21 = vrot.slane %v2210_v59, 4  ;;  %v2212_v38 = vmul.f32 %v7081_v27, %v6916_v58 }
 0x326   : > { %3817 = vst [vmem:[%s6377_s5 + $0x60] sm:$0xff] %v3703_v3  ;;  %v3717_v42 = vsel %vm3618_vm6, %v3023_v50, %v3716_v51  ;;  %v3710_v17 = vsel %vm3618_vm6, %v3017_v56, %v3709_v1  ;;  %v3029_v8 = vadd.f32 %v3028_v34, %v3027_v19  ;;  %v2211_v47 = vmul.f32 %v7083_v60, %v6942_v11 }
 0x327   : > { %3819 = vst [vmem:[%s6377_s5 + $0x70] sm:$0xff] %v3717_v42  ;;  %3818 = vst [vmem:[%s6377_s5 + $0x68] sm:$0xff] %v3710_v17  ;;  %v3103_v63 = vadd.f32 %v3102_v21, %v2210_v59  ;;  %v3114_v33 = vrot.slane %v2212_v38, 4  ;;  %v2213_v6 = vmul.f32 %v7095_v30, %v6944_v39  ;;  %v2226_v58 = vmul.f32 %v7079_v25, %v7553_v15  ;;  %v7557_v59 = vld [vmem:[#allocation67_spill] sm:$0xff]  ;;  %v7558_v42 = vld [vmem:[#allocation68_spill] sm:$0xff] }
 0x328   : > { %v3724_v61 = vsel %vm3618_vm6, %v3029_v8, %v3723_v23  ;;  %v3108_v43 = vrot.slane %v2211_v47, 4  ;;  %v2228_v48 = vmul.f32 %v7081_v27, %v7554_v32  ;;  %v2227_v18 = vmul.f32 %v7083_v60, %v7555_v26 }
 0x329   : > { %3820 = vst [vmem:[%s6377_s5 + $0x78] sm:$0xff] %v3724_v61  ;;  %v3104_v11 = vrot.slane %v3103_v63, 2  ;;  %v3115_v28 = vadd.f32 %v3114_v33, %v2212_v38  ;;  %v3120_v52 = vrot.slane %v2213_v6, 4  ;;  %v3198_v22 = vrot.slane %v2226_v58, 4  ;;  %v7559_v33 = vld [vmem:[#allocation35_spill] sm:$0xff] }
 0x32a   : > { %v3109_v9 = vadd.f32 %v3108_v43, %v2211_v47  ;;  %v3210_v36 = vrot.slane %v2228_v48, 4  ;;  %v3204_v39 = vrot.slane %v2227_v18, 4  ;;  %v2229_v10 = vmul.f32 %v7095_v30, %v7556_v13  ;;  %v7560_v43 = vld [vmem:[#allocation36_spill] sm:$0xff] }
 0x32b   : > { %v3105_v62 = vadd.f32 %v3104_v11, %v3103_v63  ;;  %v3116_v46 = vrot.slane %v3115_v28, 2  ;;  %v3121_v37 = vadd.f32 %v3120_v52, %v2213_v6  ;;  %v3199_v54 = vadd.f32 %v3198_v22, %v2226_v58 }
 0x32c   : > { %v3110_v57 = vrot.slane %v3109_v9, 2  ;;  %v3211_v31 = vadd.f32 %v3210_v36, %v2228_v48  ;;  %v3205_v55 = vadd.f32 %v3204_v39, %v2227_v18  ;;  %v3216_v7 = vrot.slane %v2229_v10, 4 }
 0x32d   : > { %v3106_v49 = vrot.slane %v3105_v62, 1  ;;  %v3117_v2 = vadd.f32 %v3116_v46, %v3115_v28  ;;  %v3122_v35 = vrot.slane %v3121_v37, 2  ;;  %v3200_v40 = vrot.slane %v3199_v54, 2  ;;  %v7563_v46 = vld [vmem:[#allocation22_spill] sm:$0xff] }
 0x32e   : > { %v3111_v0 = vadd.f32 %v3110_v57, %v3109_v9  ;;  %v3212_v5 = vrot.slane %v3211_v31, 2  ;;  %v3206_v24 = vrot.slane %v3205_v55, 2  ;;  %v3217_v45 = vadd.f32 %v3216_v7, %v2229_v10  ;;  %v7561_v9 = vld [vmem:[#allocation37_spill] sm:$0xff]  ;;  %v7562_v10 = vld [vmem:[#allocation38_spill] sm:$0xff] }
 0x32f   : > { %v3107_v20 = vadd.f32 %v3106_v49, %v3105_v62  ;;  %v3118_v4 = vrot.slane %v3117_v2, 1  ;;  %v3123_v12 = vadd.f32 %v3122_v35, %v3121_v37  ;;  %v3201_v44 = vadd.f32 %v3200_v40, %v3199_v54  ;;  %v7564_v35 = vld [vmem:[#allocation23_spill] sm:$0xff] }
 0x330   : > { %v3112_v16 = vrot.slane %v3111_v0, 1  ;;  %v3213_v53 = vadd.f32 %v3212_v5, %v3211_v31  ;;  %v3207_v14 = vadd.f32 %v3206_v24, %v3205_v55  ;;  %v3218_v19 = vrot.slane %v3217_v45, 2 }
 0x331   : > { %v3119_v51 = vadd.f32 %v3118_v4, %v3117_v2  ;;  %v3124_v29 = vrot.slane %v3123_v12, 1  ;;  %v3202_v41 = vrot.slane %v3201_v44, 1  ;;  %v2242_v1 = vmul.f32 %v7079_v25, %v7557_v59 }
 0x332   : > { %v3113_v50 = vadd.f32 %v3112_v16, %v3111_v0  ;;  %v3214_v56 = vrot.slane %v3213_v53, 1  ;;  %v3208_v34 = vrot.slane %v3207_v14, 1  ;;  %v3219_v23 = vadd.f32 %v3218_v19, %v3217_v45 }
 0x333   : > { %v3125_v3 = vadd.f32 %v3124_v29, %v3123_v12  ;;  %v3203_v21 = vadd.f32 %v3202_v41, %v3201_v44  ;;  %v3294_v38 = vrot.slane %v2242_v1, 4  ;;  %v2244_v17 = vmul.f32 %v7081_v27, %v7558_v42 }
 0x334   : > { %v3215_v8 = vadd.f32 %v3214_v56, %v3213_v53  ;;  %v3209_v47 = vadd.f32 %v3208_v34, %v3207_v14  ;;  %v3220_v63 = vrot.slane %v3219_v23, 1  ;;  %v2243_v6 = vmul.f32 %v7083_v60, %v7559_v33 }
 0x335   : > { %v3761_v15 = vsel %vm3606_vm0, %v3203_v21, %v3107_v20  ;;  %v3295_v58 = vadd.f32 %v3294_v38, %v2242_v1  ;;  %v3306_v61 = vrot.slane %v2244_v17, 4  ;;  %v2245_v32 = vmul.f32 %v7095_v30, %v7560_v43 }
 0x336   : > { %v3767_v48 = vsel %vm3606_vm0, %v3215_v8, %v3119_v51  ;;  %v3764_v26 = vsel %vm3606_vm0, %v3209_v47, %v3113_v50  ;;  %v3221_v18 = vadd.f32 %v3220_v63, %v3219_v23  ;;  %v3300_v11 = vrot.slane %v2243_v6, 4 }
 0x337   : > { %v3296_v28 = vrot.slane %v3295_v58, 2  ;;  %v3307_v52 = vadd.f32 %v3306_v61, %v2244_v17  ;;  %v3312_v22 = vrot.slane %v2245_v32, 4  ;;  %v2258_v36 = vmul.f32 %v7079_v25, %v7561_v9  ;;  %v3873_v9 = vld [vmem:[%s6377_s5 + $0x30] sm:$0xff] (%p7565_p5) }
 0x338   : > { %v3770_v39 = vsel %vm3606_vm0, %v3221_v18, %v3125_v3  ;;  %v3301_v13 = vadd.f32 %v3300_v11, %v2243_v6  ;;  %v2260_v62 = vmul.f32 %v7081_v27, %v7562_v10  ;;  %v2259_v37 = vmul.f32 %v7083_v60, %v7563_v46  ;;  %v3863_v18 = vld [vmem:[%s6377_s5 + $0x8] sm:$0xff] (%p7565_p5)  ;;  %v3865_v11 = vld [vmem:[%s6377_s5 + $0x10] sm:$0xff] (%p7565_p5)  ;;  %3874 = vst [vmem:[%s7247_s18 + $0x30] sm:$0xff] (%p7565_p5), %v3873_v9  ;;  %v3885_v46 = vld [vmem:[%s6377_s5 + $0x60] sm:$0xff] (%p7565_p5) }
 0x339   : > { %v3297_v54 = vadd.f32 %v3296_v28, %v3295_v58  ;;  %v3308_v57 = vrot.slane %v3307_v52, 2  ;;  %v3313_v31 = vadd.f32 %v3312_v22, %v2245_v32  ;;  %v3390_v55 = vrot.slane %v2258_v36, 4  ;;  %v3867_v28 = vld [vmem:[%s6377_s5 + $0x18] sm:$0xff] (%p7565_p5)  ;;  %v3871_v22 = vld [vmem:[%s6377_s5 + $0x28] sm:$0xff] (%p7565_p5)  ;;  %v3881_v10 = vld [vmem:[%s6377_s5 + $0x50] sm:$0xff] (%p7565_p5)  ;;  %3864 = vst [vmem:[%s7247_s18 + $0x8] sm:$0xff] (%p7565_p5), %v3863_v18 }
 0x33a   : > { %v3302_v7 = vrot.slane %v3301_v13, 2  ;;  %v3402_v49 = vrot.slane %v2260_v62, 4  ;;  %v3396_v2 = vrot.slane %v2259_v37, 4  ;;  %v2261_v40 = vmul.f32 %v7095_v30, %v7564_v35  ;;  %3866 = vst [vmem:[%s7247_s18 + $0x10] sm:$0xff] (%p7565_p5), %v3865_v11  ;;  %3868 = vst [vmem:[%s7247_s18 + $0x18] sm:$0xff] (%p7565_p5), %v3867_v28  ;;  %v3903_v35 = vld [vmem:[%s6377_s5 + $0xa8] sm:$0xff] (%p7565_p5) }
 0x33b   : > { %v3298_v25 = vrot.slane %v3297_v54, 1  ;;  %v3309_v0 = vadd.f32 %v3308_v57, %v3307_v52  ;;  %v3314_v5 = vrot.slane %v3313_v31, 2  ;;  %v3391_v24 = vadd.f32 %v3390_v55, %v2258_v36  ;;  %v3869_v52 = vld [vmem:[%s6377_s5 + $0x20] sm:$0xff] (%p7565_p5)  ;;  %v3875_v36 = vld [vmem:[%s6377_s5 + $0x38] sm:$0xff] (%p7565_p5)  ;;  %3872 = vst [vmem:[%s7247_s18 + $0x28] sm:$0xff] (%p7565_p5), %v3871_v22  ;;  %3882 = vst [vmem:[%s7247_s18 + $0x50] sm:$0xff] (%p7565_p5), %v3881_v10 }
 0x33c   : > { %v3303_v45 = vadd.f32 %v3302_v7, %v3301_v13  ;;  %v3403_v20 = vadd.f32 %v3402_v49, %v2260_v62  ;;  %v3397_v27 = vadd.f32 %v3396_v2, %v2259_v37  ;;  %v3408_v4 = vrot.slane %v2261_v40, 4  ;;  %v3879_v13 = vld [vmem:[%s6377_s5 + $0x48] sm:$0xff] (%p7565_p5)  ;;  %v3883_v62 = vld [vmem:[%s6377_s5 + $0x58] sm:$0xff] (%p7565_p5)  ;;  %3870 = vst [vmem:[%s7247_s18 + $0x20] sm:$0xff] (%p7565_p5), %v3869_v52  ;;  %3876 = vst [vmem:[%s7247_s18 + $0x38] sm:$0xff] (%p7565_p5), %v3875_v36 }
 0x33d   : > { %v3299_v12 = vadd.f32 %v3298_v25, %v3297_v54  ;;  %v3310_v60 = vrot.slane %v3309_v0, 1  ;;  %v3315_v44 = vadd.f32 %v3314_v5, %v3313_v31  ;;  %v3392_v16 = vrot.slane %v3391_v24, 2  ;;  %3880 = vst [vmem:[%s7247_s18 + $0x48] sm:$0xff] (%p7565_p5), %v3879_v13  ;;  %3884 = vst [vmem:[%s7247_s18 + $0x58] sm:$0xff] (%p7565_p5), %v3883_v62  ;;  %v3887_v37 = vld [vmem:[%s6377_s5 + $0x68] sm:$0xff] (%p7565_p5)  ;;  %v3889_v54 = vld [vmem:[%s6377_s5 + $0x70] sm:$0xff] (%p7565_p5) }
 0x33e   : > { %v3304_v53 = vrot.slane %v3303_v45, 1  ;;  %v3404_v14 = vrot.slane %v3403_v20, 2  ;;  %v3398_v19 = vrot.slane %v3397_v27, 2  ;;  %v3409_v51 = vadd.f32 %v3408_v4, %v2261_v40  ;;  %3886 = vst [vmem:[%s7247_s18 + $0x60] sm:$0xff] (%p7565_p5), %v3885_v46  ;;  %3888 = vst [vmem:[%s7247_s18 + $0x68] sm:$0xff] (%p7565_p5), %v3887_v37  ;;  %v3891_v57 = vld [vmem:[%s6377_s5 + $0x78] sm:$0xff] (%p7565_p5) }
 0x33f   : > { %v3762_v29 = vsel %vm3608_vm1, %v3299_v12, %v3761_v15  ;;  %v3311_v41 = vadd.f32 %v3310_v60, %v3309_v0  ;;  %v3316_v30 = vrot.slane %v3315_v44, 1  ;;  %v3393_v59 = vadd.f32 %v3392_v16, %v3391_v24  ;;  %3890 = vst [vmem:[%s7247_s18 + $0x70] sm:$0xff] (%p7565_p5), %v3889_v54  ;;  %v3893_v31 = vld [vmem:[%s6377_s5 + $0x80] sm:$0xff] (%p7565_p5)  ;;  %v3895_v55 = vld [vmem:[%s6377_s5 + $0x88] sm:$0xff] (%p7565_p5)  ;;  %3892 = vst [vmem:[%s7247_s18 + $0x78] sm:$0xff] (%p7565_p5), %v3891_v57 }
 0x340   : > { %v3305_v1 = vadd.f32 %v3304_v53, %v3303_v45  ;;  %v3405_v50 = vadd.f32 %v3404_v14, %v3403_v20  ;;  %v3399_v56 = vadd.f32 %v3398_v19, %v3397_v27  ;;  %v3410_v34 = vrot.slane %v3409_v51, 2  ;;  %3894 = vst [vmem:[%s7247_s18 + $0x100] sm:$0xff] (%p7565_p5), %v3893_v31  ;;  %3896 = vst [vmem:[%s7247_s18 + $0x108] sm:$0xff] (%p7565_p5), %v3895_v55  ;;  %v3897_v7 = vld [vmem:[%s6377_s5 + $0x90] sm:$0xff] (%p7565_p5)  ;;  %v3899_v49 = vld [vmem:[%s6377_s5 + $0x98] sm:$0xff] (%p7565_p5) }
 0x341   : > { %v3768_v23 = vsel %vm3608_vm1, %v3311_v41, %v3767_v48  ;;  %v3317_v3 = vadd.f32 %v3316_v30, %v3315_v44  ;;  %v3394_v21 = vrot.slane %v3393_v59, 1  ;;  %v3901_v2 = vld [vmem:[%s6377_s5 + $0xa0] sm:$0xff] (%p7565_p5)  ;;  %3898 = vst [vmem:[%s7247_s18 + $0x110] sm:$0xff] (%p7565_p5), %v3897_v7  ;;  %3900 = vst [vmem:[%s7247_s18 + $0x118] sm:$0xff] (%p7565_p5), %v3899_v49  ;;  %v3905_v40 = vld [vmem:[%s6377_s5 + $0xb0] sm:$0xff] (%p7565_p5) }
 0x342   : > { %v3765_v38 = vsel %vm3608_vm1, %v3305_v1, %v3764_v26  ;;  %v3406_v42 = vrot.slane %v3405_v50, 1  ;;  %v3400_v17 = vrot.slane %v3399_v56, 1  ;;  %v3411_v8 = vadd.f32 %v3410_v34, %v3409_v51  ;;  %v3861_v26 = vld [vmem:[%s6377_s5] sm:$0xff] (%p7565_p5)  ;;  %3902 = vst [vmem:[%s7247_s18 + $0x120] sm:$0xff] (%p7565_p5), %v3901_v2  ;;  %v3907_v25 = vld [vmem:[%s6377_s5 + $0xb8] sm:$0xff] (%p7565_p5)  ;;  %3904 = vst [vmem:[%s7247_s18 + $0x128] sm:$0xff] (%p7565_p5), %v3903_v35 }
 0x343   : > { %v3771_v47 = vsel %vm3608_vm1, %v3317_v3, %v3770_v39  ;;  %v3395_v63 = vadd.f32 %v3394_v21, %v3393_v59  ;;  %3843 = sbr.rel (!%p7565_p5) target bundleno = 850 (0x352), region = 48  ;;  %v3877_v39 = vld [vmem:[%s6377_s5 + $0x40] sm:$0xff] (%p7565_p5)  ;;  %3862 = vst [vmem:[%s7247_s18] sm:$0xff] (%p7565_p5), %v3861_v26  ;;  %3906 = vst [vmem:[%s7247_s18 + $0x130] sm:$0xff] (%p7565_p5), %v3905_v40  ;;  %v3911_v5 = vld [vmem:[%s6377_s5 + $0xc8] sm:$0xff] (%p7565_p5) }
 0x344   : > { %v3407_v33 = vadd.f32 %v3406_v42, %v3405_v50  ;;  %v3401_v6 = vadd.f32 %v3400_v17, %v3399_v56  ;;  %v3412_v15 = vrot.slane %v3411_v8, 1  ;;  %3878 = vst [vmem:[%s7247_s18 + $0x40] sm:$0xff] (%p7565_p5), %v3877_v39  ;;  %3908 = vst [vmem:[%s7247_s18 + $0x138] sm:$0xff] (%p7565_p5), %v3907_v25  ;;  %v3909_v0 = vld [vmem:[%s6377_s5 + $0xc0] sm:$0xff] (%p7565_p5)  ;;  %v3913_v24 = vld [vmem:[%s6377_s5 + $0xd0] sm:$0xff] (%p7565_p5) }
 0x345   : > { %v3763_v58 = vsel %vm3610_vm2, %v3395_v63, %v3762_v29  ;;  %3910 = vst [vmem:[%s7247_s18 + $0x140] sm:$0xff] (%p7565_p5), %v3909_v0  ;;  %3912 = vst [vmem:[%s7247_s18 + $0x148] sm:$0xff] (%p7565_p5), %v3911_v5  ;;  %v3915_v45 = vld [vmem:[%s6377_s5 + $0xd8] sm:$0xff] (%p7565_p5) }
 0x346   : > { %3833 = vst [vmem:[%s6377_s5 + $0xe0] sm:$0xf] %v3763_v58  ;;  %v3769_v61 = vsel %vm3610_vm2, %v3407_v33, %v3768_v23  ;;  %v3766_v43 = vsel %vm3610_vm2, %v3401_v6, %v3765_v38  ;;  %v3413_v32 = vadd.f32 %v3412_v15, %v3411_v8  ;;  %3914 = vst [vmem:[%s7247_s18 + $0x150] sm:$0xff] (%p7565_p5), %v3913_v24 }
 0x347   : > { %3835 = vst [vmem:[%s6377_s5 + $0xf0] sm:$0xf] %v3769_v61  ;;  %3834 = vst [vmem:[%s6377_s5 + $0xe8] sm:$0xf] %v3766_v43 }
 0x348   : > { %v3772_v48 = vsel %vm3610_vm2, %v3413_v32, %v3771_v47  ;;  %3916 = vst [vmem:[%s7247_s18 + $0x158] sm:$0xff] (%p7565_p5), %v3915_v45 }
 0x349   : > { %3836 = vst [vmem:[%s6377_s5 + $0xf8] sm:$0xf] %v3772_v48 }
 0x34d   : > { %v3917_v20 = vld [vmem:[%s6377_s5 + $0xe0] sm:$0xff] }
 0x34e   : > { %v3919_v27 = vld [vmem:[%s6377_s5 + $0xe8] sm:$0xff]  ;;  %3918 = vst [vmem:[%s7247_s18 + $0x160] sm:$0xff] %v3917_v20  ;;  %v3921_v4 = vld [vmem:[%s6377_s5 + $0xf0] sm:$0xff] }
 0x34f   : > { %3920 = vst [vmem:[%s7247_s18 + $0x168] sm:$0xff] %v3919_v27  ;;  %3922 = vst [vmem:[%s7247_s18 + $0x170] sm:$0xff] %v3921_v4 }
 0x350   : > { %v3923_v12 = vld [vmem:[%s6377_s5 + $0xf8] sm:$0xff] }
 0x351   : > { %3924 = vst [vmem:[%s7247_s18 + $0x178] sm:$0xff] %v3923_v12 }
 0x352 PF: > { %s19_s25 = sadd.s32 1, %s4960_s25   ;;  %s7570_s0 = sld [smem:[#allocation16_spill]] }
 0x353   : > { %p7305_p4 = scmp.ge.s32.totalorder %s19_s25, 6   ;;  %s7571_s27 = sld [smem:[#allocation17_spill]] }
 0x354   : > { %s7572_s3 = sld [smem:[#allocation19_spill]]  ;;  %s7573_s21 = sld [smem:[#allocation13_spill]] }
 0x355   : > { %s7574_s23 = sld [smem:[#allocation14_spill]]  ;;  %s7575_s11 = sld [smem:[#allocation15_spill]] }
 0x356   : > { %s7576_s12 = smov %s4912_s13  ;;  %s7577_s13 = smov %s4916_s14 }
 0x357   : > { %s7579_s15 = smov %s4924_s16  ;;  %s7580_s16 = smov %s4928_s17 }
 0x358   : > { %s7578_s14 = smov %s7570_s0  ;;  %s7582_s18 = smov %s4936_s19 }
 0x359   : > { %s7581_s17 = smov %s7571_s27  ;;  %s7583_s19 = smov %s4940_s20 }
 0x35a   : > { %s7584_s20 = smov %s7572_s3  ;;  %s7585_s22 = smov %s4956_s24 }
 0x35b   : > { %s7586_s24 = smov %s7575_s11  ;;  %18 = sbr.rel (!%p7305_p4) target bundleno = 14 (0xe), region = 119 }
 0x362   :  { %3940 = vsyncpa [#allocation3], 1 }
 0x363   :  { %3942 = vsyncpa [#allocation3 + $0x1], 1 }
 0x364   :  { %3943 = vsyncpa [#allocation5], 1 }
 0x365   :  { %3945 = vsyncpa [#allocation5 + $0x1], 1 }

</bundles_post_ra>
